<compile_context>
chip_gen: v5e
topology: v5e:2x2
jax: 0.10.0
libtpu: 0.0.40
codegen_flags: <defaults>
</compile_context>

<pallas_src>
import functools

import jax
import jax.numpy as jnp
from jax.experimental import pallas as pl
from jax.experimental.pallas import tpu as pltpu


def _spatial_attention_kernel(w_ref, x_ref, o_ref, pbuf_ref,
                              *, C, H, W, K, PAD, Bt):
    # w_ref:    (2*K*K,) SMEM  -- conv weights, scalar reads
    # x_ref:    (Bt, C, H*W) VMEM block (lane-dense spatial layout)
    # o_ref:    (Bt, C, H*W) VMEM output block
    # pbuf_ref: (2, L) VMEM scratch -- row-zero-padded flat pooled maps
    HW = H * W
    off0 = PAD * W + PAD          # start of real data inside the padded buffer
    CH = 8                        # channel chunk (one sublane group)

    # Zero only the two pad-border strips (tiny); the interior is fully
    # overwritten below for every batch element. Done per grid step so it stays
    # correct if the (parallel) batch axis is sharded across cores.
    pbuf_ref[:, pl.ds(0, off0)] = jnp.zeros((2, off0), jnp.float32)
    pbuf_ref[:, pl.ds(off0 + HW, off0)] = jnp.zeros((2, off0), jnp.float32)

    # Column-validity masks for the flattened conv: a horizontal tap offset dj
    # is valid at flat position p iff 0 <= (p % W) + dj < W. Hoisted out of all
    # loops (7 masks total).
    col = jax.lax.broadcasted_iota(jnp.int32, (1, HW), 1) % W
    col_masks = [((col + dj >= 0) & (col + dj < W)).astype(jnp.float32)
                 for dj in range(-PAD, PAD + 1)]

    for b in range(Bt):
        # ---- channel pooling, streamed in <=8-channel chunks (lane dense) ----
        x_max = None
        x_sum = None
        for c0 in range(0, C, CH):
            cw = min(CH, C - c0)
            xs = x_ref[b, c0:c0 + cw, :].astype(jnp.float32)   # (cw, HW)
            cm = jnp.max(xs, axis=0, keepdims=True)            # (1, HW)
            cs = jnp.sum(xs, axis=0, keepdims=True)            # (1, HW)
            x_max = cm if x_max is None else jnp.maximum(x_max, cm)
            x_sum = cs if x_sum is None else x_sum + cs
        x_avg = x_sum * (1.0 / C)

        # Write pooled maps into the row-padded flat scratch (interior only).
        pbuf_ref[pl.ds(0, 1), pl.ds(off0, HW)] = x_max
        pbuf_ref[pl.ds(1, 1), pl.ds(off0, HW)] = x_avg

        # ---- 7x7 conv (padding=PAD, stride=1) as 2*K*K shifted MACs ----------
        # out[p] = sum_{c,di,dj} w[c,di,dj] * padded_c[p + di*W + dj] * mask(dj)
        # SMEM scalar weights; 4 independent accumulators for ILP.
        accs = [jnp.zeros((1, HW), jnp.float32) for _ in range(4)]
        t = 0
        for j, dj in enumerate(range(-PAD, PAD + 1)):
            mask = col_masks[j]
            for c in range(2):
                part = None
                for di in range(-PAD, PAD + 1):
                    s = off0 + di * W + dj                       # static offset
                    tap = pbuf_ref[pl.ds(c, 1), pl.ds(s, HW)]    # (1, HW)
                    wv = w_ref[c * K * K + (di + PAD) * K + (dj + PAD)]
                    term = wv * tap
                    part = term if part is None else part + term
                accs[t % 4] = accs[t % 4] + part * mask
                t += 1
        attn = jax.nn.sigmoid((accs[0] + accs[1]) + (accs[2] + accs[3]))  # (1,HW)

        # ---- apply attention and store, streamed in <=8-channel chunks -------
        for c0 in range(0, C, CH):
            cw = min(CH, C - c0)
            xs = x_ref[b, c0:c0 + cw, :].astype(jnp.float32)
            o_ref[b, c0:c0 + cw, :] = (xs * attn).astype(o_ref.dtype)


def spatial_attention(x, w):
    """x: (B, C, H, W), w: (1, 2, K, K) -> (B, C, H, W)."""
    B, C, H, W = x.shape
    K = w.shape[-1]
    PAD = K // 2
    HW = H * W
    L = HW + 2 * PAD * W + 2 * PAD     # flat padded pooled-map length

    # Lane-dense views (free reshapes on contiguous dims).
    x_flat = x.reshape(B, C, HW)
    w_flat = w.reshape(-1).astype(jnp.float32)      # (2*K*K,) for SMEM scalars

    # Block as many batch elements per grid step as a modest VMEM budget allows
    # (in + out block, double-buffered by the pipeline; keep headroom for v7x).
    per_b = 2 * C * HW * jnp.dtype(x.dtype).itemsize
    max_bt = max(1, (8 * 1024 * 1024) // per_b)
    Bt = 1
    for cand in range(min(B, max_bt), 0, -1):
        if B % cand == 0:
            Bt = cand
            break

    kernel = functools.partial(_spatial_attention_kernel,
                               C=C, H=H, W=W, K=K, PAD=PAD, Bt=Bt)

    out_flat = pl.pallas_call(
        kernel,
        out_shape=jax.ShapeDtypeStruct((B, C, HW), x.dtype),
        grid=(B // Bt,),
        in_specs=[
            pl.BlockSpec(memory_space=pltpu.MemorySpace.SMEM),        # weights
            pl.BlockSpec((Bt, C, HW), lambda b: (b, 0, 0)),           # x block
        ],
        out_specs=pl.BlockSpec((Bt, C, HW), lambda b: (b, 0, 0)),
        scratch_shapes=[pltpu.VMEM((2, L), jnp.float32)],
        compiler_params=pltpu.CompilerParams(
            dimension_semantics=("parallel",),
            vmem_limit_bytes=32 * 1024 * 1024),
    )(w_flat, x_flat)

    return out_flat.reshape(B, C, H, W)


def _reference(x, w):
    """Pure-JAX reference matching the PyTorch module exactly."""
    x_max = jnp.max(x, axis=1, keepdims=True)
    x_avg = jnp.mean(x, axis=1, keepdims=True)
    cat = jnp.concatenate([x_max, x_avg], axis=1)               # (B, 2, H, W)
    conv = jax.lax.conv_general_dilated(
        cat, w, window_strides=(1, 1), padding="SAME",
        dimension_numbers=("NCHW", "OIHW", "NCHW"),
        precision=jax.lax.Precision.HIGHEST)
    return x * jax.nn.sigmoid(conv)


if __name__ == "__main__":
    key = jax.random.PRNGKey(0)
    kx, kw = jax.random.split(key)

    B, C, H, W = 2, 4, 16, 16
    K = 7

    x = jax.random.normal(kx, (B, C, H, W), dtype=jnp.float32)
    # nn.Conv2d(2, 1, 7, bias=False)-shaped deterministic weights.
    w = 0.1 * jax.random.normal(kw, (1, 2, K, K), dtype=jnp.float32)

    out = spatial_attention(x, w)
    out = jax.block_until_ready(out)

    ref = _reference(x, w)
    assert out.shape == (B, C, H, W)
    assert jnp.allclose(out, ref, atol=1e-5, rtol=1e-5), "mismatch vs reference"

    print("KERNEL_OK")
</pallas_src>

<mosaic_0001>
module attributes {stable_mosaic.version = 11 : i64} {
  func.func @_spatial_attention_kernel(%arg0: i32, %arg1: memref<98xf32, #tpu.memory_space<smem>>, %arg2: memref<2x4x256xf32, #tpu.memory_space<vmem>>, %arg3: memref<2x4x256xf32, #tpu.memory_space<vmem>>, %arg4: memref<2x358xf32, #tpu.memory_space<vmem>>) attributes {dimension_semantics = [#tpu.dimension_semantics<parallel>], iteration_bounds = array<i64: 1>, scalar_prefetch = 0 : i64, scratch_operands = 1 : i64, tpu.core_type = #tpu.core_type<tc>, window_params = [{transform_indices = @transform_0, window_bounds = array<i64: 98>}, {transform_indices = @transform_1, window_bounds = array<i64: 2, 4, 256>}, {transform_indices = @transform_2, window_bounds = array<i64: 2, 4, 256>}]} {
    %cst = arith.constant 0.000000e+00 : f32
    %0 = vector.broadcast %cst : f32 to vector<2x51xf32>
    %c0 = arith.constant 0 : index
    %c0_0 = arith.constant 0 : index
    %1 = vector.load %arg4[%c0, %c0_0] : memref<2x358xf32, #tpu.memory_space<vmem>>, vector<2x51xf32>
    tpu.vector_store %arg4[%c0, %c0_0], %0 {strides = array<i32>} : memref<2x358xf32, #tpu.memory_space<vmem>>, vector<2x51xf32>,
    %cst_1 = arith.constant 0.000000e+00 : f32
    %2 = vector.broadcast %cst_1 : f32 to vector<2x51xf32>
    %c0_2 = arith.constant 0 : index
    %c307 = arith.constant 307 : index
    %3 = vector.load %arg4[%c0_2, %c307] : memref<2x358xf32, #tpu.memory_space<vmem>>, vector<2x51xf32>
    tpu.vector_store %arg4[%c0_2, %c307], %2 {strides = array<i32>} : memref<2x358xf32, #tpu.memory_space<vmem>>, vector<2x51xf32>,
    %4 = tpu.iota {dimensions = array<i32: 1>} : vector<1x256xi32>
    %c16_i32 = arith.constant 16 : i32
    %c0_i32 = arith.constant 0 : i32
    %5 = arith.cmpi eq, %c16_i32, %c0_i32 : i32
    %c1_i32 = arith.constant 1 : i32
    %6 = arith.select %5, %c1_i32, %c16_i32 : i32
    %7 = vector.broadcast %6 : i32 to vector<1x256xi32>
    %8 = arith.remsi %4, %7 : vector<1x256xi32>
    %c0_i32_3 = arith.constant 0 : i32
    %9 = vector.broadcast %c0_i32_3 : i32 to vector<1x256xi32>
    %10 = arith.cmpi ne, %8, %9 : vector<1x256xi32>
    %c0_i32_4 = arith.constant 0 : i32
    %11 = vector.broadcast %c0_i32_4 : i32 to vector<1x256xi32>
    %12 = arith.cmpi slt, %8, %11 : vector<1x256xi32>
    %c0_i32_5 = arith.constant 0 : i32
    %13 = arith.cmpi slt, %6, %c0_i32_5 : i32
    %14 = vector.broadcast %13 : i1 to vector<1x256xi1>
    %15 = vector.broadcast %14 : vector<1x256xi1> to vector<1x256xi1>
    %16 = arith.xori %12, %15 : vector<1x256xi1>
    %17 = arith.andi %16, %10 : vector<1x256xi1>
    %18 = vector.broadcast %6 : i32 to vector<1x256xi32>
    %19 = arith.addi %8, %18 : vector<1x256xi32>
    %20 = arith.select %17, %19, %8 : vector<1x256xi1>, vector<1x256xi32>
    %c-3_i32 = arith.constant -3 : i32
    %21 = vector.broadcast %c-3_i32 : i32 to vector<1x256xi32>
    %22 = arith.addi %20, %21 : vector<1x256xi32>
    %c0_i32_6 = arith.constant 0 : i32
    %23 = vector.broadcast %c0_i32_6 : i32 to vector<1x256xi32>
    %24 = arith.cmpi sge, %22, %23 : vector<1x256xi32>
    %c-3_i32_7 = arith.constant -3 : i32
    %25 = vector.broadcast %c-3_i32_7 : i32 to vector<1x256xi32>
    %26 = arith.addi %20, %25 : vector<1x256xi32>
    %c16_i32_8 = arith.constant 16 : i32
    %27 = vector.broadcast %c16_i32_8 : i32 to vector<1x256xi32>
    %28 = arith.cmpi slt, %26, %27 : vector<1x256xi32>
    %29 = arith.andi %24, %28 : vector<1x256xi1>
    %30 = arith.extui %29 : vector<1x256xi1> to vector<1x256xi32>
    %31 = arith.sitofp %30 : vector<1x256xi32> to vector<1x256xf32>
    %c-2_i32 = arith.constant -2 : i32
    %32 = vector.broadcast %c-2_i32 : i32 to vector<1x256xi32>
    %33 = arith.addi %20, %32 : vector<1x256xi32>
    %c0_i32_9 = arith.constant 0 : i32
    %34 = vector.broadcast %c0_i32_9 : i32 to vector<1x256xi32>
    %35 = arith.cmpi sge, %33, %34 : vector<1x256xi32>
    %c-2_i32_10 = arith.constant -2 : i32
    %36 = vector.broadcast %c-2_i32_10 : i32 to vector<1x256xi32>
    %37 = arith.addi %20, %36 : vector<1x256xi32>
    %c16_i32_11 = arith.constant 16 : i32
    %38 = vector.broadcast %c16_i32_11 : i32 to vector<1x256xi32>
    %39 = arith.cmpi slt, %37, %38 : vector<1x256xi32>
    %40 = arith.andi %35, %39 : vector<1x256xi1>
    %41 = arith.extui %40 : vector<1x256xi1> to vector<1x256xi32>
    %42 = arith.sitofp %41 : vector<1x256xi32> to vector<1x256xf32>
    %c-1_i32 = arith.constant -1 : i32
    %43 = vector.broadcast %c-1_i32 : i32 to vector<1x256xi32>
    %44 = arith.addi %20, %43 : vector<1x256xi32>
    %c0_i32_12 = arith.constant 0 : i32
    %45 = vector.broadcast %c0_i32_12 : i32 to vector<1x256xi32>
    %46 = arith.cmpi sge, %44, %45 : vector<1x256xi32>
    %c-1_i32_13 = arith.constant -1 : i32
    %47 = vector.broadcast %c-1_i32_13 : i32 to vector<1x256xi32>
    %48 = arith.addi %20, %47 : vector<1x256xi32>
    %c16_i32_14 = arith.constant 16 : i32
    %49 = vector.broadcast %c16_i32_14 : i32 to vector<1x256xi32>
    %50 = arith.cmpi slt, %48, %49 : vector<1x256xi32>
    %51 = arith.andi %46, %50 : vector<1x256xi1>
    %52 = arith.extui %51 : vector<1x256xi1> to vector<1x256xi32>
    %53 = arith.sitofp %52 : vector<1x256xi32> to vector<1x256xf32>
    %c0_i32_15 = arith.constant 0 : i32
    %54 = vector.broadcast %c0_i32_15 : i32 to vector<1x256xi32>
    %55 = arith.addi %20, %54 : vector<1x256xi32>
    %c0_i32_16 = arith.constant 0 : i32
    %56 = vector.broadcast %c0_i32_16 : i32 to vector<1x256xi32>
    %57 = arith.cmpi sge, %55, %56 : vector<1x256xi32>
    %c0_i32_17 = arith.constant 0 : i32
    %58 = vector.broadcast %c0_i32_17 : i32 to vector<1x256xi32>
    %59 = arith.addi %20, %58 : vector<1x256xi32>
    %c16_i32_18 = arith.constant 16 : i32
    %60 = vector.broadcast %c16_i32_18 : i32 to vector<1x256xi32>
    %61 = arith.cmpi slt, %59, %60 : vector<1x256xi32>
    %62 = arith.andi %57, %61 : vector<1x256xi1>
    %63 = arith.extui %62 : vector<1x256xi1> to vector<1x256xi32>
    %64 = arith.sitofp %63 : vector<1x256xi32> to vector<1x256xf32>
    %c1_i32_19 = arith.constant 1 : i32
    %65 = vector.broadcast %c1_i32_19 : i32 to vector<1x256xi32>
    %66 = arith.addi %20, %65 : vector<1x256xi32>
    %c0_i32_20 = arith.constant 0 : i32
    %67 = vector.broadcast %c0_i32_20 : i32 to vector<1x256xi32>
    %68 = arith.cmpi sge, %66, %67 : vector<1x256xi32>
    %c1_i32_21 = arith.constant 1 : i32
    %69 = vector.broadcast %c1_i32_21 : i32 to vector<1x256xi32>
    %70 = arith.addi %20, %69 : vector<1x256xi32>
    %c16_i32_22 = arith.constant 16 : i32
    %71 = vector.broadcast %c16_i32_22 : i32 to vector<1x256xi32>
    %72 = arith.cmpi slt, %70, %71 : vector<1x256xi32>
    %73 = arith.andi %68, %72 : vector<1x256xi1>
    %74 = arith.extui %73 : vector<1x256xi1> to vector<1x256xi32>
    %75 = arith.sitofp %74 : vector<1x256xi32> to vector<1x256xf32>
    %c2_i32 = arith.constant 2 : i32
    %76 = vector.broadcast %c2_i32 : i32 to vector<1x256xi32>
    %77 = arith.addi %20, %76 : vector<1x256xi32>
    %c0_i32_23 = arith.constant 0 : i32
    %78 = vector.broadcast %c0_i32_23 : i32 to vector<1x256xi32>
    %79 = arith.cmpi sge, %77, %78 : vector<1x256xi32>
    %c2_i32_24 = arith.constant 2 : i32
    %80 = vector.broadcast %c2_i32_24 : i32 to vector<1x256xi32>
    %81 = arith.addi %20, %80 : vector<1x256xi32>
    %c16_i32_25 = arith.constant 16 : i32
    %82 = vector.broadcast %c16_i32_25 : i32 to vector<1x256xi32>
    %83 = arith.cmpi slt, %81, %82 : vector<1x256xi32>
    %84 = arith.andi %79, %83 : vector<1x256xi1>
    %85 = arith.extui %84 : vector<1x256xi1> to vector<1x256xi32>
    %86 = arith.sitofp %85 : vector<1x256xi32> to vector<1x256xf32>
    %c3_i32 = arith.constant 3 : i32
    %87 = vector.broadcast %c3_i32 : i32 to vector<1x256xi32>
    %88 = arith.addi %20, %87 : vector<1x256xi32>
    %c0_i32_26 = arith.constant 0 : i32
    %89 = vector.broadcast %c0_i32_26 : i32 to vector<1x256xi32>
    %90 = arith.cmpi sge, %88, %89 : vector<1x256xi32>
    %c3_i32_27 = arith.constant 3 : i32
    %91 = vector.broadcast %c3_i32_27 : i32 to vector<1x256xi32>
    %92 = arith.addi %20, %91 : vector<1x256xi32>
    %c16_i32_28 = arith.constant 16 : i32
    %93 = vector.broadcast %c16_i32_28 : i32 to vector<1x256xi32>
    %94 = arith.cmpi slt, %92, %93 : vector<1x256xi32>
    %95 = arith.andi %90, %94 : vector<1x256xi1>
    %96 = arith.extui %95 : vector<1x256xi1> to vector<1x256xi32>
    %97 = arith.sitofp %96 : vector<1x256xi32> to vector<1x256xf32>
    %c0_29 = arith.constant 0 : index
    %c0_30 = arith.constant 0 : index
    %c0_31 = arith.constant 0 : index
    %98 = vector.load %arg2[%c0_29, %c0_30, %c0_31] : memref<2x4x256xf32, #tpu.memory_space<vmem>>, vector<1x4x256xf32>
    %99 = vector.shape_cast %98 : vector<1x4x256xf32> to vector<4x256xf32>
    %cst_32 = arith.constant dense<0xFF800000> : vector<256xf32>
    %100 = vector.multi_reduction <maximumf>, %99, %cst_32 [0] : vector<4x256xf32> to vector<256xf32>
    %101 = vector.shape_cast %100 : vector<256xf32> to vector<1x256xf32>
    %cst_33 = arith.constant dense<0.000000e+00> : vector<256xf32>
    %102 = vector.multi_reduction <add>, %99, %cst_33 [0] : vector<4x256xf32> to vector<256xf32>
    %103 = vector.shape_cast %102 : vector<256xf32> to vector<1x256xf32>
    %cst_34 = arith.constant 2.500000e-01 : f32
    %104 = vector.broadcast %cst_34 : f32 to vector<1x256xf32>
    %105 = arith.mulf %103, %104 : vector<1x256xf32>
    %c0_35 = arith.constant 0 : index
    %c51 = arith.constant 51 : index
    %106 = vector.load %arg4[%c0_35, %c51] : memref<2x358xf32, #tpu.memory_space<vmem>>, vector<1x256xf32>
    tpu.vector_store %arg4[%c0_35, %c51], %101 {strides = array<i32>} : memref<2x358xf32, #tpu.memory_space<vmem>>, vector<1x256xf32>,
    %c1 = arith.constant 1 : index
    %c51_36 = arith.constant 51 : index
    %107 = vector.load %arg4[%c1, %c51_36] : memref<2x358xf32, #tpu.memory_space<vmem>>, vector<1x256xf32>
    tpu.vector_store %arg4[%c1, %c51_36], %105 {strides = array<i32>} : memref<2x358xf32, #tpu.memory_space<vmem>>, vector<1x256xf32>,
    %cst_37 = arith.constant 0.000000e+00 : f32
    %108 = vector.broadcast %cst_37 : f32 to vector<1x256xf32>
    %cst_38 = arith.constant 0.000000e+00 : f32
    %109 = vector.broadcast %cst_38 : f32 to vector<1x256xf32>
    %cst_39 = arith.constant 0.000000e+00 : f32
    %110 = vector.broadcast %cst_39 : f32 to vector<1x256xf32>
    %cst_40 = arith.constant 0.000000e+00 : f32
    %111 = vector.broadcast %cst_40 : f32 to vector<1x256xf32>
    %c0_41 = arith.constant 0 : index
    %c0_42 = arith.constant 0 : index
    %112 = vector.load %arg4[%c0_41, %c0_42] : memref<2x358xf32, #tpu.memory_space<vmem>>, vector<1x256xf32>
    %c0_43 = arith.constant 0 : index
    %113 = memref.load %arg1[%c0_43] : memref<98xf32, #tpu.memory_space<smem>>
    %114 = vector.broadcast %113 : f32 to vector<1x256xf32>
    %115 = arith.mulf %114, %112 : vector<1x256xf32>
    %c0_44 = arith.constant 0 : index
    %c16 = arith.constant 16 : index
    %116 = vector.load %arg4[%c0_44, %c16] : memref<2x358xf32, #tpu.memory_space<vmem>>, vector<1x256xf32>
    %c7 = arith.constant 7 : index
    %117 = memref.load %arg1[%c7] : memref<98xf32, #tpu.memory_space<smem>>
    %118 = vector.broadcast %117 : f32 to vector<1x256xf32>
    %119 = arith.mulf %118, %116 : vector<1x256xf32>
    %120 = arith.addf %115, %119 : vector<1x256xf32>
    %c0_45 = arith.constant 0 : index
    %c32 = arith.constant 32 : index
    %121 = vector.load %arg4[%c0_45, %c32] : memref<2x358xf32, #tpu.memory_space<vmem>>, vector<1x256xf32>
    %c14 = arith.constant 14 : index
    %122 = memref.load %arg1[%c14] : memref<98xf32, #tpu.memory_space<smem>>
    %123 = vector.broadcast %122 : f32 to vector<1x256xf32>
    %124 = arith.mulf %123, %121 : vector<1x256xf32>
    %125 = arith.addf %120, %124 : vector<1x256xf32>
    %c0_46 = arith.constant 0 : index
    %c48 = arith.constant 48 : index
    %126 = vector.load %arg4[%c0_46, %c48] : memref<2x358xf32, #tpu.memory_space<vmem>>, vector<1x256xf32>
    %c21 = arith.constant 21 : index
    %127 = memref.load %arg1[%c21] : memref<98xf32, #tpu.memory_space<smem>>
    %128 = vector.broadcast %127 : f32 to vector<1x256xf32>
    %129 = arith.mulf %128, %126 : vector<1x256xf32>
    %130 = arith.addf %125, %129 : vector<1x256xf32>
    %c0_47 = arith.constant 0 : index
    %c64 = arith.constant 64 : index
    %131 = vector.load %arg4[%c0_47, %c64] : memref<2x358xf32, #tpu.memory_space<vmem>>, vector<1x256xf32>
    %c28 = arith.constant 28 : index
    %132 = memref.load %arg1[%c28] : memref<98xf32, #tpu.memory_space<smem>>
    %133 = vector.broadcast %132 : f32 to vector<1x256xf32>
    %134 = arith.mulf %133, %131 : vector<1x256xf32>
    %135 = arith.addf %130, %134 : vector<1x256xf32>
    %c0_48 = arith.constant 0 : index
    %c80 = arith.constant 80 : index
    %136 = vector.load %arg4[%c0_48, %c80] : memref<2x358xf32, #tpu.memory_space<vmem>>, vector<1x256xf32>
    %c35 = arith.constant 35 : index
    %137 = memref.load %arg1[%c35] : memref<98xf32, #tpu.memory_space<smem>>
    %138 = vector.broadcast %137 : f32 to vector<1x256xf32>
    %139 = arith.mulf %138, %136 : vector<1x256xf32>
    %140 = arith.addf %135, %139 : vector<1x256xf32>
    %c0_49 = arith.constant 0 : index
    %c96 = arith.constant 96 : index
    %141 = vector.load %arg4[%c0_49, %c96] : memref<2x358xf32, #tpu.memory_space<vmem>>, vector<1x256xf32>
    %c42 = arith.constant 42 : index
    %142 = memref.load %arg1[%c42] : memref<98xf32, #tpu.memory_space<smem>>
    %143 = vector.broadcast %142 : f32 to vector<1x256xf32>
    %144 = arith.mulf %143, %141 : vector<1x256xf32>
    %145 = arith.addf %140, %144 : vector<1x256xf32>
    %146 = arith.mulf %145, %31 : vector<1x256xf32>
    %147 = arith.addf %108, %146 : vector<1x256xf32>
    %c1_50 = arith.constant 1 : index
    %c0_51 = arith.constant 0 : index
    %148 = vector.load %arg4[%c1_50, %c0_51] : memref<2x358xf32, #tpu.memory_space<vmem>>, vector<1x256xf32>
    %c49 = arith.constant 49 : index
    %149 = memref.load %arg1[%c49] : memref<98xf32, #tpu.memory_space<smem>>
    %150 = vector.broadcast %149 : f32 to vector<1x256xf32>
    %151 = arith.mulf %150, %148 : vector<1x256xf32>
    %c1_52 = arith.constant 1 : index
    %c16_53 = arith.constant 16 : index
    %152 = vector.load %arg4[%c1_52, %c16_53] : memref<2x358xf32, #tpu.memory_space<vmem>>, vector<1x256xf32>
    %c56 = arith.constant 56 : index
    %153 = memref.load %arg1[%c56] : memref<98xf32, #tpu.memory_space<smem>>
    %154 = vector.broadcast %153 : f32 to vector<1x256xf32>
    %155 = arith.mulf %154, %152 : vector<1x256xf32>
    %156 = arith.addf %151, %155 : vector<1x256xf32>
    %c1_54 = arith.constant 1 : index
    %c32_55 = arith.constant 32 : index
    %157 = vector.load %arg4[%c1_54, %c32_55] : memref<2x358xf32, #tpu.memory_space<vmem>>, vector<1x256xf32>
    %c63 = arith.constant 63 : index
    %158 = memref.load %arg1[%c63] : memref<98xf32, #tpu.memory_space<smem>>
    %159 = vector.broadcast %158 : f32 to vector<1x256xf32>
    %160 = arith.mulf %159, %157 : vector<1x256xf32>
    %161 = arith.addf %156, %160 : vector<1x256xf32>
    %c1_56 = arith.constant 1 : index
    %c48_57 = arith.constant 48 : index
    %162 = vector.load %arg4[%c1_56, %c48_57] : memref<2x358xf32, #tpu.memory_space<vmem>>, vector<1x256xf32>
    %c70 = arith.constant 70 : index
    %163 = memref.load %arg1[%c70] : memref<98xf32, #tpu.memory_space<smem>>
    %164 = vector.broadcast %163 : f32 to vector<1x256xf32>
    %165 = arith.mulf %164, %162 : vector<1x256xf32>
    %166 = arith.addf %161, %165 : vector<1x256xf32>
    %c1_58 = arith.constant 1 : index
    %c64_59 = arith.constant 64 : index
    %167 = vector.load %arg4[%c1_58, %c64_59] : memref<2x358xf32, #tpu.memory_space<vmem>>, vector<1x256xf32>
    %c77 = arith.constant 77 : index
    %168 = memref.load %arg1[%c77] : memref<98xf32, #tpu.memory_space<smem>>
    %169 = vector.broadcast %168 : f32 to vector<1x256xf32>
    %170 = arith.mulf %169, %167 : vector<1x256xf32>
    %171 = arith.addf %166, %170 : vector<1x256xf32>
    %c1_60 = arith.constant 1 : index
    %c80_61 = arith.constant 80 : index
    %172 = vector.load %arg4[%c1_60, %c80_61] : memref<2x358xf32, #tpu.memory_space<vmem>>, vector<1x256xf32>
    %c84 = arith.constant 84 : index
    %173 = memref.load %arg1[%c84] : memref<98xf32, #tpu.memory_space<smem>>
    %174 = vector.broadcast %173 : f32 to vector<1x256xf32>
    %175 = arith.mulf %174, %172 : vector<1x256xf32>
    %176 = arith.addf %171, %175 : vector<1x256xf32>
    %c1_62 = arith.constant 1 : index
    %c96_63 = arith.constant 96 : index
    %177 = vector.load %arg4[%c1_62, %c96_63] : memref<2x358xf32, #tpu.memory_space<vmem>>, vector<1x256xf32>
    %c91 = arith.constant 91 : index
    %178 = memref.load %arg1[%c91] : memref<98xf32, #tpu.memory_space<smem>>
    %179 = vector.broadcast %178 : f32 to vector<1x256xf32>
    %180 = arith.mulf %179, %177 : vector<1x256xf32>
    %181 = arith.addf %176, %180 : vector<1x256xf32>
    %182 = arith.mulf %181, %31 : vector<1x256xf32>
    %183 = arith.addf %109, %182 : vector<1x256xf32>
    %c0_64 = arith.constant 0 : index
    %c1_65 = arith.constant 1 : index
    %184 = vector.load %arg4[%c0_64, %c1_65] : memref<2x358xf32, #tpu.memory_space<vmem>>, vector<1x256xf32>
    %c1_66 = arith.constant 1 : index
    %185 = memref.load %arg1[%c1_66] : memref<98xf32, #tpu.memory_space<smem>>
    %186 = vector.broadcast %185 : f32 to vector<1x256xf32>
    %187 = arith.mulf %186, %184 : vector<1x256xf32>
    %c0_67 = arith.constant 0 : index
    %c17 = arith.constant 17 : index
    %188 = vector.load %arg4[%c0_67, %c17] : memref<2x358xf32, #tpu.memory_space<vmem>>, vector<1x256xf32>
    %c8 = arith.constant 8 : index
    %189 = memref.load %arg1[%c8] : memref<98xf32, #tpu.memory_space<smem>>
    %190 = vector.broadcast %189 : f32 to vector<1x256xf32>
    %191 = arith.mulf %190, %188 : vector<1x256xf32>
    %192 = arith.addf %187, %191 : vector<1x256xf32>
    %c0_68 = arith.constant 0 : index
    %c33 = arith.constant 33 : index
    %193 = vector.load %arg4[%c0_68, %c33] : memref<2x358xf32, #tpu.memory_space<vmem>>, vector<1x256xf32>
    %c15 = arith.constant 15 : index
    %194 = memref.load %arg1[%c15] : memref<98xf32, #tpu.memory_space<smem>>
    %195 = vector.broadcast %194 : f32 to vector<1x256xf32>
    %196 = arith.mulf %195, %193 : vector<1x256xf32>
    %197 = arith.addf %192, %196 : vector<1x256xf32>
    %c0_69 = arith.constant 0 : index
    %c49_70 = arith.constant 49 : index
    %198 = vector.load %arg4[%c0_69, %c49_70] : memref<2x358xf32, #tpu.memory_space<vmem>>, vector<1x256xf32>
    %c22 = arith.constant 22 : index
    %199 = memref.load %arg1[%c22] : memref<98xf32, #tpu.memory_space<smem>>
    %200 = vector.broadcast %199 : f32 to vector<1x256xf32>
    %201 = arith.mulf %200, %198 : vector<1x256xf32>
    %202 = arith.addf %197, %201 : vector<1x256xf32>
    %c0_71 = arith.constant 0 : index
    %c65 = arith.constant 65 : index
    %203 = vector.load %arg4[%c0_71, %c65] : memref<2x358xf32, #tpu.memory_space<vmem>>, vector<1x256xf32>
    %c29 = arith.constant 29 : index
    %204 = memref.load %arg1[%c29] : memref<98xf32, #tpu.memory_space<smem>>
    %205 = vector.broadcast %204 : f32 to vector<1x256xf32>
    %206 = arith.mulf %205, %203 : vector<1x256xf32>
    %207 = arith.addf %202, %206 : vector<1x256xf32>
    %c0_72 = arith.constant 0 : index
    %c81 = arith.constant 81 : index
    %208 = vector.load %arg4[%c0_72, %c81] : memref<2x358xf32, #tpu.memory_space<vmem>>, vector<1x256xf32>
    %c36 = arith.constant 36 : index
    %209 = memref.load %arg1[%c36] : memref<98xf32, #tpu.memory_space<smem>>
    %210 = vector.broadcast %209 : f32 to vector<1x256xf32>
    %211 = arith.mulf %210, %208 : vector<1x256xf32>
    %212 = arith.addf %207, %211 : vector<1x256xf32>
    %c0_73 = arith.constant 0 : index
    %c97 = arith.constant 97 : index
    %213 = vector.load %arg4[%c0_73, %c97] : memref<2x358xf32, #tpu.memory_space<vmem>>, vector<1x256xf32>
    %c43 = arith.constant 43 : index
    %214 = memref.load %arg1[%c43] : memref<98xf32, #tpu.memory_space<smem>>
    %215 = vector.broadcast %214 : f32 to vector<1x256xf32>
    %216 = arith.mulf %215, %213 : vector<1x256xf32>
    %217 = arith.addf %212, %216 : vector<1x256xf32>
    %218 = arith.mulf %217, %42 : vector<1x256xf32>
    %219 = arith.addf %110, %218 : vector<1x256xf32>
    %c1_74 = arith.constant 1 : index
    %c1_75 = arith.constant 1 : index
    %220 = vector.load %arg4[%c1_74, %c1_75] : memref<2x358xf32, #tpu.memory_space<vmem>>, vector<1x256xf32>
    %c50 = arith.constant 50 : index
    %221 = memref.load %arg1[%c50] : memref<98xf32, #tpu.memory_space<smem>>
    %222 = vector.broadcast %221 : f32 to vector<1x256xf32>
    %223 = arith.mulf %222, %220 : vector<1x256xf32>
    %c1_76 = arith.constant 1 : index
    %c17_77 = arith.constant 17 : index
    %224 = vector.load %arg4[%c1_76, %c17_77] : memref<2x358xf32, #tpu.memory_space<vmem>>, vector<1x256xf32>
    %c57 = arith.constant 57 : index
    %225 = memref.load %arg1[%c57] : memref<98xf32, #tpu.memory_space<smem>>
    %226 = vector.broadcast %225 : f32 to vector<1x256xf32>
    %227 = arith.mulf %226, %224 : vector<1x256xf32>
    %228 = arith.addf %223, %227 : vector<1x256xf32>
    %c1_78 = arith.constant 1 : index
    %c33_79 = arith.constant 33 : index
    %229 = vector.load %arg4[%c1_78, %c33_79] : memref<2x358xf32, #tpu.memory_space<vmem>>, vector<1x256xf32>
    %c64_80 = arith.constant 64 : index
    %230 = memref.load %arg1[%c64_80] : memref<98xf32, #tpu.memory_space<smem>>
    %231 = vector.broadcast %230 : f32 to vector<1x256xf32>
    %232 = arith.mulf %231, %229 : vector<1x256xf32>
    %233 = arith.addf %228, %232 : vector<1x256xf32>
    %c1_81 = arith.constant 1 : index
    %c49_82 = arith.constant 49 : index
    %234 = vector.load %arg4[%c1_81, %c49_82] : memref<2x358xf32, #tpu.memory_space<vmem>>, vector<1x256xf32>
    %c71 = arith.constant 71 : index
    %235 = memref.load %arg1[%c71] : memref<98xf32, #tpu.memory_space<smem>>
    %236 = vector.broadcast %235 : f32 to vector<1x256xf32>
    %237 = arith.mulf %236, %234 : vector<1x256xf32>
    %238 = arith.addf %233, %237 : vector<1x256xf32>
    %c1_83 = arith.constant 1 : index
    %c65_84 = arith.constant 65 : index
    %239 = vector.load %arg4[%c1_83, %c65_84] : memref<2x358xf32, #tpu.memory_space<vmem>>, vector<1x256xf32>
    %c78 = arith.constant 78 : index
    %240 = memref.load %arg1[%c78] : memref<98xf32, #tpu.memory_space<smem>>
    %241 = vector.broadcast %240 : f32 to vector<1x256xf32>
    %242 = arith.mulf %241, %239 : vector<1x256xf32>
    %243 = arith.addf %238, %242 : vector<1x256xf32>
    %c1_85 = arith.constant 1 : index
    %c81_86 = arith.constant 81 : index
    %244 = vector.load %arg4[%c1_85, %c81_86] : memref<2x358xf32, #tpu.memory_space<vmem>>, vector<1x256xf32>
    %c85 = arith.constant 85 : index
    %245 = memref.load %arg1[%c85] : memref<98xf32, #tpu.memory_space<smem>>
    %246 = vector.broadcast %245 : f32 to vector<1x256xf32>
    %247 = arith.mulf %246, %244 : vector<1x256xf32>
    %248 = arith.addf %243, %247 : vector<1x256xf32>
    %c1_87 = arith.constant 1 : index
    %c97_88 = arith.constant 97 : index
    %249 = vector.load %arg4[%c1_87, %c97_88] : memref<2x358xf32, #tpu.memory_space<vmem>>, vector<1x256xf32>
    %c92 = arith.constant 92 : index
    %250 = memref.load %arg1[%c92] : memref<98xf32, #tpu.memory_space<smem>>
    %251 = vector.broadcast %250 : f32 to vector<1x256xf32>
    %252 = arith.mulf %251, %249 : vector<1x256xf32>
    %253 = arith.addf %248, %252 : vector<1x256xf32>
    %254 = arith.mulf %253, %42 : vector<1x256xf32>
    %255 = arith.addf %111, %254 : vector<1x256xf32>
    %c0_89 = arith.constant 0 : index
    %c2 = arith.constant 2 : index
    %256 = vector.load %arg4[%c0_89, %c2] : memref<2x358xf32, #tpu.memory_space<vmem>>, vector<1x256xf32>
    %c2_90 = arith.constant 2 : index
    %257 = memref.load %arg1[%c2_90] : memref<98xf32, #tpu.memory_space<smem>>
    %258 = vector.broadcast %257 : f32 to vector<1x256xf32>
    %259 = arith.mulf %258, %256 : vector<1x256xf32>
    %c0_91 = arith.constant 0 : index
    %c18 = arith.constant 18 : index
    %260 = vector.load %arg4[%c0_91, %c18] : memref<2x358xf32, #tpu.memory_space<vmem>>, vector<1x256xf32>
    %c9 = arith.constant 9 : index
    %261 = memref.load %arg1[%c9] : memref<98xf32, #tpu.memory_space<smem>>
    %262 = vector.broadcast %261 : f32 to vector<1x256xf32>
    %263 = arith.mulf %262, %260 : vector<1x256xf32>
    %264 = arith.addf %259, %263 : vector<1x256xf32>
    %c0_92 = arith.constant 0 : index
    %c34 = arith.constant 34 : index
    %265 = vector.load %arg4[%c0_92, %c34] : memref<2x358xf32, #tpu.memory_space<vmem>>, vector<1x256xf32>
    %c16_93 = arith.constant 16 : index
    %266 = memref.load %arg1[%c16_93] : memref<98xf32, #tpu.memory_space<smem>>
    %267 = vector.broadcast %266 : f32 to vector<1x256xf32>
    %268 = arith.mulf %267, %265 : vector<1x256xf32>
    %269 = arith.addf %264, %268 : vector<1x256xf32>
    %c0_94 = arith.constant 0 : index
    %c50_95 = arith.constant 50 : index
    %270 = vector.load %arg4[%c0_94, %c50_95] : memref<2x358xf32, #tpu.memory_space<vmem>>, vector<1x256xf32>
    %c23 = arith.constant 23 : index
    %271 = memref.load %arg1[%c23] : memref<98xf32, #tpu.memory_space<smem>>
    %272 = vector.broadcast %271 : f32 to vector<1x256xf32>
    %273 = arith.mulf %272, %270 : vector<1x256xf32>
    %274 = arith.addf %269, %273 : vector<1x256xf32>
    %c0_96 = arith.constant 0 : index
    %c66 = arith.constant 66 : index
    %275 = vector.load %arg4[%c0_96, %c66] : memref<2x358xf32, #tpu.memory_space<vmem>>, vector<1x256xf32>
    %c30 = arith.constant 30 : index
    %276 = memref.load %arg1[%c30] : memref<98xf32, #tpu.memory_space<smem>>
    %277 = vector.broadcast %276 : f32 to vector<1x256xf32>
    %278 = arith.mulf %277, %275 : vector<1x256xf32>
    %279 = arith.addf %274, %278 : vector<1x256xf32>
    %c0_97 = arith.constant 0 : index
    %c82 = arith.constant 82 : index
    %280 = vector.load %arg4[%c0_97, %c82] : memref<2x358xf32, #tpu.memory_space<vmem>>, vector<1x256xf32>
    %c37 = arith.constant 37 : index
    %281 = memref.load %arg1[%c37] : memref<98xf32, #tpu.memory_space<smem>>
    %282 = vector.broadcast %281 : f32 to vector<1x256xf32>
    %283 = arith.mulf %282, %280 : vector<1x256xf32>
    %284 = arith.addf %279, %283 : vector<1x256xf32>
    %c0_98 = arith.constant 0 : index
    %c98 = arith.constant 98 : index
    %285 = vector.load %arg4[%c0_98, %c98] : memref<2x358xf32, #tpu.memory_space<vmem>>, vector<1x256xf32>
    %c44 = arith.constant 44 : index
    %286 = memref.load %arg1[%c44] : memref<98xf32, #tpu.memory_space<smem>>
    %287 = vector.broadcast %286 : f32 to vector<1x256xf32>
    %288 = arith.mulf %287, %285 : vector<1x256xf32>
    %289 = arith.addf %284, %288 : vector<1x256xf32>
    %290 = arith.mulf %289, %53 : vector<1x256xf32>
    %291 = arith.addf %147, %290 : vector<1x256xf32>
    %c1_99 = arith.constant 1 : index
    %c2_100 = arith.constant 2 : index
    %292 = vector.load %arg4[%c1_99, %c2_100] : memref<2x358xf32, #tpu.memory_space<vmem>>, vector<1x256xf32>
    %c51_101 = arith.constant 51 : index
    %293 = memref.load %arg1[%c51_101] : memref<98xf32, #tpu.memory_space<smem>>
    %294 = vector.broadcast %293 : f32 to vector<1x256xf32>
    %295 = arith.mulf %294, %292 : vector<1x256xf32>
    %c1_102 = arith.constant 1 : index
    %c18_103 = arith.constant 18 : index
    %296 = vector.load %arg4[%c1_102, %c18_103] : memref<2x358xf32, #tpu.memory_space<vmem>>, vector<1x256xf32>
    %c58 = arith.constant 58 : index
    %297 = memref.load %arg1[%c58] : memref<98xf32, #tpu.memory_space<smem>>
    %298 = vector.broadcast %297 : f32 to vector<1x256xf32>
    %299 = arith.mulf %298, %296 : vector<1x256xf32>
    %300 = arith.addf %295, %299 : vector<1x256xf32>
    %c1_104 = arith.constant 1 : index
    %c34_105 = arith.constant 34 : index
    %301 = vector.load %arg4[%c1_104, %c34_105] : memref<2x358xf32, #tpu.memory_space<vmem>>, vector<1x256xf32>
    %c65_106 = arith.constant 65 : index
    %302 = memref.load %arg1[%c65_106] : memref<98xf32, #tpu.memory_space<smem>>
    %303 = vector.broadcast %302 : f32 to vector<1x256xf32>
    %304 = arith.mulf %303, %301 : vector<1x256xf32>
    %305 = arith.addf %300, %304 : vector<1x256xf32>
    %c1_107 = arith.constant 1 : index
    %c50_108 = arith.constant 50 : index
    %306 = vector.load %arg4[%c1_107, %c50_108] : memref<2x358xf32, #tpu.memory_space<vmem>>, vector<1x256xf32>
    %c72 = arith.constant 72 : index
    %307 = memref.load %arg1[%c72] : memref<98xf32, #tpu.memory_space<smem>>
    %308 = vector.broadcast %307 : f32 to vector<1x256xf32>
    %309 = arith.mulf %308, %306 : vector<1x256xf32>
    %310 = arith.addf %305, %309 : vector<1x256xf32>
    %c1_109 = arith.constant 1 : index
    %c66_110 = arith.constant 66 : index
    %311 = vector.load %arg4[%c1_109, %c66_110] : memref<2x358xf32, #tpu.memory_space<vmem>>, vector<1x256xf32>
    %c79 = arith.constant 79 : index
    %312 = memref.load %arg1[%c79] : memref<98xf32, #tpu.memory_space<smem>>
    %313 = vector.broadcast %312 : f32 to vector<1x256xf32>
    %314 = arith.mulf %313, %311 : vector<1x256xf32>
    %315 = arith.addf %310, %314 : vector<1x256xf32>
    %c1_111 = arith.constant 1 : index
    %c82_112 = arith.constant 82 : index
    %316 = vector.load %arg4[%c1_111, %c82_112] : memref<2x358xf32, #tpu.memory_space<vmem>>, vector<1x256xf32>
    %c86 = arith.constant 86 : index
    %317 = memref.load %arg1[%c86] : memref<98xf32, #tpu.memory_space<smem>>
    %318 = vector.broadcast %317 : f32 to vector<1x256xf32>
    %319 = arith.mulf %318, %316 : vector<1x256xf32>
    %320 = arith.addf %315, %319 : vector<1x256xf32>
    %c1_113 = arith.constant 1 : index
    %c98_114 = arith.constant 98 : index
    %321 = vector.load %arg4[%c1_113, %c98_114] : memref<2x358xf32, #tpu.memory_space<vmem>>, vector<1x256xf32>
    %c93 = arith.constant 93 : index
    %322 = memref.load %arg1[%c93] : memref<98xf32, #tpu.memory_space<smem>>
    %323 = vector.broadcast %322 : f32 to vector<1x256xf32>
    %324 = arith.mulf %323, %321 : vector<1x256xf32>
    %325 = arith.addf %320, %324 : vector<1x256xf32>
    %326 = arith.mulf %325, %53 : vector<1x256xf32>
    %327 = arith.addf %183, %326 : vector<1x256xf32>
    %c0_115 = arith.constant 0 : index
    %c3 = arith.constant 3 : index
    %328 = vector.load %arg4[%c0_115, %c3] : memref<2x358xf32, #tpu.memory_space<vmem>>, vector<1x256xf32>
    %c3_116 = arith.constant 3 : index
    %329 = memref.load %arg1[%c3_116] : memref<98xf32, #tpu.memory_space<smem>>
    %330 = vector.broadcast %329 : f32 to vector<1x256xf32>
    %331 = arith.mulf %330, %328 : vector<1x256xf32>
    %c0_117 = arith.constant 0 : index
    %c19 = arith.constant 19 : index
    %332 = vector.load %arg4[%c0_117, %c19] : memref<2x358xf32, #tpu.memory_space<vmem>>, vector<1x256xf32>
    %c10 = arith.constant 10 : index
    %333 = memref.load %arg1[%c10] : memref<98xf32, #tpu.memory_space<smem>>
    %334 = vector.broadcast %333 : f32 to vector<1x256xf32>
    %335 = arith.mulf %334, %332 : vector<1x256xf32>
    %336 = arith.addf %331, %335 : vector<1x256xf32>
    %c0_118 = arith.constant 0 : index
    %c35_119 = arith.constant 35 : index
    %337 = vector.load %arg4[%c0_118, %c35_119] : memref<2x358xf32, #tpu.memory_space<vmem>>, vector<1x256xf32>
    %c17_120 = arith.constant 17 : index
    %338 = memref.load %arg1[%c17_120] : memref<98xf32, #tpu.memory_space<smem>>
    %339 = vector.broadcast %338 : f32 to vector<1x256xf32>
    %340 = arith.mulf %339, %337 : vector<1x256xf32>
    %341 = arith.addf %336, %340 : vector<1x256xf32>
    %c0_121 = arith.constant 0 : index
    %c51_122 = arith.constant 51 : index
    %342 = vector.load %arg4[%c0_121, %c51_122] : memref<2x358xf32, #tpu.memory_space<vmem>>, vector<1x256xf32>
    %c24 = arith.constant 24 : index
    %343 = memref.load %arg1[%c24] : memref<98xf32, #tpu.memory_space<smem>>
    %344 = vector.broadcast %343 : f32 to vector<1x256xf32>
    %345 = arith.mulf %344, %342 : vector<1x256xf32>
    %346 = arith.addf %341, %345 : vector<1x256xf32>
    %c0_123 = arith.constant 0 : index
    %c67 = arith.constant 67 : index
    %347 = vector.load %arg4[%c0_123, %c67] : memref<2x358xf32, #tpu.memory_space<vmem>>, vector<1x256xf32>
    %c31 = arith.constant 31 : index
    %348 = memref.load %arg1[%c31] : memref<98xf32, #tpu.memory_space<smem>>
    %349 = vector.broadcast %348 : f32 to vector<1x256xf32>
    %350 = arith.mulf %349, %347 : vector<1x256xf32>
    %351 = arith.addf %346, %350 : vector<1x256xf32>
    %c0_124 = arith.constant 0 : index
    %c83 = arith.constant 83 : index
    %352 = vector.load %arg4[%c0_124, %c83] : memref<2x358xf32, #tpu.memory_space<vmem>>, vector<1x256xf32>
    %c38 = arith.constant 38 : index
    %353 = memref.load %arg1[%c38] : memref<98xf32, #tpu.memory_space<smem>>
    %354 = vector.broadcast %353 : f32 to vector<1x256xf32>
    %355 = arith.mulf %354, %352 : vector<1x256xf32>
    %356 = arith.addf %351, %355 : vector<1x256xf32>
    %c0_125 = arith.constant 0 : index
    %c99 = arith.constant 99 : index
    %357 = vector.load %arg4[%c0_125, %c99] : memref<2x358xf32, #tpu.memory_space<vmem>>, vector<1x256xf32>
    %c45 = arith.constant 45 : index
    %358 = memref.load %arg1[%c45] : memref<98xf32, #tpu.memory_space<smem>>
    %359 = vector.broadcast %358 : f32 to vector<1x256xf32>
    %360 = arith.mulf %359, %357 : vector<1x256xf32>
    %361 = arith.addf %356, %360 : vector<1x256xf32>
    %362 = arith.mulf %361, %64 : vector<1x256xf32>
    %363 = arith.addf %219, %362 : vector<1x256xf32>
    %c1_126 = arith.constant 1 : index
    %c3_127 = arith.constant 3 : index
    %364 = vector.load %arg4[%c1_126, %c3_127] : memref<2x358xf32, #tpu.memory_space<vmem>>, vector<1x256xf32>
    %c52 = arith.constant 52 : index
    %365 = memref.load %arg1[%c52] : memref<98xf32, #tpu.memory_space<smem>>
    %366 = vector.broadcast %365 : f32 to vector<1x256xf32>
    %367 = arith.mulf %366, %364 : vector<1x256xf32>
    %c1_128 = arith.constant 1 : index
    %c19_129 = arith.constant 19 : index
    %368 = vector.load %arg4[%c1_128, %c19_129] : memref<2x358xf32, #tpu.memory_space<vmem>>, vector<1x256xf32>
    %c59 = arith.constant 59 : index
    %369 = memref.load %arg1[%c59] : memref<98xf32, #tpu.memory_space<smem>>
    %370 = vector.broadcast %369 : f32 to vector<1x256xf32>
    %371 = arith.mulf %370, %368 : vector<1x256xf32>
    %372 = arith.addf %367, %371 : vector<1x256xf32>
    %c1_130 = arith.constant 1 : index
    %c35_131 = arith.constant 35 : index
    %373 = vector.load %arg4[%c1_130, %c35_131] : memref<2x358xf32, #tpu.memory_space<vmem>>, vector<1x256xf32>
    %c66_132 = arith.constant 66 : index
    %374 = memref.load %arg1[%c66_132] : memref<98xf32, #tpu.memory_space<smem>>
    %375 = vector.broadcast %374 : f32 to vector<1x256xf32>
    %376 = arith.mulf %375, %373 : vector<1x256xf32>
    %377 = arith.addf %372, %376 : vector<1x256xf32>
    %c1_133 = arith.constant 1 : index
    %c51_134 = arith.constant 51 : index
    %378 = vector.load %arg4[%c1_133, %c51_134] : memref<2x358xf32, #tpu.memory_space<vmem>>, vector<1x256xf32>
    %c73 = arith.constant 73 : index
    %379 = memref.load %arg1[%c73] : memref<98xf32, #tpu.memory_space<smem>>
    %380 = vector.broadcast %379 : f32 to vector<1x256xf32>
    %381 = arith.mulf %380, %378 : vector<1x256xf32>
    %382 = arith.addf %377, %381 : vector<1x256xf32>
    %c1_135 = arith.constant 1 : index
    %c67_136 = arith.constant 67 : index
    %383 = vector.load %arg4[%c1_135, %c67_136] : memref<2x358xf32, #tpu.memory_space<vmem>>, vector<1x256xf32>
    %c80_137 = arith.constant 80 : index
    %384 = memref.load %arg1[%c80_137] : memref<98xf32, #tpu.memory_space<smem>>
    %385 = vector.broadcast %384 : f32 to vector<1x256xf32>
    %386 = arith.mulf %385, %383 : vector<1x256xf32>
    %387 = arith.addf %382, %386 : vector<1x256xf32>
    %c1_138 = arith.constant 1 : index
    %c83_139 = arith.constant 83 : index
    %388 = vector.load %arg4[%c1_138, %c83_139] : memref<2x358xf32, #tpu.memory_space<vmem>>, vector<1x256xf32>
    %c87 = arith.constant 87 : index
    %389 = memref.load %arg1[%c87] : memref<98xf32, #tpu.memory_space<smem>>
    %390 = vector.broadcast %389 : f32 to vector<1x256xf32>
    %391 = arith.mulf %390, %388 : vector<1x256xf32>
    %392 = arith.addf %387, %391 : vector<1x256xf32>
    %c1_140 = arith.constant 1 : index
    %c99_141 = arith.constant 99 : index
    %393 = vector.load %arg4[%c1_140, %c99_141] : memref<2x358xf32, #tpu.memory_space<vmem>>, vector<1x256xf32>
    %c94 = arith.constant 94 : index
    %394 = memref.load %arg1[%c94] : memref<98xf32, #tpu.memory_space<smem>>
    %395 = vector.broadcast %394 : f32 to vector<1x256xf32>
    %396 = arith.mulf %395, %393 : vector<1x256xf32>
    %397 = arith.addf %392, %396 : vector<1x256xf32>
    %398 = arith.mulf %397, %64 : vector<1x256xf32>
    %399 = arith.addf %255, %398 : vector<1x256xf32>
    %c0_142 = arith.constant 0 : index
    %c4 = arith.constant 4 : index
    %400 = vector.load %arg4[%c0_142, %c4] : memref<2x358xf32, #tpu.memory_space<vmem>>, vector<1x256xf32>
    %c4_143 = arith.constant 4 : index
    %401 = memref.load %arg1[%c4_143] : memref<98xf32, #tpu.memory_space<smem>>
    %402 = vector.broadcast %401 : f32 to vector<1x256xf32>
    %403 = arith.mulf %402, %400 : vector<1x256xf32>
    %c0_144 = arith.constant 0 : index
    %c20 = arith.constant 20 : index
    %404 = vector.load %arg4[%c0_144, %c20] : memref<2x358xf32, #tpu.memory_space<vmem>>, vector<1x256xf32>
    %c11 = arith.constant 11 : index
    %405 = memref.load %arg1[%c11] : memref<98xf32, #tpu.memory_space<smem>>
    %406 = vector.broadcast %405 : f32 to vector<1x256xf32>
    %407 = arith.mulf %406, %404 : vector<1x256xf32>
    %408 = arith.addf %403, %407 : vector<1x256xf32>
    %c0_145 = arith.constant 0 : index
    %c36_146 = arith.constant 36 : index
    %409 = vector.load %arg4[%c0_145, %c36_146] : memref<2x358xf32, #tpu.memory_space<vmem>>, vector<1x256xf32>
    %c18_147 = arith.constant 18 : index
    %410 = memref.load %arg1[%c18_147] : memref<98xf32, #tpu.memory_space<smem>>
    %411 = vector.broadcast %410 : f32 to vector<1x256xf32>
    %412 = arith.mulf %411, %409 : vector<1x256xf32>
    %413 = arith.addf %408, %412 : vector<1x256xf32>
    %c0_148 = arith.constant 0 : index
    %c52_149 = arith.constant 52 : index
    %414 = vector.load %arg4[%c0_148, %c52_149] : memref<2x358xf32, #tpu.memory_space<vmem>>, vector<1x256xf32>
    %c25 = arith.constant 25 : index
    %415 = memref.load %arg1[%c25] : memref<98xf32, #tpu.memory_space<smem>>
    %416 = vector.broadcast %415 : f32 to vector<1x256xf32>
    %417 = arith.mulf %416, %414 : vector<1x256xf32>
    %418 = arith.addf %413, %417 : vector<1x256xf32>
    %c0_150 = arith.constant 0 : index
    %c68 = arith.constant 68 : index
    %419 = vector.load %arg4[%c0_150, %c68] : memref<2x358xf32, #tpu.memory_space<vmem>>, vector<1x256xf32>
    %c32_151 = arith.constant 32 : index
    %420 = memref.load %arg1[%c32_151] : memref<98xf32, #tpu.memory_space<smem>>
    %421 = vector.broadcast %420 : f32 to vector<1x256xf32>
    %422 = arith.mulf %421, %419 : vector<1x256xf32>
    %423 = arith.addf %418, %422 : vector<1x256xf32>
    %c0_152 = arith.constant 0 : index
    %c84_153 = arith.constant 84 : index
    %424 = vector.load %arg4[%c0_152, %c84_153] : memref<2x358xf32, #tpu.memory_space<vmem>>, vector<1x256xf32>
    %c39 = arith.constant 39 : index
    %425 = memref.load %arg1[%c39] : memref<98xf32, #tpu.memory_space<smem>>
    %426 = vector.broadcast %425 : f32 to vector<1x256xf32>
    %427 = arith.mulf %426, %424 : vector<1x256xf32>
    %428 = arith.addf %423, %427 : vector<1x256xf32>
    %c0_154 = arith.constant 0 : index
    %c100 = arith.constant 100 : index
    %429 = vector.load %arg4[%c0_154, %c100] : memref<2x358xf32, #tpu.memory_space<vmem>>, vector<1x256xf32>
    %c46 = arith.constant 46 : index
    %430 = memref.load %arg1[%c46] : memref<98xf32, #tpu.memory_space<smem>>
    %431 = vector.broadcast %430 : f32 to vector<1x256xf32>
    %432 = arith.mulf %431, %429 : vector<1x256xf32>
    %433 = arith.addf %428, %432 : vector<1x256xf32>
    %434 = arith.mulf %433, %75 : vector<1x256xf32>
    %435 = arith.addf %291, %434 : vector<1x256xf32>
    %c1_155 = arith.constant 1 : index
    %c4_156 = arith.constant 4 : index
    %436 = vector.load %arg4[%c1_155, %c4_156] : memref<2x358xf32, #tpu.memory_space<vmem>>, vector<1x256xf32>
    %c53 = arith.constant 53 : index
    %437 = memref.load %arg1[%c53] : memref<98xf32, #tpu.memory_space<smem>>
    %438 = vector.broadcast %437 : f32 to vector<1x256xf32>
    %439 = arith.mulf %438, %436 : vector<1x256xf32>
    %c1_157 = arith.constant 1 : index
    %c20_158 = arith.constant 20 : index
    %440 = vector.load %arg4[%c1_157, %c20_158] : memref<2x358xf32, #tpu.memory_space<vmem>>, vector<1x256xf32>
    %c60 = arith.constant 60 : index
    %441 = memref.load %arg1[%c60] : memref<98xf32, #tpu.memory_space<smem>>
    %442 = vector.broadcast %441 : f32 to vector<1x256xf32>
    %443 = arith.mulf %442, %440 : vector<1x256xf32>
    %444 = arith.addf %439, %443 : vector<1x256xf32>
    %c1_159 = arith.constant 1 : index
    %c36_160 = arith.constant 36 : index
    %445 = vector.load %arg4[%c1_159, %c36_160] : memref<2x358xf32, #tpu.memory_space<vmem>>, vector<1x256xf32>
    %c67_161 = arith.constant 67 : index
    %446 = memref.load %arg1[%c67_161] : memref<98xf32, #tpu.memory_space<smem>>
    %447 = vector.broadcast %446 : f32 to vector<1x256xf32>
    %448 = arith.mulf %447, %445 : vector<1x256xf32>
    %449 = arith.addf %444, %448 : vector<1x256xf32>
    %c1_162 = arith.constant 1 : index
    %c52_163 = arith.constant 52 : index
    %450 = vector.load %arg4[%c1_162, %c52_163] : memref<2x358xf32, #tpu.memory_space<vmem>>, vector<1x256xf32>
    %c74 = arith.constant 74 : index
    %451 = memref.load %arg1[%c74] : memref<98xf32, #tpu.memory_space<smem>>
    %452 = vector.broadcast %451 : f32 to vector<1x256xf32>
    %453 = arith.mulf %452, %450 : vector<1x256xf32>
    %454 = arith.addf %449, %453 : vector<1x256xf32>
    %c1_164 = arith.constant 1 : index
    %c68_165 = arith.constant 68 : index
    %455 = vector.load %arg4[%c1_164, %c68_165] : memref<2x358xf32, #tpu.memory_space<vmem>>, vector<1x256xf32>
    %c81_166 = arith.constant 81 : index
    %456 = memref.load %arg1[%c81_166] : memref<98xf32, #tpu.memory_space<smem>>
    %457 = vector.broadcast %456 : f32 to vector<1x256xf32>
    %458 = arith.mulf %457, %455 : vector<1x256xf32>
    %459 = arith.addf %454, %458 : vector<1x256xf32>
    %c1_167 = arith.constant 1 : index
    %c84_168 = arith.constant 84 : index
    %460 = vector.load %arg4[%c1_167, %c84_168] : memref<2x358xf32, #tpu.memory_space<vmem>>, vector<1x256xf32>
    %c88 = arith.constant 88 : index
    %461 = memref.load %arg1[%c88] : memref<98xf32, #tpu.memory_space<smem>>
    %462 = vector.broadcast %461 : f32 to vector<1x256xf32>
    %463 = arith.mulf %462, %460 : vector<1x256xf32>
    %464 = arith.addf %459, %463 : vector<1x256xf32>
    %c1_169 = arith.constant 1 : index
    %c100_170 = arith.constant 100 : index
    %465 = vector.load %arg4[%c1_169, %c100_170] : memref<2x358xf32, #tpu.memory_space<vmem>>, vector<1x256xf32>
    %c95 = arith.constant 95 : index
    %466 = memref.load %arg1[%c95] : memref<98xf32, #tpu.memory_space<smem>>
    %467 = vector.broadcast %466 : f32 to vector<1x256xf32>
    %468 = arith.mulf %467, %465 : vector<1x256xf32>
    %469 = arith.addf %464, %468 : vector<1x256xf32>
    %470 = arith.mulf %469, %75 : vector<1x256xf32>
    %471 = arith.addf %327, %470 : vector<1x256xf32>
    %c0_171 = arith.constant 0 : index
    %c5 = arith.constant 5 : index
    %472 = vector.load %arg4[%c0_171, %c5] : memref<2x358xf32, #tpu.memory_space<vmem>>, vector<1x256xf32>
    %c5_172 = arith.constant 5 : index
    %473 = memref.load %arg1[%c5_172] : memref<98xf32, #tpu.memory_space<smem>>
    %474 = vector.broadcast %473 : f32 to vector<1x256xf32>
    %475 = arith.mulf %474, %472 : vector<1x256xf32>
    %c0_173 = arith.constant 0 : index
    %c21_174 = arith.constant 21 : index
    %476 = vector.load %arg4[%c0_173, %c21_174] : memref<2x358xf32, #tpu.memory_space<vmem>>, vector<1x256xf32>
    %c12 = arith.constant 12 : index
    %477 = memref.load %arg1[%c12] : memref<98xf32, #tpu.memory_space<smem>>
    %478 = vector.broadcast %477 : f32 to vector<1x256xf32>
    %479 = arith.mulf %478, %476 : vector<1x256xf32>
    %480 = arith.addf %475, %479 : vector<1x256xf32>
    %c0_175 = arith.constant 0 : index
    %c37_176 = arith.constant 37 : index
    %481 = vector.load %arg4[%c0_175, %c37_176] : memref<2x358xf32, #tpu.memory_space<vmem>>, vector<1x256xf32>
    %c19_177 = arith.constant 19 : index
    %482 = memref.load %arg1[%c19_177] : memref<98xf32, #tpu.memory_space<smem>>
    %483 = vector.broadcast %482 : f32 to vector<1x256xf32>
    %484 = arith.mulf %483, %481 : vector<1x256xf32>
    %485 = arith.addf %480, %484 : vector<1x256xf32>
    %c0_178 = arith.constant 0 : index
    %c53_179 = arith.constant 53 : index
    %486 = vector.load %arg4[%c0_178, %c53_179] : memref<2x358xf32, #tpu.memory_space<vmem>>, vector<1x256xf32>
    %c26 = arith.constant 26 : index
    %487 = memref.load %arg1[%c26] : memref<98xf32, #tpu.memory_space<smem>>
    %488 = vector.broadcast %487 : f32 to vector<1x256xf32>
    %489 = arith.mulf %488, %486 : vector<1x256xf32>
    %490 = arith.addf %485, %489 : vector<1x256xf32>
    %c0_180 = arith.constant 0 : index
    %c69 = arith.constant 69 : index
    %491 = vector.load %arg4[%c0_180, %c69] : memref<2x358xf32, #tpu.memory_space<vmem>>, vector<1x256xf32>
    %c33_181 = arith.constant 33 : index
    %492 = memref.load %arg1[%c33_181] : memref<98xf32, #tpu.memory_space<smem>>
    %493 = vector.broadcast %492 : f32 to vector<1x256xf32>
    %494 = arith.mulf %493, %491 : vector<1x256xf32>
    %495 = arith.addf %490, %494 : vector<1x256xf32>
    %c0_182 = arith.constant 0 : index
    %c85_183 = arith.constant 85 : index
    %496 = vector.load %arg4[%c0_182, %c85_183] : memref<2x358xf32, #tpu.memory_space<vmem>>, vector<1x256xf32>
    %c40 = arith.constant 40 : index
    %497 = memref.load %arg1[%c40] : memref<98xf32, #tpu.memory_space<smem>>
    %498 = vector.broadcast %497 : f32 to vector<1x256xf32>
    %499 = arith.mulf %498, %496 : vector<1x256xf32>
    %500 = arith.addf %495, %499 : vector<1x256xf32>
    %c0_184 = arith.constant 0 : index
    %c101 = arith.constant 101 : index
    %501 = vector.load %arg4[%c0_184, %c101] : memref<2x358xf32, #tpu.memory_space<vmem>>, vector<1x256xf32>
    %c47 = arith.constant 47 : index
    %502 = memref.load %arg1[%c47] : memref<98xf32, #tpu.memory_space<smem>>
    %503 = vector.broadcast %502 : f32 to vector<1x256xf32>
    %504 = arith.mulf %503, %501 : vector<1x256xf32>
    %505 = arith.addf %500, %504 : vector<1x256xf32>
    %506 = arith.mulf %505, %86 : vector<1x256xf32>
    %507 = arith.addf %363, %506 : vector<1x256xf32>
    %c1_185 = arith.constant 1 : index
    %c5_186 = arith.constant 5 : index
    %508 = vector.load %arg4[%c1_185, %c5_186] : memref<2x358xf32, #tpu.memory_space<vmem>>, vector<1x256xf32>
    %c54 = arith.constant 54 : index
    %509 = memref.load %arg1[%c54] : memref<98xf32, #tpu.memory_space<smem>>
    %510 = vector.broadcast %509 : f32 to vector<1x256xf32>
    %511 = arith.mulf %510, %508 : vector<1x256xf32>
    %c1_187 = arith.constant 1 : index
    %c21_188 = arith.constant 21 : index
    %512 = vector.load %arg4[%c1_187, %c21_188] : memref<2x358xf32, #tpu.memory_space<vmem>>, vector<1x256xf32>
    %c61 = arith.constant 61 : index
    %513 = memref.load %arg1[%c61] : memref<98xf32, #tpu.memory_space<smem>>
    %514 = vector.broadcast %513 : f32 to vector<1x256xf32>
    %515 = arith.mulf %514, %512 : vector<1x256xf32>
    %516 = arith.addf %511, %515 : vector<1x256xf32>
    %c1_189 = arith.constant 1 : index
    %c37_190 = arith.constant 37 : index
    %517 = vector.load %arg4[%c1_189, %c37_190] : memref<2x358xf32, #tpu.memory_space<vmem>>, vector<1x256xf32>
    %c68_191 = arith.constant 68 : index
    %518 = memref.load %arg1[%c68_191] : memref<98xf32, #tpu.memory_space<smem>>
    %519 = vector.broadcast %518 : f32 to vector<1x256xf32>
    %520 = arith.mulf %519, %517 : vector<1x256xf32>
    %521 = arith.addf %516, %520 : vector<1x256xf32>
    %c1_192 = arith.constant 1 : index
    %c53_193 = arith.constant 53 : index
    %522 = vector.load %arg4[%c1_192, %c53_193] : memref<2x358xf32, #tpu.memory_space<vmem>>, vector<1x256xf32>
    %c75 = arith.constant 75 : index
    %523 = memref.load %arg1[%c75] : memref<98xf32, #tpu.memory_space<smem>>
    %524 = vector.broadcast %523 : f32 to vector<1x256xf32>
    %525 = arith.mulf %524, %522 : vector<1x256xf32>
    %526 = arith.addf %521, %525 : vector<1x256xf32>
    %c1_194 = arith.constant 1 : index
    %c69_195 = arith.constant 69 : index
    %527 = vector.load %arg4[%c1_194, %c69_195] : memref<2x358xf32, #tpu.memory_space<vmem>>, vector<1x256xf32>
    %c82_196 = arith.constant 82 : index
    %528 = memref.load %arg1[%c82_196] : memref<98xf32, #tpu.memory_space<smem>>
    %529 = vector.broadcast %528 : f32 to vector<1x256xf32>
    %530 = arith.mulf %529, %527 : vector<1x256xf32>
    %531 = arith.addf %526, %530 : vector<1x256xf32>
    %c1_197 = arith.constant 1 : index
    %c85_198 = arith.constant 85 : index
    %532 = vector.load %arg4[%c1_197, %c85_198] : memref<2x358xf32, #tpu.memory_space<vmem>>, vector<1x256xf32>
    %c89 = arith.constant 89 : index
    %533 = memref.load %arg1[%c89] : memref<98xf32, #tpu.memory_space<smem>>
    %534 = vector.broadcast %533 : f32 to vector<1x256xf32>
    %535 = arith.mulf %534, %532 : vector<1x256xf32>
    %536 = arith.addf %531, %535 : vector<1x256xf32>
    %c1_199 = arith.constant 1 : index
    %c101_200 = arith.constant 101 : index
    %537 = vector.load %arg4[%c1_199, %c101_200] : memref<2x358xf32, #tpu.memory_space<vmem>>, vector<1x256xf32>
    %c96_201 = arith.constant 96 : index
    %538 = memref.load %arg1[%c96_201] : memref<98xf32, #tpu.memory_space<smem>>
    %539 = vector.broadcast %538 : f32 to vector<1x256xf32>
    %540 = arith.mulf %539, %537 : vector<1x256xf32>
    %541 = arith.addf %536, %540 : vector<1x256xf32>
    %542 = arith.mulf %541, %86 : vector<1x256xf32>
    %543 = arith.addf %399, %542 : vector<1x256xf32>
    %c0_202 = arith.constant 0 : index
    %c6 = arith.constant 6 : index
    %544 = vector.load %arg4[%c0_202, %c6] : memref<2x358xf32, #tpu.memory_space<vmem>>, vector<1x256xf32>
    %c6_203 = arith.constant 6 : index
    %545 = memref.load %arg1[%c6_203] : memref<98xf32, #tpu.memory_space<smem>>
    %546 = vector.broadcast %545 : f32 to vector<1x256xf32>
    %547 = arith.mulf %546, %544 : vector<1x256xf32>
    %c0_204 = arith.constant 0 : index
    %c22_205 = arith.constant 22 : index
    %548 = vector.load %arg4[%c0_204, %c22_205] : memref<2x358xf32, #tpu.memory_space<vmem>>, vector<1x256xf32>
    %c13 = arith.constant 13 : index
    %549 = memref.load %arg1[%c13] : memref<98xf32, #tpu.memory_space<smem>>
    %550 = vector.broadcast %549 : f32 to vector<1x256xf32>
    %551 = arith.mulf %550, %548 : vector<1x256xf32>
    %552 = arith.addf %547, %551 : vector<1x256xf32>
    %c0_206 = arith.constant 0 : index
    %c38_207 = arith.constant 38 : index
    %553 = vector.load %arg4[%c0_206, %c38_207] : memref<2x358xf32, #tpu.memory_space<vmem>>, vector<1x256xf32>
    %c20_208 = arith.constant 20 : index
    %554 = memref.load %arg1[%c20_208] : memref<98xf32, #tpu.memory_space<smem>>
    %555 = vector.broadcast %554 : f32 to vector<1x256xf32>
    %556 = arith.mulf %555, %553 : vector<1x256xf32>
    %557 = arith.addf %552, %556 : vector<1x256xf32>
    %c0_209 = arith.constant 0 : index
    %c54_210 = arith.constant 54 : index
    %558 = vector.load %arg4[%c0_209, %c54_210] : memref<2x358xf32, #tpu.memory_space<vmem>>, vector<1x256xf32>
    %c27 = arith.constant 27 : index
    %559 = memref.load %arg1[%c27] : memref<98xf32, #tpu.memory_space<smem>>
    %560 = vector.broadcast %559 : f32 to vector<1x256xf32>
    %561 = arith.mulf %560, %558 : vector<1x256xf32>
    %562 = arith.addf %557, %561 : vector<1x256xf32>
    %c0_211 = arith.constant 0 : index
    %c70_212 = arith.constant 70 : index
    %563 = vector.load %arg4[%c0_211, %c70_212] : memref<2x358xf32, #tpu.memory_space<vmem>>, vector<1x256xf32>
    %c34_213 = arith.constant 34 : index
    %564 = memref.load %arg1[%c34_213] : memref<98xf32, #tpu.memory_space<smem>>
    %565 = vector.broadcast %564 : f32 to vector<1x256xf32>
    %566 = arith.mulf %565, %563 : vector<1x256xf32>
    %567 = arith.addf %562, %566 : vector<1x256xf32>
    %c0_214 = arith.constant 0 : index
    %c86_215 = arith.constant 86 : index
    %568 = vector.load %arg4[%c0_214, %c86_215] : memref<2x358xf32, #tpu.memory_space<vmem>>, vector<1x256xf32>
    %c41 = arith.constant 41 : index
    %569 = memref.load %arg1[%c41] : memref<98xf32, #tpu.memory_space<smem>>
    %570 = vector.broadcast %569 : f32 to vector<1x256xf32>
    %571 = arith.mulf %570, %568 : vector<1x256xf32>
    %572 = arith.addf %567, %571 : vector<1x256xf32>
    %c0_216 = arith.constant 0 : index
    %c102 = arith.constant 102 : index
    %573 = vector.load %arg4[%c0_216, %c102] : memref<2x358xf32, #tpu.memory_space<vmem>>, vector<1x256xf32>
    %c48_217 = arith.constant 48 : index
    %574 = memref.load %arg1[%c48_217] : memref<98xf32, #tpu.memory_space<smem>>
    %575 = vector.broadcast %574 : f32 to vector<1x256xf32>
    %576 = arith.mulf %575, %573 : vector<1x256xf32>
    %577 = arith.addf %572, %576 : vector<1x256xf32>
    %578 = arith.mulf %577, %97 : vector<1x256xf32>
    %579 = arith.addf %435, %578 : vector<1x256xf32>
    %c1_218 = arith.constant 1 : index
    %c6_219 = arith.constant 6 : index
    %580 = vector.load %arg4[%c1_218, %c6_219] : memref<2x358xf32, #tpu.memory_space<vmem>>, vector<1x256xf32>
    %c55 = arith.constant 55 : index
    %581 = memref.load %arg1[%c55] : memref<98xf32, #tpu.memory_space<smem>>
    %582 = vector.broadcast %581 : f32 to vector<1x256xf32>
    %583 = arith.mulf %582, %580 : vector<1x256xf32>
    %c1_220 = arith.constant 1 : index
    %c22_221 = arith.constant 22 : index
    %584 = vector.load %arg4[%c1_220, %c22_221] : memref<2x358xf32, #tpu.memory_space<vmem>>, vector<1x256xf32>
    %c62 = arith.constant 62 : index
    %585 = memref.load %arg1[%c62] : memref<98xf32, #tpu.memory_space<smem>>
    %586 = vector.broadcast %585 : f32 to vector<1x256xf32>
    %587 = arith.mulf %586, %584 : vector<1x256xf32>
    %588 = arith.addf %583, %587 : vector<1x256xf32>
    %c1_222 = arith.constant 1 : index
    %c38_223 = arith.constant 38 : index
    %589 = vector.load %arg4[%c1_222, %c38_223] : memref<2x358xf32, #tpu.memory_space<vmem>>, vector<1x256xf32>
    %c69_224 = arith.constant 69 : index
    %590 = memref.load %arg1[%c69_224] : memref<98xf32, #tpu.memory_space<smem>>
    %591 = vector.broadcast %590 : f32 to vector<1x256xf32>
    %592 = arith.mulf %591, %589 : vector<1x256xf32>
    %593 = arith.addf %588, %592 : vector<1x256xf32>
    %c1_225 = arith.constant 1 : index
    %c54_226 = arith.constant 54 : index
    %594 = vector.load %arg4[%c1_225, %c54_226] : memref<2x358xf32, #tpu.memory_space<vmem>>, vector<1x256xf32>
    %c76 = arith.constant 76 : index
    %595 = memref.load %arg1[%c76] : memref<98xf32, #tpu.memory_space<smem>>
    %596 = vector.broadcast %595 : f32 to vector<1x256xf32>
    %597 = arith.mulf %596, %594 : vector<1x256xf32>
    %598 = arith.addf %593, %597 : vector<1x256xf32>
    %c1_227 = arith.constant 1 : index
    %c70_228 = arith.constant 70 : index
    %599 = vector.load %arg4[%c1_227, %c70_228] : memref<2x358xf32, #tpu.memory_space<vmem>>, vector<1x256xf32>
    %c83_229 = arith.constant 83 : index
    %600 = memref.load %arg1[%c83_229] : memref<98xf32, #tpu.memory_space<smem>>
    %601 = vector.broadcast %600 : f32 to vector<1x256xf32>
    %602 = arith.mulf %601, %599 : vector<1x256xf32>
    %603 = arith.addf %598, %602 : vector<1x256xf32>
    %c1_230 = arith.constant 1 : index
    %c86_231 = arith.constant 86 : index
    %604 = vector.load %arg4[%c1_230, %c86_231] : memref<2x358xf32, #tpu.memory_space<vmem>>, vector<1x256xf32>
    %c90 = arith.constant 90 : index
    %605 = memref.load %arg1[%c90] : memref<98xf32, #tpu.memory_space<smem>>
    %606 = vector.broadcast %605 : f32 to vector<1x256xf32>
    %607 = arith.mulf %606, %604 : vector<1x256xf32>
    %608 = arith.addf %603, %607 : vector<1x256xf32>
    %c1_232 = arith.constant 1 : index
    %c102_233 = arith.constant 102 : index
    %609 = vector.load %arg4[%c1_232, %c102_233] : memref<2x358xf32, #tpu.memory_space<vmem>>, vector<1x256xf32>
    %c97_234 = arith.constant 97 : index
    %610 = memref.load %arg1[%c97_234] : memref<98xf32, #tpu.memory_space<smem>>
    %611 = vector.broadcast %610 : f32 to vector<1x256xf32>
    %612 = arith.mulf %611, %609 : vector<1x256xf32>
    %613 = arith.addf %608, %612 : vector<1x256xf32>
    %614 = arith.mulf %613, %97 : vector<1x256xf32>
    %615 = arith.addf %471, %614 : vector<1x256xf32>
    %616 = arith.addf %579, %615 : vector<1x256xf32>
    %617 = arith.addf %507, %543 : vector<1x256xf32>
    %618 = arith.addf %616, %617 : vector<1x256xf32>
    %619 = arith.negf %618 : vector<1x256xf32>
    %620 = math.exp %619 : vector<1x256xf32>
    %cst_235 = arith.constant 1.000000e+00 : f32
    %621 = vector.broadcast %cst_235 : f32 to vector<1x256xf32>
    %622 = arith.addf %621, %620 : vector<1x256xf32>
    %623 = arith.divf %621, %622 : vector<1x256xf32>
    %c0_236 = arith.constant 0 : index
    %c0_237 = arith.constant 0 : index
    %c0_238 = arith.constant 0 : index
    %624 = vector.load %arg2[%c0_236, %c0_237, %c0_238] : memref<2x4x256xf32, #tpu.memory_space<vmem>>, vector<1x4x256xf32>
    %625 = vector.shape_cast %624 : vector<1x4x256xf32> to vector<4x256xf32>
    %626 = vector.broadcast %623 : vector<1x256xf32> to vector<4x256xf32>
    %627 = arith.mulf %625, %626 : vector<4x256xf32>
    %c0_239 = arith.constant 0 : index
    %c0_240 = arith.constant 0 : index
    %c0_241 = arith.constant 0 : index
    %628 = vector.load %arg3[%c0_239, %c0_240, %c0_241] : memref<2x4x256xf32, #tpu.memory_space<vmem>>, vector<1x4x256xf32>
    %629 = vector.shape_cast %628 : vector<1x4x256xf32> to vector<4x256xf32>
    %630 = vector.shape_cast %627 : vector<4x256xf32> to vector<1x4x256xf32>
    tpu.vector_store %arg3[%c0_239, %c0_240, %c0_241], %630 {strides = array<i32>} : memref<2x4x256xf32, #tpu.memory_space<vmem>>, vector<1x4x256xf32>,
    %c1_242 = arith.constant 1 : index
    %c0_243 = arith.constant 0 : index
    %c0_244 = arith.constant 0 : index
    %631 = vector.load %arg2[%c1_242, %c0_243, %c0_244] : memref<2x4x256xf32, #tpu.memory_space<vmem>>, vector<1x4x256xf32>
    %632 = vector.shape_cast %631 : vector<1x4x256xf32> to vector<4x256xf32>
    %cst_245 = arith.constant dense<0xFF800000> : vector<256xf32>
    %633 = vector.multi_reduction <maximumf>, %632, %cst_245 [0] : vector<4x256xf32> to vector<256xf32>
    %634 = vector.shape_cast %633 : vector<256xf32> to vector<1x256xf32>
    %cst_246 = arith.constant dense<0.000000e+00> : vector<256xf32>
    %635 = vector.multi_reduction <add>, %632, %cst_246 [0] : vector<4x256xf32> to vector<256xf32>
    %636 = vector.shape_cast %635 : vector<256xf32> to vector<1x256xf32>
    %cst_247 = arith.constant 2.500000e-01 : f32
    %637 = vector.broadcast %cst_247 : f32 to vector<1x256xf32>
    %638 = arith.mulf %636, %637 : vector<1x256xf32>
    %c0_248 = arith.constant 0 : index
    %c51_249 = arith.constant 51 : index
    %639 = vector.load %arg4[%c0_248, %c51_249] : memref<2x358xf32, #tpu.memory_space<vmem>>, vector<1x256xf32>
    tpu.vector_store %arg4[%c0_248, %c51_249], %634 {strides = array<i32>} : memref<2x358xf32, #tpu.memory_space<vmem>>, vector<1x256xf32>,
    %c1_250 = arith.constant 1 : index
    %c51_251 = arith.constant 51 : index
    %640 = vector.load %arg4[%c1_250, %c51_251] : memref<2x358xf32, #tpu.memory_space<vmem>>, vector<1x256xf32>
    tpu.vector_store %arg4[%c1_250, %c51_251], %638 {strides = array<i32>} : memref<2x358xf32, #tpu.memory_space<vmem>>, vector<1x256xf32>,
    %cst_252 = arith.constant 0.000000e+00 : f32
    %641 = vector.broadcast %cst_252 : f32 to vector<1x256xf32>
    %cst_253 = arith.constant 0.000000e+00 : f32
    %642 = vector.broadcast %cst_253 : f32 to vector<1x256xf32>
    %cst_254 = arith.constant 0.000000e+00 : f32
    %643 = vector.broadcast %cst_254 : f32 to vector<1x256xf32>
    %cst_255 = arith.constant 0.000000e+00 : f32
    %644 = vector.broadcast %cst_255 : f32 to vector<1x256xf32>
    %c0_256 = arith.constant 0 : index
    %c0_257 = arith.constant 0 : index
    %645 = vector.load %arg4[%c0_256, %c0_257] : memref<2x358xf32, #tpu.memory_space<vmem>>, vector<1x256xf32>
    %c0_258 = arith.constant 0 : index
    %646 = memref.load %arg1[%c0_258] : memref<98xf32, #tpu.memory_space<smem>>
    %647 = vector.broadcast %646 : f32 to vector<1x256xf32>
    %648 = arith.mulf %647, %645 : vector<1x256xf32>
    %c0_259 = arith.constant 0 : index
    %c16_260 = arith.constant 16 : index
    %649 = vector.load %arg4[%c0_259, %c16_260] : memref<2x358xf32, #tpu.memory_space<vmem>>, vector<1x256xf32>
    %c7_261 = arith.constant 7 : index
    %650 = memref.load %arg1[%c7_261] : memref<98xf32, #tpu.memory_space<smem>>
    %651 = vector.broadcast %650 : f32 to vector<1x256xf32>
    %652 = arith.mulf %651, %649 : vector<1x256xf32>
    %653 = arith.addf %648, %652 : vector<1x256xf32>
    %c0_262 = arith.constant 0 : index
    %c32_263 = arith.constant 32 : index
    %654 = vector.load %arg4[%c0_262, %c32_263] : memref<2x358xf32, #tpu.memory_space<vmem>>, vector<1x256xf32>
    %c14_264 = arith.constant 14 : index
    %655 = memref.load %arg1[%c14_264] : memref<98xf32, #tpu.memory_space<smem>>
    %656 = vector.broadcast %655 : f32 to vector<1x256xf32>
    %657 = arith.mulf %656, %654 : vector<1x256xf32>
    %658 = arith.addf %653, %657 : vector<1x256xf32>
    %c0_265 = arith.constant 0 : index
    %c48_266 = arith.constant 48 : index
    %659 = vector.load %arg4[%c0_265, %c48_266] : memref<2x358xf32, #tpu.memory_space<vmem>>, vector<1x256xf32>
    %c21_267 = arith.constant 21 : index
    %660 = memref.load %arg1[%c21_267] : memref<98xf32, #tpu.memory_space<smem>>
    %661 = vector.broadcast %660 : f32 to vector<1x256xf32>
    %662 = arith.mulf %661, %659 : vector<1x256xf32>
    %663 = arith.addf %658, %662 : vector<1x256xf32>
    %c0_268 = arith.constant 0 : index
    %c64_269 = arith.constant 64 : index
    %664 = vector.load %arg4[%c0_268, %c64_269] : memref<2x358xf32, #tpu.memory_space<vmem>>, vector<1x256xf32>
    %c28_270 = arith.constant 28 : index
    %665 = memref.load %arg1[%c28_270] : memref<98xf32, #tpu.memory_space<smem>>
    %666 = vector.broadcast %665 : f32 to vector<1x256xf32>
    %667 = arith.mulf %666, %664 : vector<1x256xf32>
    %668 = arith.addf %663, %667 : vector<1x256xf32>
    %c0_271 = arith.constant 0 : index
    %c80_272 = arith.constant 80 : index
    %669 = vector.load %arg4[%c0_271, %c80_272] : memref<2x358xf32, #tpu.memory_space<vmem>>, vector<1x256xf32>
    %c35_273 = arith.constant 35 : index
    %670 = memref.load %arg1[%c35_273] : memref<98xf32, #tpu.memory_space<smem>>
    %671 = vector.broadcast %670 : f32 to vector<1x256xf32>
    %672 = arith.mulf %671, %669 : vector<1x256xf32>
    %673 = arith.addf %668, %672 : vector<1x256xf32>
    %c0_274 = arith.constant 0 : index
    %c96_275 = arith.constant 96 : index
    %674 = vector.load %arg4[%c0_274, %c96_275] : memref<2x358xf32, #tpu.memory_space<vmem>>, vector<1x256xf32>
    %c42_276 = arith.constant 42 : index
    %675 = memref.load %arg1[%c42_276] : memref<98xf32, #tpu.memory_space<smem>>
    %676 = vector.broadcast %675 : f32 to vector<1x256xf32>
    %677 = arith.mulf %676, %674 : vector<1x256xf32>
    %678 = arith.addf %673, %677 : vector<1x256xf32>
    %679 = arith.mulf %678, %31 : vector<1x256xf32>
    %680 = arith.addf %641, %679 : vector<1x256xf32>
    %c1_277 = arith.constant 1 : index
    %c0_278 = arith.constant 0 : index
    %681 = vector.load %arg4[%c1_277, %c0_278] : memref<2x358xf32, #tpu.memory_space<vmem>>, vector<1x256xf32>
    %c49_279 = arith.constant 49 : index
    %682 = memref.load %arg1[%c49_279] : memref<98xf32, #tpu.memory_space<smem>>
    %683 = vector.broadcast %682 : f32 to vector<1x256xf32>
    %684 = arith.mulf %683, %681 : vector<1x256xf32>
    %c1_280 = arith.constant 1 : index
    %c16_281 = arith.constant 16 : index
    %685 = vector.load %arg4[%c1_280, %c16_281] : memref<2x358xf32, #tpu.memory_space<vmem>>, vector<1x256xf32>
    %c56_282 = arith.constant 56 : index
    %686 = memref.load %arg1[%c56_282] : memref<98xf32, #tpu.memory_space<smem>>
    %687 = vector.broadcast %686 : f32 to vector<1x256xf32>
    %688 = arith.mulf %687, %685 : vector<1x256xf32>
    %689 = arith.addf %684, %688 : vector<1x256xf32>
    %c1_283 = arith.constant 1 : index
    %c32_284 = arith.constant 32 : index
    %690 = vector.load %arg4[%c1_283, %c32_284] : memref<2x358xf32, #tpu.memory_space<vmem>>, vector<1x256xf32>
    %c63_285 = arith.constant 63 : index
    %691 = memref.load %arg1[%c63_285] : memref<98xf32, #tpu.memory_space<smem>>
    %692 = vector.broadcast %691 : f32 to vector<1x256xf32>
    %693 = arith.mulf %692, %690 : vector<1x256xf32>
    %694 = arith.addf %689, %693 : vector<1x256xf32>
    %c1_286 = arith.constant 1 : index
    %c48_287 = arith.constant 48 : index
    %695 = vector.load %arg4[%c1_286, %c48_287] : memref<2x358xf32, #tpu.memory_space<vmem>>, vector<1x256xf32>
    %c70_288 = arith.constant 70 : index
    %696 = memref.load %arg1[%c70_288] : memref<98xf32, #tpu.memory_space<smem>>
    %697 = vector.broadcast %696 : f32 to vector<1x256xf32>
    %698 = arith.mulf %697, %695 : vector<1x256xf32>
    %699 = arith.addf %694, %698 : vector<1x256xf32>
    %c1_289 = arith.constant 1 : index
    %c64_290 = arith.constant 64 : index
    %700 = vector.load %arg4[%c1_289, %c64_290] : memref<2x358xf32, #tpu.memory_space<vmem>>, vector<1x256xf32>
    %c77_291 = arith.constant 77 : index
    %701 = memref.load %arg1[%c77_291] : memref<98xf32, #tpu.memory_space<smem>>
    %702 = vector.broadcast %701 : f32 to vector<1x256xf32>
    %703 = arith.mulf %702, %700 : vector<1x256xf32>
    %704 = arith.addf %699, %703 : vector<1x256xf32>
    %c1_292 = arith.constant 1 : index
    %c80_293 = arith.constant 80 : index
    %705 = vector.load %arg4[%c1_292, %c80_293] : memref<2x358xf32, #tpu.memory_space<vmem>>, vector<1x256xf32>
    %c84_294 = arith.constant 84 : index
    %706 = memref.load %arg1[%c84_294] : memref<98xf32, #tpu.memory_space<smem>>
    %707 = vector.broadcast %706 : f32 to vector<1x256xf32>
    %708 = arith.mulf %707, %705 : vector<1x256xf32>
    %709 = arith.addf %704, %708 : vector<1x256xf32>
    %c1_295 = arith.constant 1 : index
    %c96_296 = arith.constant 96 : index
    %710 = vector.load %arg4[%c1_295, %c96_296] : memref<2x358xf32, #tpu.memory_space<vmem>>, vector<1x256xf32>
    %c91_297 = arith.constant 91 : index
    %711 = memref.load %arg1[%c91_297] : memref<98xf32, #tpu.memory_space<smem>>
    %712 = vector.broadcast %711 : f32 to vector<1x256xf32>
    %713 = arith.mulf %712, %710 : vector<1x256xf32>
    %714 = arith.addf %709, %713 : vector<1x256xf32>
    %715 = arith.mulf %714, %31 : vector<1x256xf32>
    %716 = arith.addf %642, %715 : vector<1x256xf32>
    %c0_298 = arith.constant 0 : index
    %c1_299 = arith.constant 1 : index
    %717 = vector.load %arg4[%c0_298, %c1_299] : memref<2x358xf32, #tpu.memory_space<vmem>>, vector<1x256xf32>
    %c1_300 = arith.constant 1 : index
    %718 = memref.load %arg1[%c1_300] : memref<98xf32, #tpu.memory_space<smem>>
    %719 = vector.broadcast %718 : f32 to vector<1x256xf32>
    %720 = arith.mulf %719, %717 : vector<1x256xf32>
    %c0_301 = arith.constant 0 : index
    %c17_302 = arith.constant 17 : index
    %721 = vector.load %arg4[%c0_301, %c17_302] : memref<2x358xf32, #tpu.memory_space<vmem>>, vector<1x256xf32>
    %c8_303 = arith.constant 8 : index
    %722 = memref.load %arg1[%c8_303] : memref<98xf32, #tpu.memory_space<smem>>
    %723 = vector.broadcast %722 : f32 to vector<1x256xf32>
    %724 = arith.mulf %723, %721 : vector<1x256xf32>
    %725 = arith.addf %720, %724 : vector<1x256xf32>
    %c0_304 = arith.constant 0 : index
    %c33_305 = arith.constant 33 : index
    %726 = vector.load %arg4[%c0_304, %c33_305] : memref<2x358xf32, #tpu.memory_space<vmem>>, vector<1x256xf32>
    %c15_306 = arith.constant 15 : index
    %727 = memref.load %arg1[%c15_306] : memref<98xf32, #tpu.memory_space<smem>>
    %728 = vector.broadcast %727 : f32 to vector<1x256xf32>
    %729 = arith.mulf %728, %726 : vector<1x256xf32>
    %730 = arith.addf %725, %729 : vector<1x256xf32>
    %c0_307 = arith.constant 0 : index
    %c49_308 = arith.constant 49 : index
    %731 = vector.load %arg4[%c0_307, %c49_308] : memref<2x358xf32, #tpu.memory_space<vmem>>, vector<1x256xf32>
    %c22_309 = arith.constant 22 : index
    %732 = memref.load %arg1[%c22_309] : memref<98xf32, #tpu.memory_space<smem>>
    %733 = vector.broadcast %732 : f32 to vector<1x256xf32>
    %734 = arith.mulf %733, %731 : vector<1x256xf32>
    %735 = arith.addf %730, %734 : vector<1x256xf32>
    %c0_310 = arith.constant 0 : index
    %c65_311 = arith.constant 65 : index
    %736 = vector.load %arg4[%c0_310, %c65_311] : memref<2x358xf32, #tpu.memory_space<vmem>>, vector<1x256xf32>
    %c29_312 = arith.constant 29 : index
    %737 = memref.load %arg1[%c29_312] : memref<98xf32, #tpu.memory_space<smem>>
    %738 = vector.broadcast %737 : f32 to vector<1x256xf32>
    %739 = arith.mulf %738, %736 : vector<1x256xf32>
    %740 = arith.addf %735, %739 : vector<1x256xf32>
    %c0_313 = arith.constant 0 : index
    %c81_314 = arith.constant 81 : index
    %741 = vector.load %arg4[%c0_313, %c81_314] : memref<2x358xf32, #tpu.memory_space<vmem>>, vector<1x256xf32>
    %c36_315 = arith.constant 36 : index
    %742 = memref.load %arg1[%c36_315] : memref<98xf32, #tpu.memory_space<smem>>
    %743 = vector.broadcast %742 : f32 to vector<1x256xf32>
    %744 = arith.mulf %743, %741 : vector<1x256xf32>
    %745 = arith.addf %740, %744 : vector<1x256xf32>
    %c0_316 = arith.constant 0 : index
    %c97_317 = arith.constant 97 : index
    %746 = vector.load %arg4[%c0_316, %c97_317] : memref<2x358xf32, #tpu.memory_space<vmem>>, vector<1x256xf32>
    %c43_318 = arith.constant 43 : index
    %747 = memref.load %arg1[%c43_318] : memref<98xf32, #tpu.memory_space<smem>>
    %748 = vector.broadcast %747 : f32 to vector<1x256xf32>
    %749 = arith.mulf %748, %746 : vector<1x256xf32>
    %750 = arith.addf %745, %749 : vector<1x256xf32>
    %751 = arith.mulf %750, %42 : vector<1x256xf32>
    %752 = arith.addf %643, %751 : vector<1x256xf32>
    %c1_319 = arith.constant 1 : index
    %c1_320 = arith.constant 1 : index
    %753 = vector.load %arg4[%c1_319, %c1_320] : memref<2x358xf32, #tpu.memory_space<vmem>>, vector<1x256xf32>
    %c50_321 = arith.constant 50 : index
    %754 = memref.load %arg1[%c50_321] : memref<98xf32, #tpu.memory_space<smem>>
    %755 = vector.broadcast %754 : f32 to vector<1x256xf32>
    %756 = arith.mulf %755, %753 : vector<1x256xf32>
    %c1_322 = arith.constant 1 : index
    %c17_323 = arith.constant 17 : index
    %757 = vector.load %arg4[%c1_322, %c17_323] : memref<2x358xf32, #tpu.memory_space<vmem>>, vector<1x256xf32>
    %c57_324 = arith.constant 57 : index
    %758 = memref.load %arg1[%c57_324] : memref<98xf32, #tpu.memory_space<smem>>
    %759 = vector.broadcast %758 : f32 to vector<1x256xf32>
    %760 = arith.mulf %759, %757 : vector<1x256xf32>
    %761 = arith.addf %756, %760 : vector<1x256xf32>
    %c1_325 = arith.constant 1 : index
    %c33_326 = arith.constant 33 : index
    %762 = vector.load %arg4[%c1_325, %c33_326] : memref<2x358xf32, #tpu.memory_space<vmem>>, vector<1x256xf32>
    %c64_327 = arith.constant 64 : index
    %763 = memref.load %arg1[%c64_327] : memref<98xf32, #tpu.memory_space<smem>>
    %764 = vector.broadcast %763 : f32 to vector<1x256xf32>
    %765 = arith.mulf %764, %762 : vector<1x256xf32>
    %766 = arith.addf %761, %765 : vector<1x256xf32>
    %c1_328 = arith.constant 1 : index
    %c49_329 = arith.constant 49 : index
    %767 = vector.load %arg4[%c1_328, %c49_329] : memref<2x358xf32, #tpu.memory_space<vmem>>, vector<1x256xf32>
    %c71_330 = arith.constant 71 : index
    %768 = memref.load %arg1[%c71_330] : memref<98xf32, #tpu.memory_space<smem>>
    %769 = vector.broadcast %768 : f32 to vector<1x256xf32>
    %770 = arith.mulf %769, %767 : vector<1x256xf32>
    %771 = arith.addf %766, %770 : vector<1x256xf32>
    %c1_331 = arith.constant 1 : index
    %c65_332 = arith.constant 65 : index
    %772 = vector.load %arg4[%c1_331, %c65_332] : memref<2x358xf32, #tpu.memory_space<vmem>>, vector<1x256xf32>
    %c78_333 = arith.constant 78 : index
    %773 = memref.load %arg1[%c78_333] : memref<98xf32, #tpu.memory_space<smem>>
    %774 = vector.broadcast %773 : f32 to vector<1x256xf32>
    %775 = arith.mulf %774, %772 : vector<1x256xf32>
    %776 = arith.addf %771, %775 : vector<1x256xf32>
    %c1_334 = arith.constant 1 : index
    %c81_335 = arith.constant 81 : index
    %777 = vector.load %arg4[%c1_334, %c81_335] : memref<2x358xf32, #tpu.memory_space<vmem>>, vector<1x256xf32>
    %c85_336 = arith.constant 85 : index
    %778 = memref.load %arg1[%c85_336] : memref<98xf32, #tpu.memory_space<smem>>
    %779 = vector.broadcast %778 : f32 to vector<1x256xf32>
    %780 = arith.mulf %779, %777 : vector<1x256xf32>
    %781 = arith.addf %776, %780 : vector<1x256xf32>
    %c1_337 = arith.constant 1 : index
    %c97_338 = arith.constant 97 : index
    %782 = vector.load %arg4[%c1_337, %c97_338] : memref<2x358xf32, #tpu.memory_space<vmem>>, vector<1x256xf32>
    %c92_339 = arith.constant 92 : index
    %783 = memref.load %arg1[%c92_339] : memref<98xf32, #tpu.memory_space<smem>>
    %784 = vector.broadcast %783 : f32 to vector<1x256xf32>
    %785 = arith.mulf %784, %782 : vector<1x256xf32>
    %786 = arith.addf %781, %785 : vector<1x256xf32>
    %787 = arith.mulf %786, %42 : vector<1x256xf32>
    %788 = arith.addf %644, %787 : vector<1x256xf32>
    %c0_340 = arith.constant 0 : index
    %c2_341 = arith.constant 2 : index
    %789 = vector.load %arg4[%c0_340, %c2_341] : memref<2x358xf32, #tpu.memory_space<vmem>>, vector<1x256xf32>
    %c2_342 = arith.constant 2 : index
    %790 = memref.load %arg1[%c2_342] : memref<98xf32, #tpu.memory_space<smem>>
    %791 = vector.broadcast %790 : f32 to vector<1x256xf32>
    %792 = arith.mulf %791, %789 : vector<1x256xf32>
    %c0_343 = arith.constant 0 : index
    %c18_344 = arith.constant 18 : index
    %793 = vector.load %arg4[%c0_343, %c18_344] : memref<2x358xf32, #tpu.memory_space<vmem>>, vector<1x256xf32>
    %c9_345 = arith.constant 9 : index
    %794 = memref.load %arg1[%c9_345] : memref<98xf32, #tpu.memory_space<smem>>
    %795 = vector.broadcast %794 : f32 to vector<1x256xf32>
    %796 = arith.mulf %795, %793 : vector<1x256xf32>
    %797 = arith.addf %792, %796 : vector<1x256xf32>
    %c0_346 = arith.constant 0 : index
    %c34_347 = arith.constant 34 : index
    %798 = vector.load %arg4[%c0_346, %c34_347] : memref<2x358xf32, #tpu.memory_space<vmem>>, vector<1x256xf32>
    %c16_348 = arith.constant 16 : index
    %799 = memref.load %arg1[%c16_348] : memref<98xf32, #tpu.memory_space<smem>>
    %800 = vector.broadcast %799 : f32 to vector<1x256xf32>
    %801 = arith.mulf %800, %798 : vector<1x256xf32>
    %802 = arith.addf %797, %801 : vector<1x256xf32>
    %c0_349 = arith.constant 0 : index
    %c50_350 = arith.constant 50 : index
    %803 = vector.load %arg4[%c0_349, %c50_350] : memref<2x358xf32, #tpu.memory_space<vmem>>, vector<1x256xf32>
    %c23_351 = arith.constant 23 : index
    %804 = memref.load %arg1[%c23_351] : memref<98xf32, #tpu.memory_space<smem>>
    %805 = vector.broadcast %804 : f32 to vector<1x256xf32>
    %806 = arith.mulf %805, %803 : vector<1x256xf32>
    %807 = arith.addf %802, %806 : vector<1x256xf32>
    %c0_352 = arith.constant 0 : index
    %c66_353 = arith.constant 66 : index
    %808 = vector.load %arg4[%c0_352, %c66_353] : memref<2x358xf32, #tpu.memory_space<vmem>>, vector<1x256xf32>
    %c30_354 = arith.constant 30 : index
    %809 = memref.load %arg1[%c30_354] : memref<98xf32, #tpu.memory_space<smem>>
    %810 = vector.broadcast %809 : f32 to vector<1x256xf32>
    %811 = arith.mulf %810, %808 : vector<1x256xf32>
    %812 = arith.addf %807, %811 : vector<1x256xf32>
    %c0_355 = arith.constant 0 : index
    %c82_356 = arith.constant 82 : index
    %813 = vector.load %arg4[%c0_355, %c82_356] : memref<2x358xf32, #tpu.memory_space<vmem>>, vector<1x256xf32>
    %c37_357 = arith.constant 37 : index
    %814 = memref.load %arg1[%c37_357] : memref<98xf32, #tpu.memory_space<smem>>
    %815 = vector.broadcast %814 : f32 to vector<1x256xf32>
    %816 = arith.mulf %815, %813 : vector<1x256xf32>
    %817 = arith.addf %812, %816 : vector<1x256xf32>
    %c0_358 = arith.constant 0 : index
    %c98_359 = arith.constant 98 : index
    %818 = vector.load %arg4[%c0_358, %c98_359] : memref<2x358xf32, #tpu.memory_space<vmem>>, vector<1x256xf32>
    %c44_360 = arith.constant 44 : index
    %819 = memref.load %arg1[%c44_360] : memref<98xf32, #tpu.memory_space<smem>>
    %820 = vector.broadcast %819 : f32 to vector<1x256xf32>
    %821 = arith.mulf %820, %818 : vector<1x256xf32>
    %822 = arith.addf %817, %821 : vector<1x256xf32>
    %823 = arith.mulf %822, %53 : vector<1x256xf32>
    %824 = arith.addf %680, %823 : vector<1x256xf32>
    %c1_361 = arith.constant 1 : index
    %c2_362 = arith.constant 2 : index
    %825 = vector.load %arg4[%c1_361, %c2_362] : memref<2x358xf32, #tpu.memory_space<vmem>>, vector<1x256xf32>
    %c51_363 = arith.constant 51 : index
    %826 = memref.load %arg1[%c51_363] : memref<98xf32, #tpu.memory_space<smem>>
    %827 = vector.broadcast %826 : f32 to vector<1x256xf32>
    %828 = arith.mulf %827, %825 : vector<1x256xf32>
    %c1_364 = arith.constant 1 : index
    %c18_365 = arith.constant 18 : index
    %829 = vector.load %arg4[%c1_364, %c18_365] : memref<2x358xf32, #tpu.memory_space<vmem>>, vector<1x256xf32>
    %c58_366 = arith.constant 58 : index
    %830 = memref.load %arg1[%c58_366] : memref<98xf32, #tpu.memory_space<smem>>
    %831 = vector.broadcast %830 : f32 to vector<1x256xf32>
    %832 = arith.mulf %831, %829 : vector<1x256xf32>
    %833 = arith.addf %828, %832 : vector<1x256xf32>
    %c1_367 = arith.constant 1 : index
    %c34_368 = arith.constant 34 : index
    %834 = vector.load %arg4[%c1_367, %c34_368] : memref<2x358xf32, #tpu.memory_space<vmem>>, vector<1x256xf32>
    %c65_369 = arith.constant 65 : index
    %835 = memref.load %arg1[%c65_369] : memref<98xf32, #tpu.memory_space<smem>>
    %836 = vector.broadcast %835 : f32 to vector<1x256xf32>
    %837 = arith.mulf %836, %834 : vector<1x256xf32>
    %838 = arith.addf %833, %837 : vector<1x256xf32>
    %c1_370 = arith.constant 1 : index
    %c50_371 = arith.constant 50 : index
    %839 = vector.load %arg4[%c1_370, %c50_371] : memref<2x358xf32, #tpu.memory_space<vmem>>, vector<1x256xf32>
    %c72_372 = arith.constant 72 : index
    %840 = memref.load %arg1[%c72_372] : memref<98xf32, #tpu.memory_space<smem>>
    %841 = vector.broadcast %840 : f32 to vector<1x256xf32>
    %842 = arith.mulf %841, %839 : vector<1x256xf32>
    %843 = arith.addf %838, %842 : vector<1x256xf32>
    %c1_373 = arith.constant 1 : index
    %c66_374 = arith.constant 66 : index
    %844 = vector.load %arg4[%c1_373, %c66_374] : memref<2x358xf32, #tpu.memory_space<vmem>>, vector<1x256xf32>
    %c79_375 = arith.constant 79 : index
    %845 = memref.load %arg1[%c79_375] : memref<98xf32, #tpu.memory_space<smem>>
    %846 = vector.broadcast %845 : f32 to vector<1x256xf32>
    %847 = arith.mulf %846, %844 : vector<1x256xf32>
    %848 = arith.addf %843, %847 : vector<1x256xf32>
    %c1_376 = arith.constant 1 : index
    %c82_377 = arith.constant 82 : index
    %849 = vector.load %arg4[%c1_376, %c82_377] : memref<2x358xf32, #tpu.memory_space<vmem>>, vector<1x256xf32>
    %c86_378 = arith.constant 86 : index
    %850 = memref.load %arg1[%c86_378] : memref<98xf32, #tpu.memory_space<smem>>
    %851 = vector.broadcast %850 : f32 to vector<1x256xf32>
    %852 = arith.mulf %851, %849 : vector<1x256xf32>
    %853 = arith.addf %848, %852 : vector<1x256xf32>
    %c1_379 = arith.constant 1 : index
    %c98_380 = arith.constant 98 : index
    %854 = vector.load %arg4[%c1_379, %c98_380] : memref<2x358xf32, #tpu.memory_space<vmem>>, vector<1x256xf32>
    %c93_381 = arith.constant 93 : index
    %855 = memref.load %arg1[%c93_381] : memref<98xf32, #tpu.memory_space<smem>>
    %856 = vector.broadcast %855 : f32 to vector<1x256xf32>
    %857 = arith.mulf %856, %854 : vector<1x256xf32>
    %858 = arith.addf %853, %857 : vector<1x256xf32>
    %859 = arith.mulf %858, %53 : vector<1x256xf32>
    %860 = arith.addf %716, %859 : vector<1x256xf32>
    %c0_382 = arith.constant 0 : index
    %c3_383 = arith.constant 3 : index
    %861 = vector.load %arg4[%c0_382, %c3_383] : memref<2x358xf32, #tpu.memory_space<vmem>>, vector<1x256xf32>
    %c3_384 = arith.constant 3 : index
    %862 = memref.load %arg1[%c3_384] : memref<98xf32, #tpu.memory_space<smem>>
    %863 = vector.broadcast %862 : f32 to vector<1x256xf32>
    %864 = arith.mulf %863, %861 : vector<1x256xf32>
    %c0_385 = arith.constant 0 : index
    %c19_386 = arith.constant 19 : index
    %865 = vector.load %arg4[%c0_385, %c19_386] : memref<2x358xf32, #tpu.memory_space<vmem>>, vector<1x256xf32>
    %c10_387 = arith.constant 10 : index
    %866 = memref.load %arg1[%c10_387] : memref<98xf32, #tpu.memory_space<smem>>
    %867 = vector.broadcast %866 : f32 to vector<1x256xf32>
    %868 = arith.mulf %867, %865 : vector<1x256xf32>
    %869 = arith.addf %864, %868 : vector<1x256xf32>
    %c0_388 = arith.constant 0 : index
    %c35_389 = arith.constant 35 : index
    %870 = vector.load %arg4[%c0_388, %c35_389] : memref<2x358xf32, #tpu.memory_space<vmem>>, vector<1x256xf32>
    %c17_390 = arith.constant 17 : index
    %871 = memref.load %arg1[%c17_390] : memref<98xf32, #tpu.memory_space<smem>>
    %872 = vector.broadcast %871 : f32 to vector<1x256xf32>
    %873 = arith.mulf %872, %870 : vector<1x256xf32>
    %874 = arith.addf %869, %873 : vector<1x256xf32>
    %c0_391 = arith.constant 0 : index
    %c51_392 = arith.constant 51 : index
    %875 = vector.load %arg4[%c0_391, %c51_392] : memref<2x358xf32, #tpu.memory_space<vmem>>, vector<1x256xf32>
    %c24_393 = arith.constant 24 : index
    %876 = memref.load %arg1[%c24_393] : memref<98xf32, #tpu.memory_space<smem>>
    %877 = vector.broadcast %876 : f32 to vector<1x256xf32>
    %878 = arith.mulf %877, %875 : vector<1x256xf32>
    %879 = arith.addf %874, %878 : vector<1x256xf32>
    %c0_394 = arith.constant 0 : index
    %c67_395 = arith.constant 67 : index
    %880 = vector.load %arg4[%c0_394, %c67_395] : memref<2x358xf32, #tpu.memory_space<vmem>>, vector<1x256xf32>
    %c31_396 = arith.constant 31 : index
    %881 = memref.load %arg1[%c31_396] : memref<98xf32, #tpu.memory_space<smem>>
    %882 = vector.broadcast %881 : f32 to vector<1x256xf32>
    %883 = arith.mulf %882, %880 : vector<1x256xf32>
    %884 = arith.addf %879, %883 : vector<1x256xf32>
    %c0_397 = arith.constant 0 : index
    %c83_398 = arith.constant 83 : index
    %885 = vector.load %arg4[%c0_397, %c83_398] : memref<2x358xf32, #tpu.memory_space<vmem>>, vector<1x256xf32>
    %c38_399 = arith.constant 38 : index
    %886 = memref.load %arg1[%c38_399] : memref<98xf32, #tpu.memory_space<smem>>
    %887 = vector.broadcast %886 : f32 to vector<1x256xf32>
    %888 = arith.mulf %887, %885 : vector<1x256xf32>
    %889 = arith.addf %884, %888 : vector<1x256xf32>
    %c0_400 = arith.constant 0 : index
    %c99_401 = arith.constant 99 : index
    %890 = vector.load %arg4[%c0_400, %c99_401] : memref<2x358xf32, #tpu.memory_space<vmem>>, vector<1x256xf32>
    %c45_402 = arith.constant 45 : index
    %891 = memref.load %arg1[%c45_402] : memref<98xf32, #tpu.memory_space<smem>>
    %892 = vector.broadcast %891 : f32 to vector<1x256xf32>
    %893 = arith.mulf %892, %890 : vector<1x256xf32>
    %894 = arith.addf %889, %893 : vector<1x256xf32>
    %895 = arith.mulf %894, %64 : vector<1x256xf32>
    %896 = arith.addf %752, %895 : vector<1x256xf32>
    %c1_403 = arith.constant 1 : index
    %c3_404 = arith.constant 3 : index
    %897 = vector.load %arg4[%c1_403, %c3_404] : memref<2x358xf32, #tpu.memory_space<vmem>>, vector<1x256xf32>
    %c52_405 = arith.constant 52 : index
    %898 = memref.load %arg1[%c52_405] : memref<98xf32, #tpu.memory_space<smem>>
    %899 = vector.broadcast %898 : f32 to vector<1x256xf32>
    %900 = arith.mulf %899, %897 : vector<1x256xf32>
    %c1_406 = arith.constant 1 : index
    %c19_407 = arith.constant 19 : index
    %901 = vector.load %arg4[%c1_406, %c19_407] : memref<2x358xf32, #tpu.memory_space<vmem>>, vector<1x256xf32>
    %c59_408 = arith.constant 59 : index
    %902 = memref.load %arg1[%c59_408] : memref<98xf32, #tpu.memory_space<smem>>
    %903 = vector.broadcast %902 : f32 to vector<1x256xf32>
    %904 = arith.mulf %903, %901 : vector<1x256xf32>
    %905 = arith.addf %900, %904 : vector<1x256xf32>
    %c1_409 = arith.constant 1 : index
    %c35_410 = arith.constant 35 : index
    %906 = vector.load %arg4[%c1_409, %c35_410] : memref<2x358xf32, #tpu.memory_space<vmem>>, vector<1x256xf32>
    %c66_411 = arith.constant 66 : index
    %907 = memref.load %arg1[%c66_411] : memref<98xf32, #tpu.memory_space<smem>>
    %908 = vector.broadcast %907 : f32 to vector<1x256xf32>
    %909 = arith.mulf %908, %906 : vector<1x256xf32>
    %910 = arith.addf %905, %909 : vector<1x256xf32>
    %c1_412 = arith.constant 1 : index
    %c51_413 = arith.constant 51 : index
    %911 = vector.load %arg4[%c1_412, %c51_413] : memref<2x358xf32, #tpu.memory_space<vmem>>, vector<1x256xf32>
    %c73_414 = arith.constant 73 : index
    %912 = memref.load %arg1[%c73_414] : memref<98xf32, #tpu.memory_space<smem>>
    %913 = vector.broadcast %912 : f32 to vector<1x256xf32>
    %914 = arith.mulf %913, %911 : vector<1x256xf32>
    %915 = arith.addf %910, %914 : vector<1x256xf32>
    %c1_415 = arith.constant 1 : index
    %c67_416 = arith.constant 67 : index
    %916 = vector.load %arg4[%c1_415, %c67_416] : memref<2x358xf32, #tpu.memory_space<vmem>>, vector<1x256xf32>
    %c80_417 = arith.constant 80 : index
    %917 = memref.load %arg1[%c80_417] : memref<98xf32, #tpu.memory_space<smem>>
    %918 = vector.broadcast %917 : f32 to vector<1x256xf32>
    %919 = arith.mulf %918, %916 : vector<1x256xf32>
    %920 = arith.addf %915, %919 : vector<1x256xf32>
    %c1_418 = arith.constant 1 : index
    %c83_419 = arith.constant 83 : index
    %921 = vector.load %arg4[%c1_418, %c83_419] : memref<2x358xf32, #tpu.memory_space<vmem>>, vector<1x256xf32>
    %c87_420 = arith.constant 87 : index
    %922 = memref.load %arg1[%c87_420] : memref<98xf32, #tpu.memory_space<smem>>
    %923 = vector.broadcast %922 : f32 to vector<1x256xf32>
    %924 = arith.mulf %923, %921 : vector<1x256xf32>
    %925 = arith.addf %920, %924 : vector<1x256xf32>
    %c1_421 = arith.constant 1 : index
    %c99_422 = arith.constant 99 : index
    %926 = vector.load %arg4[%c1_421, %c99_422] : memref<2x358xf32, #tpu.memory_space<vmem>>, vector<1x256xf32>
    %c94_423 = arith.constant 94 : index
    %927 = memref.load %arg1[%c94_423] : memref<98xf32, #tpu.memory_space<smem>>
    %928 = vector.broadcast %927 : f32 to vector<1x256xf32>
    %929 = arith.mulf %928, %926 : vector<1x256xf32>
    %930 = arith.addf %925, %929 : vector<1x256xf32>
    %931 = arith.mulf %930, %64 : vector<1x256xf32>
    %932 = arith.addf %788, %931 : vector<1x256xf32>
    %c0_424 = arith.constant 0 : index
    %c4_425 = arith.constant 4 : index
    %933 = vector.load %arg4[%c0_424, %c4_425] : memref<2x358xf32, #tpu.memory_space<vmem>>, vector<1x256xf32>
    %c4_426 = arith.constant 4 : index
    %934 = memref.load %arg1[%c4_426] : memref<98xf32, #tpu.memory_space<smem>>
    %935 = vector.broadcast %934 : f32 to vector<1x256xf32>
    %936 = arith.mulf %935, %933 : vector<1x256xf32>
    %c0_427 = arith.constant 0 : index
    %c20_428 = arith.constant 20 : index
    %937 = vector.load %arg4[%c0_427, %c20_428] : memref<2x358xf32, #tpu.memory_space<vmem>>, vector<1x256xf32>
    %c11_429 = arith.constant 11 : index
    %938 = memref.load %arg1[%c11_429] : memref<98xf32, #tpu.memory_space<smem>>
    %939 = vector.broadcast %938 : f32 to vector<1x256xf32>
    %940 = arith.mulf %939, %937 : vector<1x256xf32>
    %941 = arith.addf %936, %940 : vector<1x256xf32>
    %c0_430 = arith.constant 0 : index
    %c36_431 = arith.constant 36 : index
    %942 = vector.load %arg4[%c0_430, %c36_431] : memref<2x358xf32, #tpu.memory_space<vmem>>, vector<1x256xf32>
    %c18_432 = arith.constant 18 : index
    %943 = memref.load %arg1[%c18_432] : memref<98xf32, #tpu.memory_space<smem>>
    %944 = vector.broadcast %943 : f32 to vector<1x256xf32>
    %945 = arith.mulf %944, %942 : vector<1x256xf32>
    %946 = arith.addf %941, %945 : vector<1x256xf32>
    %c0_433 = arith.constant 0 : index
    %c52_434 = arith.constant 52 : index
    %947 = vector.load %arg4[%c0_433, %c52_434] : memref<2x358xf32, #tpu.memory_space<vmem>>, vector<1x256xf32>
    %c25_435 = arith.constant 25 : index
    %948 = memref.load %arg1[%c25_435] : memref<98xf32, #tpu.memory_space<smem>>
    %949 = vector.broadcast %948 : f32 to vector<1x256xf32>
    %950 = arith.mulf %949, %947 : vector<1x256xf32>
    %951 = arith.addf %946, %950 : vector<1x256xf32>
    %c0_436 = arith.constant 0 : index
    %c68_437 = arith.constant 68 : index
    %952 = vector.load %arg4[%c0_436, %c68_437] : memref<2x358xf32, #tpu.memory_space<vmem>>, vector<1x256xf32>
    %c32_438 = arith.constant 32 : index
    %953 = memref.load %arg1[%c32_438] : memref<98xf32, #tpu.memory_space<smem>>
    %954 = vector.broadcast %953 : f32 to vector<1x256xf32>
    %955 = arith.mulf %954, %952 : vector<1x256xf32>
    %956 = arith.addf %951, %955 : vector<1x256xf32>
    %c0_439 = arith.constant 0 : index
    %c84_440 = arith.constant 84 : index
    %957 = vector.load %arg4[%c0_439, %c84_440] : memref<2x358xf32, #tpu.memory_space<vmem>>, vector<1x256xf32>
    %c39_441 = arith.constant 39 : index
    %958 = memref.load %arg1[%c39_441] : memref<98xf32, #tpu.memory_space<smem>>
    %959 = vector.broadcast %958 : f32 to vector<1x256xf32>
    %960 = arith.mulf %959, %957 : vector<1x256xf32>
    %961 = arith.addf %956, %960 : vector<1x256xf32>
    %c0_442 = arith.constant 0 : index
    %c100_443 = arith.constant 100 : index
    %962 = vector.load %arg4[%c0_442, %c100_443] : memref<2x358xf32, #tpu.memory_space<vmem>>, vector<1x256xf32>
    %c46_444 = arith.constant 46 : index
    %963 = memref.load %arg1[%c46_444] : memref<98xf32, #tpu.memory_space<smem>>
    %964 = vector.broadcast %963 : f32 to vector<1x256xf32>
    %965 = arith.mulf %964, %962 : vector<1x256xf32>
    %966 = arith.addf %961, %965 : vector<1x256xf32>
    %967 = arith.mulf %966, %75 : vector<1x256xf32>
    %968 = arith.addf %824, %967 : vector<1x256xf32>
    %c1_445 = arith.constant 1 : index
    %c4_446 = arith.constant 4 : index
    %969 = vector.load %arg4[%c1_445, %c4_446] : memref<2x358xf32, #tpu.memory_space<vmem>>, vector<1x256xf32>
    %c53_447 = arith.constant 53 : index
    %970 = memref.load %arg1[%c53_447] : memref<98xf32, #tpu.memory_space<smem>>
    %971 = vector.broadcast %970 : f32 to vector<1x256xf32>
    %972 = arith.mulf %971, %969 : vector<1x256xf32>
    %c1_448 = arith.constant 1 : index
    %c20_449 = arith.constant 20 : index
    %973 = vector.load %arg4[%c1_448, %c20_449] : memref<2x358xf32, #tpu.memory_space<vmem>>, vector<1x256xf32>
    %c60_450 = arith.constant 60 : index
    %974 = memref.load %arg1[%c60_450] : memref<98xf32, #tpu.memory_space<smem>>
    %975 = vector.broadcast %974 : f32 to vector<1x256xf32>
    %976 = arith.mulf %975, %973 : vector<1x256xf32>
    %977 = arith.addf %972, %976 : vector<1x256xf32>
    %c1_451 = arith.constant 1 : index
    %c36_452 = arith.constant 36 : index
    %978 = vector.load %arg4[%c1_451, %c36_452] : memref<2x358xf32, #tpu.memory_space<vmem>>, vector<1x256xf32>
    %c67_453 = arith.constant 67 : index
    %979 = memref.load %arg1[%c67_453] : memref<98xf32, #tpu.memory_space<smem>>
    %980 = vector.broadcast %979 : f32 to vector<1x256xf32>
    %981 = arith.mulf %980, %978 : vector<1x256xf32>
    %982 = arith.addf %977, %981 : vector<1x256xf32>
    %c1_454 = arith.constant 1 : index
    %c52_455 = arith.constant 52 : index
    %983 = vector.load %arg4[%c1_454, %c52_455] : memref<2x358xf32, #tpu.memory_space<vmem>>, vector<1x256xf32>
    %c74_456 = arith.constant 74 : index
    %984 = memref.load %arg1[%c74_456] : memref<98xf32, #tpu.memory_space<smem>>
    %985 = vector.broadcast %984 : f32 to vector<1x256xf32>
    %986 = arith.mulf %985, %983 : vector<1x256xf32>
    %987 = arith.addf %982, %986 : vector<1x256xf32>
    %c1_457 = arith.constant 1 : index
    %c68_458 = arith.constant 68 : index
    %988 = vector.load %arg4[%c1_457, %c68_458] : memref<2x358xf32, #tpu.memory_space<vmem>>, vector<1x256xf32>
    %c81_459 = arith.constant 81 : index
    %989 = memref.load %arg1[%c81_459] : memref<98xf32, #tpu.memory_space<smem>>
    %990 = vector.broadcast %989 : f32 to vector<1x256xf32>
    %991 = arith.mulf %990, %988 : vector<1x256xf32>
    %992 = arith.addf %987, %991 : vector<1x256xf32>
    %c1_460 = arith.constant 1 : index
    %c84_461 = arith.constant 84 : index
    %993 = vector.load %arg4[%c1_460, %c84_461] : memref<2x358xf32, #tpu.memory_space<vmem>>, vector<1x256xf32>
    %c88_462 = arith.constant 88 : index
    %994 = memref.load %arg1[%c88_462] : memref<98xf32, #tpu.memory_space<smem>>
    %995 = vector.broadcast %994 : f32 to vector<1x256xf32>
    %996 = arith.mulf %995, %993 : vector<1x256xf32>
    %997 = arith.addf %992, %996 : vector<1x256xf32>
    %c1_463 = arith.constant 1 : index
    %c100_464 = arith.constant 100 : index
    %998 = vector.load %arg4[%c1_463, %c100_464] : memref<2x358xf32, #tpu.memory_space<vmem>>, vector<1x256xf32>
    %c95_465 = arith.constant 95 : index
    %999 = memref.load %arg1[%c95_465] : memref<98xf32, #tpu.memory_space<smem>>
    %1000 = vector.broadcast %999 : f32 to vector<1x256xf32>
    %1001 = arith.mulf %1000, %998 : vector<1x256xf32>
    %1002 = arith.addf %997, %1001 : vector<1x256xf32>
    %1003 = arith.mulf %1002, %75 : vector<1x256xf32>
    %1004 = arith.addf %860, %1003 : vector<1x256xf32>
    %c0_466 = arith.constant 0 : index
    %c5_467 = arith.constant 5 : index
    %1005 = vector.load %arg4[%c0_466, %c5_467] : memref<2x358xf32, #tpu.memory_space<vmem>>, vector<1x256xf32>
    %c5_468 = arith.constant 5 : index
    %1006 = memref.load %arg1[%c5_468] : memref<98xf32, #tpu.memory_space<smem>>
    %1007 = vector.broadcast %1006 : f32 to vector<1x256xf32>
    %1008 = arith.mulf %1007, %1005 : vector<1x256xf32>
    %c0_469 = arith.constant 0 : index
    %c21_470 = arith.constant 21 : index
    %1009 = vector.load %arg4[%c0_469, %c21_470] : memref<2x358xf32, #tpu.memory_space<vmem>>, vector<1x256xf32>
    %c12_471 = arith.constant 12 : index
    %1010 = memref.load %arg1[%c12_471] : memref<98xf32, #tpu.memory_space<smem>>
    %1011 = vector.broadcast %1010 : f32 to vector<1x256xf32>
    %1012 = arith.mulf %1011, %1009 : vector<1x256xf32>
    %1013 = arith.addf %1008, %1012 : vector<1x256xf32>
    %c0_472 = arith.constant 0 : index
    %c37_473 = arith.constant 37 : index
    %1014 = vector.load %arg4[%c0_472, %c37_473] : memref<2x358xf32, #tpu.memory_space<vmem>>, vector<1x256xf32>
    %c19_474 = arith.constant 19 : index
    %1015 = memref.load %arg1[%c19_474] : memref<98xf32, #tpu.memory_space<smem>>
    %1016 = vector.broadcast %1015 : f32 to vector<1x256xf32>
    %1017 = arith.mulf %1016, %1014 : vector<1x256xf32>
    %1018 = arith.addf %1013, %1017 : vector<1x256xf32>
    %c0_475 = arith.constant 0 : index
    %c53_476 = arith.constant 53 : index
    %1019 = vector.load %arg4[%c0_475, %c53_476] : memref<2x358xf32, #tpu.memory_space<vmem>>, vector<1x256xf32>
    %c26_477 = arith.constant 26 : index
    %1020 = memref.load %arg1[%c26_477] : memref<98xf32, #tpu.memory_space<smem>>
    %1021 = vector.broadcast %1020 : f32 to vector<1x256xf32>
    %1022 = arith.mulf %1021, %1019 : vector<1x256xf32>
    %1023 = arith.addf %1018, %1022 : vector<1x256xf32>
    %c0_478 = arith.constant 0 : index
    %c69_479 = arith.constant 69 : index
    %1024 = vector.load %arg4[%c0_478, %c69_479] : memref<2x358xf32, #tpu.memory_space<vmem>>, vector<1x256xf32>
    %c33_480 = arith.constant 33 : index
    %1025 = memref.load %arg1[%c33_480] : memref<98xf32, #tpu.memory_space<smem>>
    %1026 = vector.broadcast %1025 : f32 to vector<1x256xf32>
    %1027 = arith.mulf %1026, %1024 : vector<1x256xf32>
    %1028 = arith.addf %1023, %1027 : vector<1x256xf32>
    %c0_481 = arith.constant 0 : index
    %c85_482 = arith.constant 85 : index
    %1029 = vector.load %arg4[%c0_481, %c85_482] : memref<2x358xf32, #tpu.memory_space<vmem>>, vector<1x256xf32>
    %c40_483 = arith.constant 40 : index
    %1030 = memref.load %arg1[%c40_483] : memref<98xf32, #tpu.memory_space<smem>>
    %1031 = vector.broadcast %1030 : f32 to vector<1x256xf32>
    %1032 = arith.mulf %1031, %1029 : vector<1x256xf32>
    %1033 = arith.addf %1028, %1032 : vector<1x256xf32>
    %c0_484 = arith.constant 0 : index
    %c101_485 = arith.constant 101 : index
    %1034 = vector.load %arg4[%c0_484, %c101_485] : memref<2x358xf32, #tpu.memory_space<vmem>>, vector<1x256xf32>
    %c47_486 = arith.constant 47 : index
    %1035 = memref.load %arg1[%c47_486] : memref<98xf32, #tpu.memory_space<smem>>
    %1036 = vector.broadcast %1035 : f32 to vector<1x256xf32>
    %1037 = arith.mulf %1036, %1034 : vector<1x256xf32>
    %1038 = arith.addf %1033, %1037 : vector<1x256xf32>
    %1039 = arith.mulf %1038, %86 : vector<1x256xf32>
    %1040 = arith.addf %896, %1039 : vector<1x256xf32>
    %c1_487 = arith.constant 1 : index
    %c5_488 = arith.constant 5 : index
    %1041 = vector.load %arg4[%c1_487, %c5_488] : memref<2x358xf32, #tpu.memory_space<vmem>>, vector<1x256xf32>
    %c54_489 = arith.constant 54 : index
    %1042 = memref.load %arg1[%c54_489] : memref<98xf32, #tpu.memory_space<smem>>
    %1043 = vector.broadcast %1042 : f32 to vector<1x256xf32>
    %1044 = arith.mulf %1043, %1041 : vector<1x256xf32>
    %c1_490 = arith.constant 1 : index
    %c21_491 = arith.constant 21 : index
    %1045 = vector.load %arg4[%c1_490, %c21_491] : memref<2x358xf32, #tpu.memory_space<vmem>>, vector<1x256xf32>
    %c61_492 = arith.constant 61 : index
    %1046 = memref.load %arg1[%c61_492] : memref<98xf32, #tpu.memory_space<smem>>
    %1047 = vector.broadcast %1046 : f32 to vector<1x256xf32>
    %1048 = arith.mulf %1047, %1045 : vector<1x256xf32>
    %1049 = arith.addf %1044, %1048 : vector<1x256xf32>
    %c1_493 = arith.constant 1 : index
    %c37_494 = arith.constant 37 : index
    %1050 = vector.load %arg4[%c1_493, %c37_494] : memref<2x358xf32, #tpu.memory_space<vmem>>, vector<1x256xf32>
    %c68_495 = arith.constant 68 : index
    %1051 = memref.load %arg1[%c68_495] : memref<98xf32, #tpu.memory_space<smem>>
    %1052 = vector.broadcast %1051 : f32 to vector<1x256xf32>
    %1053 = arith.mulf %1052, %1050 : vector<1x256xf32>
    %1054 = arith.addf %1049, %1053 : vector<1x256xf32>
    %c1_496 = arith.constant 1 : index
    %c53_497 = arith.constant 53 : index
    %1055 = vector.load %arg4[%c1_496, %c53_497] : memref<2x358xf32, #tpu.memory_space<vmem>>, vector<1x256xf32>
    %c75_498 = arith.constant 75 : index
    %1056 = memref.load %arg1[%c75_498] : memref<98xf32, #tpu.memory_space<smem>>
    %1057 = vector.broadcast %1056 : f32 to vector<1x256xf32>
    %1058 = arith.mulf %1057, %1055 : vector<1x256xf32>
    %1059 = arith.addf %1054, %1058 : vector<1x256xf32>
    %c1_499 = arith.constant 1 : index
    %c69_500 = arith.constant 69 : index
    %1060 = vector.load %arg4[%c1_499, %c69_500] : memref<2x358xf32, #tpu.memory_space<vmem>>, vector<1x256xf32>
    %c82_501 = arith.constant 82 : index
    %1061 = memref.load %arg1[%c82_501] : memref<98xf32, #tpu.memory_space<smem>>
    %1062 = vector.broadcast %1061 : f32 to vector<1x256xf32>
    %1063 = arith.mulf %1062, %1060 : vector<1x256xf32>
    %1064 = arith.addf %1059, %1063 : vector<1x256xf32>
    %c1_502 = arith.constant 1 : index
    %c85_503 = arith.constant 85 : index
    %1065 = vector.load %arg4[%c1_502, %c85_503] : memref<2x358xf32, #tpu.memory_space<vmem>>, vector<1x256xf32>
    %c89_504 = arith.constant 89 : index
    %1066 = memref.load %arg1[%c89_504] : memref<98xf32, #tpu.memory_space<smem>>
    %1067 = vector.broadcast %1066 : f32 to vector<1x256xf32>
    %1068 = arith.mulf %1067, %1065 : vector<1x256xf32>
    %1069 = arith.addf %1064, %1068 : vector<1x256xf32>
    %c1_505 = arith.constant 1 : index
    %c101_506 = arith.constant 101 : index
    %1070 = vector.load %arg4[%c1_505, %c101_506] : memref<2x358xf32, #tpu.memory_space<vmem>>, vector<1x256xf32>
    %c96_507 = arith.constant 96 : index
    %1071 = memref.load %arg1[%c96_507] : memref<98xf32, #tpu.memory_space<smem>>
    %1072 = vector.broadcast %1071 : f32 to vector<1x256xf32>
    %1073 = arith.mulf %1072, %1070 : vector<1x256xf32>
    %1074 = arith.addf %1069, %1073 : vector<1x256xf32>
    %1075 = arith.mulf %1074, %86 : vector<1x256xf32>
    %1076 = arith.addf %932, %1075 : vector<1x256xf32>
    %c0_508 = arith.constant 0 : index
    %c6_509 = arith.constant 6 : index
    %1077 = vector.load %arg4[%c0_508, %c6_509] : memref<2x358xf32, #tpu.memory_space<vmem>>, vector<1x256xf32>
    %c6_510 = arith.constant 6 : index
    %1078 = memref.load %arg1[%c6_510] : memref<98xf32, #tpu.memory_space<smem>>
    %1079 = vector.broadcast %1078 : f32 to vector<1x256xf32>
    %1080 = arith.mulf %1079, %1077 : vector<1x256xf32>
    %c0_511 = arith.constant 0 : index
    %c22_512 = arith.constant 22 : index
    %1081 = vector.load %arg4[%c0_511, %c22_512] : memref<2x358xf32, #tpu.memory_space<vmem>>, vector<1x256xf32>
    %c13_513 = arith.constant 13 : index
    %1082 = memref.load %arg1[%c13_513] : memref<98xf32, #tpu.memory_space<smem>>
    %1083 = vector.broadcast %1082 : f32 to vector<1x256xf32>
    %1084 = arith.mulf %1083, %1081 : vector<1x256xf32>
    %1085 = arith.addf %1080, %1084 : vector<1x256xf32>
    %c0_514 = arith.constant 0 : index
    %c38_515 = arith.constant 38 : index
    %1086 = vector.load %arg4[%c0_514, %c38_515] : memref<2x358xf32, #tpu.memory_space<vmem>>, vector<1x256xf32>
    %c20_516 = arith.constant 20 : index
    %1087 = memref.load %arg1[%c20_516] : memref<98xf32, #tpu.memory_space<smem>>
    %1088 = vector.broadcast %1087 : f32 to vector<1x256xf32>
    %1089 = arith.mulf %1088, %1086 : vector<1x256xf32>
    %1090 = arith.addf %1085, %1089 : vector<1x256xf32>
    %c0_517 = arith.constant 0 : index
    %c54_518 = arith.constant 54 : index
    %1091 = vector.load %arg4[%c0_517, %c54_518] : memref<2x358xf32, #tpu.memory_space<vmem>>, vector<1x256xf32>
    %c27_519 = arith.constant 27 : index
    %1092 = memref.load %arg1[%c27_519] : memref<98xf32, #tpu.memory_space<smem>>
    %1093 = vector.broadcast %1092 : f32 to vector<1x256xf32>
    %1094 = arith.mulf %1093, %1091 : vector<1x256xf32>
    %1095 = arith.addf %1090, %1094 : vector<1x256xf32>
    %c0_520 = arith.constant 0 : index
    %c70_521 = arith.constant 70 : index
    %1096 = vector.load %arg4[%c0_520, %c70_521] : memref<2x358xf32, #tpu.memory_space<vmem>>, vector<1x256xf32>
    %c34_522 = arith.constant 34 : index
    %1097 = memref.load %arg1[%c34_522] : memref<98xf32, #tpu.memory_space<smem>>
    %1098 = vector.broadcast %1097 : f32 to vector<1x256xf32>
    %1099 = arith.mulf %1098, %1096 : vector<1x256xf32>
    %1100 = arith.addf %1095, %1099 : vector<1x256xf32>
    %c0_523 = arith.constant 0 : index
    %c86_524 = arith.constant 86 : index
    %1101 = vector.load %arg4[%c0_523, %c86_524] : memref<2x358xf32, #tpu.memory_space<vmem>>, vector<1x256xf32>
    %c41_525 = arith.constant 41 : index
    %1102 = memref.load %arg1[%c41_525] : memref<98xf32, #tpu.memory_space<smem>>
    %1103 = vector.broadcast %1102 : f32 to vector<1x256xf32>
    %1104 = arith.mulf %1103, %1101 : vector<1x256xf32>
    %1105 = arith.addf %1100, %1104 : vector<1x256xf32>
    %c0_526 = arith.constant 0 : index
    %c102_527 = arith.constant 102 : index
    %1106 = vector.load %arg4[%c0_526, %c102_527] : memref<2x358xf32, #tpu.memory_space<vmem>>, vector<1x256xf32>
    %c48_528 = arith.constant 48 : index
    %1107 = memref.load %arg1[%c48_528] : memref<98xf32, #tpu.memory_space<smem>>
    %1108 = vector.broadcast %1107 : f32 to vector<1x256xf32>
    %1109 = arith.mulf %1108, %1106 : vector<1x256xf32>
    %1110 = arith.addf %1105, %1109 : vector<1x256xf32>
    %1111 = arith.mulf %1110, %97 : vector<1x256xf32>
    %1112 = arith.addf %968, %1111 : vector<1x256xf32>
    %c1_529 = arith.constant 1 : index
    %c6_530 = arith.constant 6 : index
    %1113 = vector.load %arg4[%c1_529, %c6_530] : memref<2x358xf32, #tpu.memory_space<vmem>>, vector<1x256xf32>
    %c55_531 = arith.constant 55 : index
    %1114 = memref.load %arg1[%c55_531] : memref<98xf32, #tpu.memory_space<smem>>
    %1115 = vector.broadcast %1114 : f32 to vector<1x256xf32>
    %1116 = arith.mulf %1115, %1113 : vector<1x256xf32>
    %c1_532 = arith.constant 1 : index
    %c22_533 = arith.constant 22 : index
    %1117 = vector.load %arg4[%c1_532, %c22_533] : memref<2x358xf32, #tpu.memory_space<vmem>>, vector<1x256xf32>
    %c62_534 = arith.constant 62 : index
    %1118 = memref.load %arg1[%c62_534] : memref<98xf32, #tpu.memory_space<smem>>
    %1119 = vector.broadcast %1118 : f32 to vector<1x256xf32>
    %1120 = arith.mulf %1119, %1117 : vector<1x256xf32>
    %1121 = arith.addf %1116, %1120 : vector<1x256xf32>
    %c1_535 = arith.constant 1 : index
    %c38_536 = arith.constant 38 : index
    %1122 = vector.load %arg4[%c1_535, %c38_536] : memref<2x358xf32, #tpu.memory_space<vmem>>, vector<1x256xf32>
    %c69_537 = arith.constant 69 : index
    %1123 = memref.load %arg1[%c69_537] : memref<98xf32, #tpu.memory_space<smem>>
    %1124 = vector.broadcast %1123 : f32 to vector<1x256xf32>
    %1125 = arith.mulf %1124, %1122 : vector<1x256xf32>
    %1126 = arith.addf %1121, %1125 : vector<1x256xf32>
    %c1_538 = arith.constant 1 : index
    %c54_539 = arith.constant 54 : index
    %1127 = vector.load %arg4[%c1_538, %c54_539] : memref<2x358xf32, #tpu.memory_space<vmem>>, vector<1x256xf32>
    %c76_540 = arith.constant 76 : index
    %1128 = memref.load %arg1[%c76_540] : memref<98xf32, #tpu.memory_space<smem>>
    %1129 = vector.broadcast %1128 : f32 to vector<1x256xf32>
    %1130 = arith.mulf %1129, %1127 : vector<1x256xf32>
    %1131 = arith.addf %1126, %1130 : vector<1x256xf32>
    %c1_541 = arith.constant 1 : index
    %c70_542 = arith.constant 70 : index
    %1132 = vector.load %arg4[%c1_541, %c70_542] : memref<2x358xf32, #tpu.memory_space<vmem>>, vector<1x256xf32>
    %c83_543 = arith.constant 83 : index
    %1133 = memref.load %arg1[%c83_543] : memref<98xf32, #tpu.memory_space<smem>>
    %1134 = vector.broadcast %1133 : f32 to vector<1x256xf32>
    %1135 = arith.mulf %1134, %1132 : vector<1x256xf32>
    %1136 = arith.addf %1131, %1135 : vector<1x256xf32>
    %c1_544 = arith.constant 1 : index
    %c86_545 = arith.constant 86 : index
    %1137 = vector.load %arg4[%c1_544, %c86_545] : memref<2x358xf32, #tpu.memory_space<vmem>>, vector<1x256xf32>
    %c90_546 = arith.constant 90 : index
    %1138 = memref.load %arg1[%c90_546] : memref<98xf32, #tpu.memory_space<smem>>
    %1139 = vector.broadcast %1138 : f32 to vector<1x256xf32>
    %1140 = arith.mulf %1139, %1137 : vector<1x256xf32>
    %1141 = arith.addf %1136, %1140 : vector<1x256xf32>
    %c1_547 = arith.constant 1 : index
    %c102_548 = arith.constant 102 : index
    %1142 = vector.load %arg4[%c1_547, %c102_548] : memref<2x358xf32, #tpu.memory_space<vmem>>, vector<1x256xf32>
    %c97_549 = arith.constant 97 : index
    %1143 = memref.load %arg1[%c97_549] : memref<98xf32, #tpu.memory_space<smem>>
    %1144 = vector.broadcast %1143 : f32 to vector<1x256xf32>
    %1145 = arith.mulf %1144, %1142 : vector<1x256xf32>
    %1146 = arith.addf %1141, %1145 : vector<1x256xf32>
    %1147 = arith.mulf %1146, %97 : vector<1x256xf32>
    %1148 = arith.addf %1004, %1147 : vector<1x256xf32>
    %1149 = arith.addf %1112, %1148 : vector<1x256xf32>
    %1150 = arith.addf %1040, %1076 : vector<1x256xf32>
    %1151 = arith.addf %1149, %1150 : vector<1x256xf32>
    %1152 = arith.negf %1151 : vector<1x256xf32>
    %1153 = math.exp %1152 : vector<1x256xf32>
    %cst_550 = arith.constant 1.000000e+00 : f32
    %1154 = vector.broadcast %cst_550 : f32 to vector<1x256xf32>
    %1155 = arith.addf %1154, %1153 : vector<1x256xf32>
    %1156 = arith.divf %1154, %1155 : vector<1x256xf32>
    %c1_551 = arith.constant 1 : index
    %c0_552 = arith.constant 0 : index
    %c0_553 = arith.constant 0 : index
    %1157 = vector.load %arg2[%c1_551, %c0_552, %c0_553] : memref<2x4x256xf32, #tpu.memory_space<vmem>>, vector<1x4x256xf32>
    %1158 = vector.shape_cast %1157 : vector<1x4x256xf32> to vector<4x256xf32>
    %1159 = vector.broadcast %1156 : vector<1x256xf32> to vector<4x256xf32>
    %1160 = arith.mulf %1158, %1159 : vector<4x256xf32>
    %c1_554 = arith.constant 1 : index
    %c0_555 = arith.constant 0 : index
    %c0_556 = arith.constant 0 : index
    %1161 = vector.load %arg3[%c1_554, %c0_555, %c0_556] : memref<2x4x256xf32, #tpu.memory_space<vmem>>, vector<1x4x256xf32>
    %1162 = vector.shape_cast %1161 : vector<1x4x256xf32> to vector<4x256xf32>
    %1163 = vector.shape_cast %1160 : vector<4x256xf32> to vector<1x4x256xf32>
    tpu.vector_store %arg3[%c1_554, %c0_555, %c0_556], %1163 {strides = array<i32>} : memref<2x4x256xf32, #tpu.memory_space<vmem>>, vector<1x4x256xf32>,
    return
  }
  func.func @transform_0(%arg0: i32) -> i32 {
    %c0_i32 = arith.constant 0 : i32
    %c0_i32_0 = arith.constant 0 : i32
    return %c0_i32 : i32
  }
  func.func @transform_1(%arg0: i32) -> (i32, i32, i32) {
    %c0_i32 = arith.constant 0 : i32
    %c0_i32_0 = arith.constant 0 : i32
    %c0_i32_1 = arith.constant 0 : i32
    return %arg0, %c0_i32, %c0_i32_0 : i32, i32, i32
  }
  func.func @transform_2(%arg0: i32) -> (i32, i32, i32) {
    %c0_i32 = arith.constant 0 : i32
    %c0_i32_0 = arith.constant 0 : i32
    %c0_i32_1 = arith.constant 0 : i32
    return %arg0, %c0_i32, %c0_i32_0 : i32, i32, i32
  }
}

</mosaic_0001>

<bundles_post_ra>
// kernel: tpu_custom_call.1
= control target key start
LH: loop header
LB: loop body
LE: loop exit
PB: predicated region body
PF: predicated region fallthrough
CT: control target
= control target key end

     0   :  { %7 = vsyncpa [#allocation6], 0  ;;  %s4044_s0 = inlined_call_operand.hbm [shape: f32[98], index: 0, kind: input, shape index: {}]   ;;  %s4045_s1 = inlined_call_operand.hbm [shape: f32[2,4,256], index: 1, kind: input, shape index: {}]   ;;  %s4046_s2 = inlined_call_operand.hbm [shape: f32[2,4,256], index: 2, kind: output, shape index: {}]  }
   0x1   :  { %8 = vsyncpa [#allocation4], 0 }
   0x2   :  { %9 = vsyncpa [#allocation5], 0  ;;  %s15_s11 = sshll.u32 %s4044_s0, 4  ;;  %s23_s14 = sshll.u32 %s4045_s1, 4  ;;  %s16_s11 = int_to_ptr.hbm [resolvable:$true] %s15_s11  ;;  %s24_s14 = int_to_ptr.hbm [resolvable:$true] %s23_s14 }
   0x3   :  { %s2714_s15 = smov [#allocation3]   ;;  %s2715_s16 = smov [#allocation7]  }
   0x4   :  { %18 = dma.hbm_to_smem %s16_s11, 16, %s2714_s15, [#allocation6]  }
   0x5   :  { %s25_s17 = sshll.u32 %s2715_s16, 4  ;;  %s2716_s18 = smov 128   ;;  %s26_s17 = int_to_ptr.vmem [resolvable:$true] %s25_s17 }
   0x6   :  { %s2717_s19 = smov 8  }
   0x7   :  { %31 = dma.hbm_to_vmem [thread:$0]  %s24_s14, 256, %s26_s17, [#allocation4], %s2716_s18, %s2716_s18, %s2717_s19  }
   0x8   :  { %2708 = dma.done.wait [#allocation6], 16  }
   0x9   :  { %2709 = vsyncadd [#allocation6], 4294967280 }
   0xa   :  { %2710 = dma.done.wait [#allocation4], 256  }
   0xb   :  { %2711 = vsyncadd [#allocation4], 4294967040 }
   0xc   :  { %40 = sfence }
   0xd   :  { %v45_v0 = vlaneseq  ;;  %v154_v1 = vld [vmem:[#allocation7] sm:$0xff]  ;;  %vm161_vm0 = vcmask 1043456   ;;  %v4049_v13 = vmov 0.0   ;;  %vm200_vm3 = vcmask 1040384   ;;  %s2719_s0 = smov 2   ;;  %v2774_v23 = vld [vmem:[#allocation7 + $0x8] sm:$0xff] }
   0xe   :  { %156 = vst [vmem:[#allocation1] ss:$2 sm:$0xff] %v154_v1  ;;  %v2720_v24 = vmov 1.0   ;;  %s2721_s1 = smov 3   ;;  %s2722_s20 = smov 51   ;;  %vm43_vm4 = vcmask 828824  }
   0xf   :  { %v46_v2 = vand.u32 127, %v45_v0  ;;  %v727_v25 = vrot.slane %v2720_v24, 7  ;;  %44 = vst.msk [vmem:[#allocation2 + $0x4] sm:$0x3] %vm43_vm4, %v4049_v13  ;;  %vm41_vm5 = vcmask 410624   ;;  %s2723_s21 = smov 1  }
  0x10   :  { %42 = vst.msk [vmem:[#allocation2] sm:$0x3] %vm41_vm5, %v4049_v13  ;;  %vm209_vm8 = vcmp.ge.s32.totalorder %v45_v0, 51  ;;  %vm210_vm9 = vcmp.lt.s32.totalorder %v45_v0, 307  ;;  %s2421_s22 = sld [smem:[#allocation3 + $0x23]]  ;;  %vm205_vm10 = vcmask 416768  }
  0x11   :  { %v47_v3 = vadd.s32 128, %v46_v2  ;;  %v2763_v4 = vand.u32 15, %v46_v2  ;;  %v728_v35 = vsel %vm200_vm3, 1.0, %v727_v25  ;;  %s2419_s23 = sld [smem:[#allocation3 + $0x15]]  ;;  %vm2797_vm11 = vmand %vm209_vm8, %vm210_vm9  ;;  %s2724_s28 = smov 48   ;;  %vm236_vm4 = vcmask 916480  }
  0x12   :  { %s2417_s24 = sld [smem:[#allocation3 + $0x7]]  ;;  %s2725_s29 = smov 80   ;;  %vm247_vm5 = vcmask 785408   ;;  %vm280_vm8 = vcmask 392192   ;;  %vm291_vm9 = vcmask 261120  }
  0x13   :  { %4071 = vst [vmem:[#allocation12_spill] sm:$0xff] %v2763_v4  ;;  %v2765_v5 = vand.u32 15, %v47_v3  ;;  %v96_v6 = vadd.s32 4294967295, %v2763_v4  ;;  %v84_v56 = vadd.s32 4294967294, %v2763_v4  ;;  %s2432_s25 = sld [smem:[#allocation3 + $0xf]]  ;;  %s2726_s30 = smov 112  }
  0x14   :  { %s2420_s26 = sld [smem:[#allocation3 + $0x1c]]  ;;  %s2727_s6 = smov 96  }
  0x15   :  { %v97_v7 = vadd.s32 4294967295, %v2765_v5  ;;  %vm98_vm1 = vcmp.ge.s32.totalorder %v96_v6, 0  ;;  %v157_v8 = vld.sshfl [vmem:[#allocation1] sm:$0xff pattern:$0x75316420]  ;;  %v85_v55 = vadd.s32 4294967294, %v2765_v5 }
  0x16   :  { %v158_v9 = vld.sshfl [vmem:[#allocation1 + $0x8] sm:$0xff pattern:$0x75316420]  ;;  %v162_v10 = vsel %vm161_vm0, %v157_v8, -inf  ;;  %v2409_v14 = vsel %vm98_vm1, 1.0, %v4049_v13  ;;  %vm86_vm7 = vcmp.ge.s32.totalorder %v84_v56, 0  ;;  %v274_v6 = vstv %s2421_s22 }
  0x17   :  { %vm99_vm2 = vcmp.ge.s32.totalorder %v97_v7, 0  ;;  %v163_v11 = vrot.slane %v162_v10, 4  ;;  %v169_v12 = vsel %vm161_vm0, %v158_v9, -inf  ;;  %176 = vst [vmem:[#allocation1] ss:$2 sm:$0xff] %v154_v1  ;;  %vm87_vm6 = vcmp.ge.s32.totalorder %v85_v55, 0 }
  0x18   :  { %v2410_v15 = vsel %vm99_vm2, 1.0, %v4049_v13  ;;  %v170_v16 = vrot.slane %v169_v12, 4  ;;  %v2408_v57 = vsel %vm87_vm6, 1.0, %v4049_v13  ;;  %v2407_v59 = vsel %vm86_vm7, 1.0, %v4049_v13  ;;  %s2418_s27 = sld [smem:[#allocation3 + $0xe]]  ;;  %s2728_s7 = smov 64  }
  0x19   :  { %v574_v17 = vrot.slane %v2410_v15, 7  ;;  %v164_v18 = vmax.f32 %v162_v10, %v163_v11  ;;  %v434_v58 = vrot.slane %v2408_v57, 7  ;;  %v252_v7 = vstv %s2419_s23  ;;  %s2435_s3 = sld [smem:[#allocation3 + $0x24]]  ;;  %s2729_s11 = smov 32  }
  0x1a   :  { %v171_v19 = vmax.f32 %v169_v12, %v170_v16  ;;  %v230_v8 = vstv %s2417_s24  ;;  %v383_v12 = vstv %s2432_s25  ;;  %s2431_s4 = sld [smem:[#allocation3 + $0x8]]  ;;  %vm258_vm6 = vcmask 654336  }
  0x1b   :  { %v575_v20 = vsel %vm200_vm3, %v2409_v14, %v574_v17  ;;  %v165_v21 = vrot.slane %v164_v18, 2  ;;  %v435_v60 = vsel %vm200_vm3, %v2407_v59, %v434_v58  ;;  %v263_v14 = vstv %s2420_s26  ;;  %s2422_s5 = sld [smem:[#allocation3 + $0x2a]] }
  0x1c   :  { %576 = vrot.lane.b32.xlu0 %v575_v20, %s2719_s0  ;;  %v172_v22 = vrot.slane %v171_v19, 2  ;;  %436 = vrot.lane.b32.xlu2 %v435_v60, %s2723_s21  ;;  %s2445_s8 = sld [smem:[#allocation3 + $0x9]]  ;;  %vm269_vm7 = vcmask 523264  }
  0x1d   :  { %v166_v26 = vmax.f32 %v164_v18, %v165_v21  ;;  %s2434_s9 = sld [smem:[#allocation3 + $0x1d]] }
  0x1e   :  { %v173_v27 = vmax.f32 %v171_v19, %v172_v22  ;;  %v177_v28 = vld.sshfl [vmem:[#allocation1] sm:$0xff pattern:$0x75316420]  ;;  %v178_v29 = vld.sshfl [vmem:[#allocation1 + $0x8] sm:$0xff pattern:$0x75316420]  ;;  %v241_v15 = vstv %s2418_s27 }
  0x1f   :  { %v181_v30 = vsel %vm161_vm0, %v177_v28, 0.0  ;;  %v188_v31 = vsel %vm161_vm0, %v178_v29, 0.0  ;;  %1313 = vst [vmem:[#allocation1] ss:$2 sm:$0xff] %v2774_v23  ;;  %v167_v36 = vrot.slane %v166_v26, 1  ;;  %v413_v19 = vstv %s2435_s3  ;;  %s2433_s10 = sld [smem:[#allocation3 + $0x16]] }
  0x20   :  { %v174_v32 = vrot.slane %v173_v27, 1  ;;  %v182_v33 = vrot.slane %v181_v30, 4  ;;  %v189_v34 = vrot.slane %v188_v31, 4  ;;  %v373_v20 = vstv %s2431_s4  ;;  %s2448_s12 = sld [smem:[#allocation3 + $0x1e]] }
  0x21   :  { %v168_v42 = vmax.f32 %v166_v26, %v167_v36  ;;  %v285_v21 = vstv %s2422_s5  ;;  %s2447_s13 = sld [smem:[#allocation3 + $0x17]] }
  0x22   :  { %v175_v37 = vmax.f32 %v173_v27, %v174_v32  ;;  %v183_v38 = vadd.f32 %v182_v33, %v181_v30  ;;  %v190_v39 = vadd.f32 %v189_v34, %v188_v31  ;;  %v513_v26 = vstv %s2445_s8  ;;  %s2436_s14 = sld [smem:[#allocation3 + $0x2b]] }
  0x23   :  { %v403_v27 = vstv %s2434_s9  ;;  %s2459_s15 = sld [smem:[#allocation3 + $0xa]] }
  0x24   :  { %729 = vrot.lane.b32.xlu0 %v728_v35, %s2721_s1  ;;  %v184_v40 = vrot.slane %v183_v38, 2  ;;  %v191_v41 = vrot.slane %v190_v39, 2  ;;  %v199_v43 = vrot.slane %v175_v37, 7  ;;  %s2450_s16 = sld [smem:[#allocation3 + $0x2c]] }
  0x25   :  { %v393_v28 = vstv %s2433_s10  ;;  %s2446_s17 = sld [smem:[#allocation3 + $0x10]] }
  0x26   :  { %v185_v44 = vadd.f32 %v184_v40, %v183_v38  ;;  %v192_v45 = vadd.f32 %v191_v41, %v190_v39  ;;  %v201_v48 = vsel %vm200_vm3, %v168_v42, %v199_v43  ;;  %v543_v34 = vstv %s2448_s12  ;;  %s2462_s0 = sld [smem:[#allocation3 + $0x1f]] }
  0x27   :  { %v533_v35 = vstv %s2447_s13  ;;  %s2461_s1 = sld [smem:[#allocation3 + $0x18]] }
  0x28   :  { %v186_v46 = vrot.slane %v185_v44, 1  ;;  %v193_v47 = vrot.slane %v192_v45, 1  ;;  %v423_v36 = vstv %s2436_s14  ;;  %s2449_s21 = sld [smem:[#allocation3 + $0x25]] }
  0x29   :  { %v666_v41 = vstv %s2459_s15  ;;  %s2473_s22 = sld [smem:[#allocation3 + $0xb]] }
  0x2a   :  { %v187_v49 = vadd.f32 %v186_v46, %v185_v44  ;;  %v194_v50 = vadd.f32 %v193_v47, %v192_v45  ;;  %v563_v42 = vstv %s2450_s16  ;;  %s2464_s23 = sld [smem:[#allocation3 + $0x2d]] }
  0x2b   :  { %v523_v43 = vstv %s2446_s17  ;;  %s2460_s24 = sld [smem:[#allocation3 + $0x11]] }
  0x2c   :  { %202 = vrot.lane.b32.xlu0 %v201_v48, %s2722_s20  ;;  %v196_v51 = vmul.f32 0.25, %v194_v50  ;;  %v195_v52 = vmul.f32 0.25, %v187_v49  ;;  %v696_v47 = vstv %s2462_s0  ;;  %s2476_s25 = sld [smem:[#allocation3 + $0x20]] }
  0x2d   :  { %v686_v48 = vstv %s2461_s1  ;;  %s2475_s26 = sld [smem:[#allocation3 + $0x19]] }
  0x2e   :  { %v215_v53 = vrot.slane %v196_v51, 7  ;;  %v553_v49 = vstv %s2449_s21  ;;  %s2463_s27 = sld [smem:[#allocation3 + $0x26]] }
  0x2f   :  { %s2425_s3 = sld [smem:[#allocation3 + $0x3f]] }
  0x30   :  { %v216_v54 = vsel %vm200_vm3, %v195_v52, %v215_v53  ;;  %v818_v53 = vstv %s2473_s22  ;;  %s2478_s4 = sld [smem:[#allocation3 + $0x2e]] }
  0x31   :  { %v676_v55 = vstv %s2460_s24  ;;  %s2474_s5 = sld [smem:[#allocation3 + $0x12]] }
  0x32   :  { %v848_v59 = vstv %s2476_s25  ;;  %s2428_s8 = sld [smem:[#allocation3 + $0x54]] }
  0x33   :  { %v838_v60 = vstv %s2475_s26  ;;  %s2424_s9 = sld [smem:[#allocation3 + $0x38]] }
  0x34   :  { %217 = vrot.lane.b32.xlu0 %v216_v54, %s2722_s20  ;;  %v716_v54 = vstv %s2464_s23  ;;  %s2477_s10 = sld [smem:[#allocation3 + $0x27]] }
  0x35   :  { %s2438_s12 = sld [smem:[#allocation3 + $0x39]] }
  0x36   :  { %s2427_s13 = sld [smem:[#allocation3 + $0x4d]] }
  0x37   :  { %s2426_s14 = sld [smem:[#allocation3 + $0x46]] }
  0x38   :  { %s2441_s15 = sld [smem:[#allocation3 + $0x4e]] }
  0x39   :  { %s2440_s16 = sld [smem:[#allocation3 + $0x47]] }
  0x3a   :  { %s2429_s17 = sld [smem:[#allocation3 + $0x5b]] }
  0x3b   :  { %s2453_s0 = sld [smem:[#allocation3 + $0x41]] }
  0x3c   :  { %s2443_s1 = sld [smem:[#allocation3 + $0x5c]] }
  0x3d   :  { %s2439_s21 = sld [smem:[#allocation3 + $0x40]] }
  0x3e   :  { %s2456_s22 = sld [smem:[#allocation3 + $0x56]] }
  0x3f   :  { %s2452_s23 = sld [smem:[#allocation3 + $0x3a]] }
  0x40   :  { %s2442_s24 = sld [smem:[#allocation3 + $0x55]] }
  0x41   :  { %s2467_s25 = sld [smem:[#allocation3 + $0x42]] }
  0x42   :  { %s2455_s26 = sld [smem:[#allocation3 + $0x4f]] }
  0x8e   :  { %v2791_v61 = vpop.permute.xlu0 %576 }
  0x96   :  { %v2793_v62 = vpop.permute.xlu0 %729 }
  0x9e   :  { %v203_v63 = vpop.permute.xlu0 %202 }
  0x9f   :  { %v204_v2 = vrot.slane %v203_v63, 7 }
  0xa1   :  { %v206_v3 = vsel %vm205_vm10, %v204_v2, %v203_v63  ;;  %v706_v63 = vstv %s2463_s27  ;;  %s2454_s27 = sld [smem:[#allocation3 + $0x48]] }
  0xa2   :  { %212 = vst.msk [vmem:[#allocation2] ss:$2 sm:$0x7] %vm2797_vm11, %v206_v3 }
  0xa6   :  { %v218_v32 = vpop.permute.xlu0 %217 }
  0xa7   :  { %v219_v33 = vrot.slane %v218_v32, 7 }
  0xa9   :  { %v2804_v0 = vld [vmem:[#allocation2] ss:$2 sm:$0x7]  ;;  %v220_v37 = vsel %vm205_vm10, %v219_v33, %v218_v32  ;;  %v358_v32 = vstv %s2429_s17  ;;  %s2482_s17 = sld [smem:[#allocation3 + $0x4a]] }
  0xaa   :  { %v275_v9 = vmul.f32 %v274_v6, %v2804_v0  ;;  %v253_v10 = vmul.f32 %v252_v7, %v2804_v0  ;;  %v231_v11 = vmul.f32 %v230_v8, %v2804_v0  ;;  %v384_v16 = vmul.f32 %v383_v12, %v2804_v0  ;;  %223 = vst.msk [vmem:[#allocation2 + $0x1] ss:$2 sm:$0x7] %vm2797_vm11, %v220_v37 }
  0xab   :  { %v264_v17 = vmul.f32 %v263_v14, %v2804_v0  ;;  %v242_v18 = vmul.f32 %v241_v15, %v2804_v0  ;;  %v414_v22 = vmul.f32 %v413_v19, %v2804_v0  ;;  %v374_v24 = vmul.f32 %v373_v20, %v2804_v0 }
  0xac   :  { %277 = vrot.lane.b32.xlu0 %v275_v9, %s2724_s28  ;;  %255 = vrot.lane.b32.xlu2 %v253_v10, %s2725_s29  ;;  %v286_v25 = vmul.f32 %v285_v21, %v2804_v0  ;;  %v514_v29 = vmul.f32 %v513_v26, %v2804_v0  ;;  %v404_v30 = vmul.f32 %v403_v27, %v2804_v0  ;;  %v318_v8 = vstv %s2425_s3  ;;  %v2876_v21 = vpop.permute.xlu2 %436  ;;  %s2470_s3 = sld [smem:[#allocation3 + $0x57]] }
  0xad   :  { %233 = vrot.lane.b32.xlu1 %v231_v11, %s2726_s30  ;;  %v394_v31 = vmul.f32 %v393_v28, %v2804_v0  ;;  %v544_v38 = vmul.f32 %v543_v34, %v2804_v0  ;;  %v534_v39 = vmul.f32 %v533_v35, %v2804_v0  ;;  %v424_v40 = vmul.f32 %v423_v36, %v2804_v0 }
  0xae   :  { %v667_v44 = vmul.f32 %v666_v41, %v2804_v0  ;;  %v564_v45 = vmul.f32 %v563_v42, %v2804_v0  ;;  %v524_v46 = vmul.f32 %v523_v43, %v2804_v0  ;;  %v697_v50 = vmul.f32 %v696_v47, %v2804_v0  ;;  %4074 = vst [vmem:[#allocation13_spill] sm:$0xff] %v2876_v21 }
  0xaf   :  { %v687_v51 = vmul.f32 %v686_v48, %v2804_v0  ;;  %v554_v52 = vmul.f32 %v553_v49, %v2804_v0  ;;  %v819_v56 = vmul.f32 %v818_v53, %v2804_v0  ;;  %v717_v57 = vmul.f32 %v716_v54, %v2804_v0 }
  0xb0   :  { %v677_v58 = vmul.f32 %v676_v55, %v2804_v0  ;;  %v849_v2 = vmul.f32 %v848_v59, %v2804_v0  ;;  %v839_v3 = vmul.f32 %v838_v60, %v2804_v0  ;;  %v707_v6 = vmul.f32 %v706_v63, %v2804_v0 }
  0xb1   :  { %v2862_v7 = vld [vmem:[#allocation2 + $0x1] ss:$2 sm:$0x7]  ;;  %v868_v9 = vstv %s2478_s4  ;;  %v828_v11 = vstv %s2474_s5  ;;  %v348_v15 = vstv %s2428_s8  ;;  %v858_v19 = vstv %s2477_s10  ;;  %s2466_s4 = sld [smem:[#allocation3 + $0x3b]] }
  0xb2   :  { %v319_v10 = vmul.f32 %v318_v8, %v2862_v7  ;;  %v869_v12 = vmul.f32 %v868_v9, %v2804_v0  ;;  %v829_v14 = vmul.f32 %v828_v11, %v2804_v0  ;;  %v859_v20 = vmul.f32 %v858_v19, %v2804_v0  ;;  %s2457_s5 = sld [smem:[#allocation3 + $0x5d]] }
  0xb3   :  { %v359_v35 = vmul.f32 %v358_v32, %v2862_v7  ;;  %v605_v37 = vstv %s2453_s0  ;;  %v757_v53 = vstv %s2467_s25  ;;  %v625_v54 = vstv %s2455_s26  ;;  %s2469_s8 = sld [smem:[#allocation3 + $0x50]] }
  0xb4   :  { %386 = vrot.lane.b32.xlu0 %v384_v16, %s2727_s6  ;;  %266 = vrot.lane.b32.xlu2 %v264_v17, %s2728_s7  ;;  %v308_v16 = vstv %s2424_s9  ;;  %v349_v17 = vmul.f32 %v348_v15, %v2862_v7  ;;  %v615_v55 = vstv %s2454_s27  ;;  %v119_v59 = vadd.s32 1, %v2765_v5  ;;  %s2468_s9 = sld [smem:[#allocation3 + $0x49]] }
  0xb5   :  { %244 = vrot.lane.b32.xlu1 %v242_v18, %s2727_s6  ;;  %v309_v18 = vmul.f32 %v308_v16, %v2862_v7  ;;  %v118_v8 = vadd.s32 1, %v2763_v4  ;;  %s2481_s10 = sld [smem:[#allocation3 + $0x43]] }
  0xb6   :  { %vm123_vm12 = vcmp.lt.s32.totalorder %v119_v59, 16  ;;  %s2487_s0 = sld [smem:[#allocation3 + $0xc]] }
  0xb7   :  { %vm122_vm13 = vcmp.lt.s32.totalorder %v118_v8, 16  ;;  %s2494_s25 = sld [smem:[#allocation3 + $0x3d]] }
  0xb8   :  { %v645_v9 = vstv %s2457_s5  ;;  %s2491_s26 = sld [smem:[#allocation3 + $0x28]]  ;;  %s2731_s5 = smov 5  }
  0xb9   :  { %s2495_s27 = sld [smem:[#allocation3 + $0x44]] }
  0xbc   :  { %416 = vrot.lane.b32.xlu0 %v414_v22, %s2724_s28  ;;  %376 = vrot.lane.b32.xlu2 %v374_v24, %s2726_s30  ;;  %v448_v22 = vstv %s2438_s12  ;;  %v338_v24 = vstv %s2427_s13  ;;  %s2480_s12 = sld [smem:[#allocation3 + $0x3c]] }
  0xbd   :  { %288 = vrot.lane.b32.xlu1 %v286_v25, %s2729_s11  ;;  %v328_v25 = vstv %s2426_s14  ;;  %v449_v26 = vmul.f32 %v448_v22, %v2862_v7  ;;  %v339_v27 = vmul.f32 %v338_v24, %v2862_v7  ;;  %v767_v22 = vstv %s2468_s9  ;;  %s2471_s13 = sld [smem:[#allocation3 + $0x5e]]  ;;  %s2730_s14 = smov 4  }
  0xbe   :  { %v329_v28 = vmul.f32 %v328_v25, %v2862_v7  ;;  %s2498_s9 = sld [smem:[#allocation3 + $0x59]] }
  0xc2   :  { %v900_v32 = vstv %s2480_s12  ;;  %s2501_s12 = sld [smem:[#allocation3 + $0xd]] }
  0xc4   :  { %516 = vrot.lane.b32.xlu0 %v514_v29, %s2726_s30  ;;  %406 = vrot.lane.b32.xlu2 %v404_v30, %s2728_s7  ;;  %v478_v30 = vstv %s2441_s15  ;;  %s2484_s15 = sld [smem:[#allocation3 + $0x58]] }
  0xc5   :  { %396 = vrot.lane.b32.xlu1 %v394_v31, %s2725_s29  ;;  %v468_v31 = vstv %s2440_s16  ;;  %v479_v33 = vmul.f32 %v478_v30, %v2862_v7  ;;  %s2483_s16 = sld [smem:[#allocation3 + $0x51]] }
  0xc6   :  { %v469_v34 = vmul.f32 %v468_v31, %v2862_v7  ;;  %v910_v31 = vstv %s2481_s10  ;;  %s2499_s10 = sld [smem:[#allocation3 + $0x60]] }
  0xcc   :  { %546 = vrot.lane.b32.xlu0 %v544_v38, %s2728_s7  ;;  %536 = vrot.lane.b32.xlu2 %v534_v39, %s2725_s29  ;;  %v498_v38 = vstv %s2443_s1  ;;  %v458_v39 = vstv %s2439_s21  ;;  %s2489_s1 = sld [smem:[#allocation3 + $0x1a]] }
  0xcd   :  { %426 = vrot.lane.b32.xlu1 %v424_v40, %s2729_s11  ;;  %v606_v40 = vmul.f32 %v605_v37, %v2862_v7  ;;  %v499_v41 = vmul.f32 %v498_v38, %v2862_v7  ;;  %v459_v42 = vmul.f32 %v458_v39, %v2862_v7  ;;  %s2485_s21 = sld [smem:[#allocation3 + $0x5f]] }
  0xd4   :  { %669 = vrot.lane.b32.xlu0 %v667_v44, %s2726_s30  ;;  %566 = vrot.lane.b32.xlu2 %v564_v45, %s2729_s11  ;;  %v635_v44 = vstv %s2456_s22  ;;  %v595_v45 = vstv %s2452_s23  ;;  %s2490_s22 = sld [smem:[#allocation3 + $0x21]] }
  0xd5   :  { %526 = vrot.lane.b32.xlu1 %v524_v46, %s2727_s6  ;;  %v488_v46 = vstv %s2442_s24  ;;  %v636_v47 = vmul.f32 %v635_v44, %v2862_v7  ;;  %v596_v48 = vmul.f32 %v595_v45, %v2862_v7  ;;  %v920_v44 = vstv %s2482_s17  ;;  %s2492_s23 = sld [smem:[#allocation3 + $0x2f]] }
  0xd6   :  { %v489_v49 = vmul.f32 %v488_v46, %v2862_v7  ;;  %s2488_s24 = sld [smem:[#allocation3 + $0x13]] }
  0xd7   :  { %s2505_s17 = sld [smem:[#allocation3 + $0x29]] }
  0xdc   :  { %699 = vrot.lane.b32.xlu0 %v697_v50, %s2728_s7  ;;  %689 = vrot.lane.b32.xlu2 %v687_v51, %s2725_s29 }
  0xdd   :  { %556 = vrot.lane.b32.xlu1 %v554_v52, %s2724_s28 }
  0xe4   :  { %821 = vrot.lane.b32.xlu0 %v819_v56, %s2726_s30  ;;  %719 = vrot.lane.b32.xlu2 %v717_v57, %s2729_s11  ;;  %v758_v56 = vmul.f32 %v757_v53, %v2862_v7  ;;  %v626_v57 = vmul.f32 %v625_v54, %v2862_v7  ;;  %v971_v54 = vstv %s2487_s0  ;;  %s2511_s0 = sld [smem:[#allocation3 + $0x53]] }
  0xe5   :  { %679 = vrot.lane.b32.xlu1 %v677_v58, %s2727_s6  ;;  %v616_v58 = vmul.f32 %v615_v55, %v2862_v7  ;;  %v991_v55 = vstv %s2489_s1  ;;  %s2510_s1 = sld [smem:[#allocation3 + $0x4c]] }
  0xec   :  { %851 = vrot.lane.b32.xlu0 %v849_v2, %s2728_s7  ;;  %841 = vrot.lane.b32.xlu2 %v839_v3, %s2725_s29  ;;  %v787_v3 = vstv %s2470_s3  ;;  %s2497_s3 = sld [smem:[#allocation3 + $0x52]] }
  0xed   :  { %709 = vrot.lane.b32.xlu1 %v707_v6, %s2724_s28  ;;  %v747_v6 = vstv %s2466_s4  ;;  %s2496_s4 = sld [smem:[#allocation3 + $0x4b]] }
  0xee   :  { %v748_v11 = vmul.f32 %v747_v6, %v2862_v7 }
  0xf4   :  { %321 = vrot.lane.b32.xlu0 %v319_v10, %s2727_s6  ;;  %871 = vrot.lane.b32.xlu2 %v869_v12, %s2729_s11  ;;  %v788_v10 = vmul.f32 %v787_v3, %v2862_v7  ;;  %v2412_v12 = vsel %vm123_vm12, 1.0, %v4049_v13  ;;  %v131_v3 = vadd.s32 2, %v2765_v5  ;;  %vm884_vm12 = vcmask 31744  }
  0xf5   :  { %831 = vrot.lane.b32.xlu1 %v829_v14, %s2727_s6  ;;  %v646_v14 = vmul.f32 %v645_v9, %v2862_v7  ;;  %v879_v15 = vrot.slane %v2412_v12, 7  ;;  %v130_v12 = vadd.s32 2, %v2763_v4 }
  0xf6   :  { %vm135_vm14 = vcmp.lt.s32.totalorder %v131_v3, 16 }
  0xf7   :  { %vm134_vm15 = vcmp.lt.s32.totalorder %v130_v12, 16  ;;  %v1102_v12 = vstv %s2499_s10  ;;  %s3172_s10 = sld [smem:[#allocation3 + $0x4]] }
  0xfc   :  { %351 = vrot.lane.b32.xlu0 %v349_v17, %s2724_s28  ;;  %311 = vrot.lane.b32.xlu2 %v309_v18, %s2726_s30  ;;  %v2411_v18 = vsel %vm122_vm13, 1.0, %v4049_v13  ;;  %vm1037_vm13 = vcmask 39936  }
  0xfd   :  { %861 = vrot.lane.b32.xlu1 %v859_v20, %s2724_s28  ;;  %v777_v20 = vstv %s2469_s8  ;;  %v880_v24 = vsel %vm200_vm3, %v2411_v18, %v879_v15  ;;  %s2503_s8 = sld [smem:[#allocation3 + $0x1b]] }
  0xfe   :  { %v778_v25 = vmul.f32 %v777_v20, %v2862_v7  ;;  %v2414_v20 = vsel %vm135_vm14, 1.0, %v4049_v13  ;;  %vm1189_vm14 = vcmask 48128  }
 0x104   :  { %451 = vrot.lane.b32.xlu0 %v449_v26, %s2726_s30  ;;  %341 = vrot.lane.b32.xlu2 %v339_v27, %s2728_s7  ;;  %v768_v26 = vmul.f32 %v767_v22, %v2862_v7 }
 0x105   :  { %331 = vrot.lane.b32.xlu1 %v329_v28, %s2725_s29 }
 0x106   :  { %v2885_v29 = vpop.permute.xlu2 %255 }
 0x107   :  { %4075 = vst [vmem:[#allocation14_spill] sm:$0xff] %v2885_v29 }
 0x10c   :  { %481 = vrot.lane.b32.xlu0 %v479_v33, %s2728_s7  ;;  %471 = vrot.lane.b32.xlu2 %v469_v34, %s2725_s29  ;;  %v797_v33 = vstv %s2471_s13  ;;  %v911_v34 = vmul.f32 %v910_v31, %v2862_v7  ;;  %v2413_v31 = vsel %vm134_vm15, 1.0, %v4049_v13  ;;  %s2506_s13 = sld [smem:[#allocation3 + $0x30]] }
 0x10d   :  { %361 = vrot.lane.b32.xlu1 %v359_v35, %s2729_s11  ;;  %v901_v35 = vmul.f32 %v900_v32, %v2862_v7  ;;  %v798_v37 = vmul.f32 %v797_v33, %v2862_v7  ;;  %v1052_v33 = vstv %s2494_s25  ;;  %s2465_s25 = sld [smem:[#allocation3 + $0x34]] }
 0x10e   :  { %v2893_v36 = vpop.permute.xlu2 %266 }
 0x10f   :  { %4076 = vst [vmem:[#allocation15_spill] sm:$0xff] %v2893_v36 }
 0x114   :  { %608 = vrot.lane.b32.xlu0 %v606_v40, %s2727_s6  ;;  %501 = vrot.lane.b32.xlu2 %v499_v41, %s2729_s11  ;;  %v940_v41 = vstv %s2484_s15  ;;  %s3037_s15 = sld [smem:[#allocation3 + $0x22]] }
 0x115   :  { %461 = vrot.lane.b32.xlu1 %v459_v42, %s2727_s6  ;;  %v930_v42 = vstv %s2483_s16  ;;  %v941_v45 = vmul.f32 %v940_v41, %v2862_v7  ;;  %s2508_s16 = sld [smem:[#allocation3 + $0x3e]] }
 0x116   :  { %v2901_v43 = vpop.permute.xlu2 %376  ;;  %v931_v46 = vmul.f32 %v930_v42, %v2862_v7 }
 0x117   :  { %4077 = vst [vmem:[#allocation16_spill] sm:$0xff] %v2901_v43 }
 0x11c   :  { %638 = vrot.lane.b32.xlu0 %v636_v47, %s2724_s28  ;;  %598 = vrot.lane.b32.xlu2 %v596_v48, %s2726_s30  ;;  %v921_v47 = vmul.f32 %v920_v44, %v2862_v7 }
 0x11d   :  { %491 = vrot.lane.b32.xlu1 %v489_v49, %s2724_s28 }
 0x11e   :  { %v2909_v50 = vpop.permute.xlu0 %277  ;;  %v2911_v51 = vpop.permute.xlu2 %406 }
 0x11f   :  { %4078 = vst [vmem:[#allocation17_spill] sm:$0xff] %v2909_v50  ;;  %v2913_v52 = vpop.permute.xlu1 %233 }
 0x120   :  { %4079 = vst [vmem:[#allocation18_spill] sm:$0xff] %v2911_v51 }
 0x124   :  { %760 = vrot.lane.b32.xlu0 %v758_v56, %s2727_s6  ;;  %628 = vrot.lane.b32.xlu2 %v626_v57, %s2728_s7  ;;  %v950_v56 = vstv %s2485_s21  ;;  %v972_v57 = vmul.f32 %v971_v54, %v2804_v0  ;;  %v1072_v54 = vstv %s2496_s4  ;;  %s2509_s21 = sld [smem:[#allocation3 + $0x45]] }
 0x125   :  { %618 = vrot.lane.b32.xlu1 %v616_v58, %s2725_s29  ;;  %v992_v58 = vmul.f32 %v991_v55, %v2804_v0  ;;  %v951_v59 = vmul.f32 %v950_v56, %v2862_v7  ;;  %s2507_s4 = sld [smem:[#allocation3 + $0x37]] }
 0x126   :  { %v2922_v60 = vpop.permute.xlu0 %386  ;;  %v2924_v63 = vpop.permute.xlu2 %536 }
 0x127   :  { %4080 = vst [vmem:[#allocation19_spill] sm:$0xff] %v2922_v60  ;;  %v2926_v2 = vpop.permute.xlu1 %244 }
 0x128   :  { %4081 = vst [vmem:[#allocation20_spill] sm:$0xff] %v2926_v2 }
 0x12c   :  { %790 = vrot.lane.b32.xlu0 %v788_v10, %s2724_s28  ;;  %750 = vrot.lane.b32.xlu2 %v748_v11, %s2726_s30  ;;  %v1001_v10 = vstv %s2490_s22  ;;  %v1021_v11 = vstv %s2492_s23  ;;  %s2513_s22 = sld [smem:[#allocation3 + $0x61]]  ;;  %s2732_s23 = smov 6  }
 0x12d   :  { %648 = vrot.lane.b32.xlu1 %v646_v14, %s2729_s11  ;;  %v981_v14 = vstv %s2488_s24  ;;  %v1002_v15 = vmul.f32 %v1001_v10, %v2804_v0  ;;  %v1022_v18 = vmul.f32 %v1021_v11, %v2804_v0  ;;  %v1092_v10 = vstv %s2498_s9  ;;  %s2512_s24 = sld [smem:[#allocation3 + $0x5a]] }
 0x12e   :  { %v2936_v16 = vpop.permute.xlu0 %416  ;;  %v2938_v17 = vpop.permute.xlu2 %566  ;;  %v982_v22 = vmul.f32 %v981_v14, %v2804_v0  ;;  %v1143_v11 = vstv %s2503_s8  ;;  %v1093_v14 = vmul.f32 %v1092_v10, %v2862_v7  ;;  %s3160_s8 = sld [smem:[#allocation3 + $0x3]] }
 0x12f   :  { %4082 = vst [vmem:[#allocation21_spill] sm:$0xff] %v2936_v16  ;;  %v2941_v19 = vpop.permute.xlu1 %288  ;;  %v1235_v16 = vstv %s2511_s0  ;;  %s3163_s9 = sld [smem:[#allocation3 + $0x33]]  ;;  %s2733_s0 = smov 126  }
 0x130   :  { %4083 = vst [vmem:[#allocation22_spill] sm:$0xff] %v2941_v19 }
 0x134   :  { %881 = vrot.lane.b32.xlu0 %v880_v24, %s2730_s14  ;;  %780 = vrot.lane.b32.xlu2 %v778_v25, %s2728_s7  ;;  %v1032_v24 = vrot.slane %v2414_v20, 7  ;;  %s2502_s14 = sld [smem:[#allocation3 + $0x14]] }
 0x135   :  { %770 = vrot.lane.b32.xlu1 %v768_v26, %s2725_s29 }
 0x136   :  { %v2948_v27 = vpop.permute.xlu0 %516  ;;  %v2950_v28 = vpop.permute.xlu2 %689 }
 0x137   :  { %v2952_v30 = vpop.permute.xlu1 %396 }
 0x138   :  { %4084 = vst [vmem:[#allocation23_spill] sm:$0xff] %v2952_v30 }
 0x13c   :  { %913 = vrot.lane.b32.xlu0 %v911_v34, %s2727_s6  ;;  %903 = vrot.lane.b32.xlu2 %v901_v35, %s2726_s30  ;;  %v1011_v34 = vstv %s2491_s26  ;;  %v1033_v35 = vsel %vm200_vm3, %v2413_v31, %v1032_v24  ;;  %v1123_v31 = vstv %s2501_s12  ;;  %s2479_s26 = sld [smem:[#allocation3 + $0x35]] }
 0x13d   :  { %800 = vrot.lane.b32.xlu1 %v798_v37, %s2729_s11  ;;  %v1053_v37 = vmul.f32 %v1052_v33, %v2862_v7  ;;  %v1012_v41 = vmul.f32 %v1011_v34, %v2804_v0  ;;  %v1173_v33 = vstv %s2506_s13  ;;  %v1133_v34 = vstv %s2502_s14  ;;  %s3176_s12 = sld [smem:[#allocation3 + $0x15]] }
 0x13e   :  { %v2960_v38 = vpop.permute.xlu0 %546  ;;  %v2962_v39 = vpop.permute.xlu2 %719  ;;  %s3180_s13 = sld [smem:[#allocation3 + $0xe]] }
 0x13f   :  { %v2964_v40 = vpop.permute.xlu1 %426  ;;  %s3188_s14 = sld [smem:[#allocation3 + $0x7]] }
 0x140   :  { %4085 = vst [vmem:[#allocation24_spill] sm:$0xff] %v2964_v40 }
 0x144   :  { %943 = vrot.lane.b32.xlu0 %v941_v45, %s2724_s28  ;;  %933 = vrot.lane.b32.xlu2 %v931_v46, %s2728_s7  ;;  %v1062_v46 = vstv %s2495_s27  ;;  %s2493_s27 = sld [smem:[#allocation3 + $0x36]] }
 0x145   :  { %923 = vrot.lane.b32.xlu1 %v921_v47, %s2725_s29  ;;  %v1082_v47 = vstv %s2497_s3  ;;  %v1063_v55 = vmul.f32 %v1062_v46, %v2862_v7  ;;  %v1174_v46 = vmul.f32 %v1173_v33, %v2804_v0  ;;  %s2500_s3 = sld [smem:[#allocation3 + $0x6]] }
 0x146   :  { %v2972_v48 = vpop.permute.xlu0 %669  ;;  %v2974_v49 = vpop.permute.xlu2 %841  ;;  %v1083_v56 = vmul.f32 %v1082_v47, %v2862_v7  ;;  %v1134_v47 = vmul.f32 %v1133_v34, %v2804_v0 }
 0x147   :  { %v2976_v53 = vpop.permute.xlu1 %526 }
 0x14c   :  { %974 = vrot.lane.b32.xlu0 %v972_v57, %s2726_s30  ;;  %994 = vrot.lane.b32.xlu2 %v992_v58, %s2725_s29  ;;  %v1073_v57 = vmul.f32 %v1072_v54, %v2862_v7  ;;  %v143_v54 = vadd.s32 3, %v2765_v5 }
 0x14d   :  { %953 = vrot.lane.b32.xlu1 %v951_v59, %s2729_s11 }
 0x14e   :  { %v2985_v6 = vpop.permute.xlu0 %699  ;;  %v2987_v8 = vpop.permute.xlu2 %871  ;;  %vm147_vm1 = vcmp.lt.s32.totalorder %v143_v54, 16 }
 0x14f   :  { %v2989_v9 = vpop.permute.xlu1 %556  ;;  %v2416_v34 = vsel %vm147_vm1, 1.0, %v4049_v13 }
 0x154   :  { %1004 = vrot.lane.b32.xlu0 %v1002_v15, %s2728_s7  ;;  %1024 = vrot.lane.b32.xlu2 %v1022_v18, %s2729_s11  ;;  %v1144_v15 = vmul.f32 %v1143_v11, %v2804_v0  ;;  %v1103_v18 = vmul.f32 %v1102_v12, %v2862_v7  ;;  %v1205_v12 = vstv %s2508_s16  ;;  %s3230_s16 = sld [smem:[#allocation3 + $0x1c]] }
 0x155   :  { %984 = vrot.lane.b32.xlu1 %v982_v22, %s2727_s6  ;;  %v1206_v33 = vmul.f32 %v1205_v12, %v2862_v7 }
 0x156   :  { %v2999_v25 = vpop.permute.xlu0 %821  ;;  %v3001_v26 = vpop.permute.xlu2 %311 }
 0x157   :  { %v3004_v32 = vpop.permute.xlu1 %679 }
 0x15c   :  { %1034 = vrot.lane.b32.xlu0 %v1033_v35, %s2731_s5  ;;  %1055 = vrot.lane.b32.xlu2 %v1053_v37, %s2726_s30  ;;  %v1315_v35 = vld.sshfl [vmem:[#allocation1 + $0x8] sm:$0xff pattern:$0x75316420]  ;;  %v1314_v37 = vld.sshfl [vmem:[#allocation1] sm:$0xff pattern:$0x75316420] }
 0x15d   :  { %1014 = vrot.lane.b32.xlu1 %v1012_v41, %s2724_s28  ;;  %v1124_v41 = vmul.f32 %v1123_v31, %v2804_v0  ;;  %1332 = vst [vmem:[#allocation1] ss:$2 sm:$0xff] %v2774_v23  ;;  %v142_v23 = vadd.s32 3, %v2763_v4  ;;  %s2444_s5 = sld [smem:[#allocation3 + $0x2]] }
 0x15e   :  { %v3011_v42 = vpop.permute.xlu0 %851  ;;  %v3013_v44 = vpop.permute.xlu2 %341 }
 0x15f   :  { %4086 = vst [vmem:[#allocation25_spill] sm:$0xff] %v3013_v44  ;;  %v3015_v45 = vpop.permute.xlu1 %709  ;;  %vm146_vm2 = vcmp.lt.s32.totalorder %v142_v23, 16 }
 0x160   :  { %v2415_v54 = vsel %vm146_vm2, 1.0, %v4049_v13  ;;  %v1245_v13 = vstv %s2512_s24  ;;  %s2536_s24 = sld [smem:[#allocation3 + $0x39]]  ;;  %vm439_vm2 = vcmask 7168  }
 0x164   :  { %1065 = vrot.lane.b32.xlu0 %v1063_v55, %s2727_s6  ;;  %1085 = vrot.lane.b32.xlu2 %v1083_v56, %s2728_s7  ;;  %v1325_v55 = vsel %vm161_vm0, %v1315_v35, -inf }
 0x165   :  { %1075 = vrot.lane.b32.xlu1 %v1073_v57, %s2725_s29  ;;  %v1153_v57 = vstv %s3037_s15  ;;  %v1326_v10 = vrot.slane %v1325_v55, 4  ;;  %s3227_s15 = sld [smem:[#allocation3 + $0x2a]] }
 0x166   :  { %v3023_v58 = vpop.permute.xlu0 %321  ;;  %v3025_v59 = vpop.permute.xlu2 %471  ;;  %v1154_v31 = vmul.f32 %v1153_v57, %v2804_v0 }
 0x167   :  { %4087 = vst [vmem:[#allocation26_spill] sm:$0xff] %v3025_v59  ;;  %v3027_v3 = vpop.permute.xlu1 %831 }
 0x16c   :  { %1095 = vrot.lane.b32.xlu0 %v1093_v14, %s2724_s28  ;;  %1146 = vrot.lane.b32.xlu2 %v1144_v15, %s2725_s29  ;;  %v1318_v14 = vsel %vm161_vm0, %v1314_v37, -inf  ;;  %v1163_v15 = vstv %s2505_s17  ;;  %v1184_v37 = vrot.slane %v2416_v34, 7  ;;  %s3260_s17 = sld [smem:[#allocation3 + $0x38]] }
 0x16d   :  { %1105 = vrot.lane.b32.xlu1 %v1103_v18, %s2729_s11  ;;  %v1319_v35 = vrot.slane %v1318_v14, 4 }
 0x16e   :  { %v3035_v20 = vpop.permute.xlu0 %351  ;;  %v3039_v22 = vpop.permute.xlu2 %501 }
 0x16f   :  { %4088 = vst [vmem:[#allocation27_spill] sm:$0xff] %v3035_v20  ;;  %v3041_v24 = vpop.permute.xlu1 %861  ;;  %v1320_v57 = vmax.f32 %v1318_v14, %v1319_v35 }
 0x170   :  { %4089 = vst [vmem:[#allocation28_spill] sm:$0xff] %v3039_v22 }
 0x171   :  { %v1321_v23 = vrot.slane %v1320_v57, 2 }
 0x173   :  { %v1322_v34 = vmax.f32 %v1320_v57, %v1321_v23 }
 0x174   :  { %1126 = vrot.lane.b32.xlu0 %v1124_v41, %s2726_s30  ;;  %1176 = vrot.lane.b32.xlu2 %v1174_v46, %s2729_s11  ;;  %v1327_v41 = vmax.f32 %v1325_v55, %v1326_v10  ;;  %v1164_v46 = vmul.f32 %v1163_v15, %v2804_v0  ;;  %v1225_v55 = vstv %s2510_s1  ;;  %v1185_v0 = vsel %vm200_vm3, %v2415_v54, %v1184_v37  ;;  %s2525_s1 = sld [smem:[#allocation3 + $0x4d]] }
 0x175   :  { %1136 = vrot.lane.b32.xlu1 %v1134_v47, %s2727_s6  ;;  %v1236_v10 = vmul.f32 %v1235_v16, %v2862_v7  ;;  %v1215_v37 = vstv %s2509_s21  ;;  %v1255_v16 = vstv %s2513_s22  ;;  %v1323_v54 = vrot.slane %v1322_v34, 1  ;;  %s2529_s21 = sld [smem:[#allocation3 + $0x8]]  ;;  %s2734_s22 = smov 124  }
 0x176   :  { %v3052_v56 = vpop.permute.xlu0 %451  ;;  %v3059_v18 = vpop.permute.xlu2 %598  ;;  %v1328_v12 = vrot.slane %v1327_v41, 2 }
 0x177   :  { %4090 = vst [vmem:[#allocation29_spill] sm:$0xff] %v3052_v56  ;;  %v3055_v11 = vpop.permute.xlu1 %331  ;;  %v1324_v57 = vmax.f32 %v1322_v34, %v1323_v54 }
 0x178   :  { %v1329_v15 = vmax.f32 %v1327_v41, %v1328_v12  ;;  %v1216_v41 = vmul.f32 %v1215_v37, %v2862_v7  ;;  %v1246_v37 = vmul.f32 %v1245_v13, %v2862_v7  ;;  %v1333_v13 = vld.sshfl [vmem:[#allocation1] sm:$0xff pattern:$0x75316420] }
 0x17a   :  { %v1330_v35 = vrot.slane %v1329_v15, 1 }
 0x17c   :  { %1156 = vrot.lane.b32.xlu0 %v1154_v31, %s2728_s7  ;;  %1208 = vrot.lane.b32.xlu2 %v1206_v33, %s2726_s30  ;;  %v1226_v33 = vmul.f32 %v1225_v55, %v2862_v7  ;;  %v1331_v12 = vmax.f32 %v1329_v15, %v1330_v35  ;;  %v1256_v55 = vmul.f32 %v1255_v16, %v2862_v7  ;;  %v744_v35 = vstv %s2465_s25  ;;  %s2519_s25 = sld [smem:[#allocation3 + $0x23]] }
 0x17d   :  { %1166 = vrot.lane.b32.xlu1 %v1164_v46, %s2724_s28  ;;  %v745_v34 = vmul.f32 %v744_v35, %v2862_v7 }
 0x17e   :  { %v3068_v47 = vpop.permute.xlu0 %481  ;;  %v3075_v31 = vpop.permute.xlu2 %628  ;;  %v1355_v23 = vrot.slane %v1331_v12, 7 }
 0x17f   :  { %4091 = vst [vmem:[#allocation30_spill] sm:$0xff] %v3068_v47  ;;  %v3071_v40 = vpop.permute.xlu1 %361 }
 0x180   :  { %4092 = vst [vmem:[#allocation31_spill] sm:$0xff] %v3071_v40  ;;  %v1356_v15 = vsel %vm200_vm3, %v1324_v57, %v1355_v23 }
 0x184   :  { %1186 = vrot.lane.b32.xlu0 %v1185_v0, %s2732_s23  ;;  %1238 = vrot.lane.b32.xlu2 %v1236_v10, %s2728_s7  ;;  %s2532_s23 = sld [smem:[#allocation3 + $0x1d]] }
 0x185   :  { %1228 = vrot.lane.b32.xlu1 %v1226_v33, %s2725_s29 }
 0x186   :  { %v3080_v14 = vpop.permute.xlu0 %608  ;;  %v751_v0 = vpop.permute.xlu2 %750 }
 0x187   :  { %v3082_v46 = vpop.permute.xlu1 %461  ;;  %v752_v51 = vrot.slane %v751_v0, 1 }
 0x188   :  { %4093 = vst [vmem:[#allocation32_spill] sm:$0xff] %v3082_v46 }
 0x189   :  { %v753_v16 = vsel %vm236_vm4, %v751_v0, %v752_v51 }
 0x18a   :  { %v755_v23 = vadd.f32 %v753_v16, %v745_v34 }
 0x18c   :  { %1218 = vrot.lane.b32.xlu0 %v1216_v41, %s2727_s6  ;;  %v1334_v41 = vld.sshfl [vmem:[#allocation1 + $0x8] sm:$0xff pattern:$0x75316420] }
 0x18d   :  { %1258 = vrot.lane.b32.xlu1 %v1256_v55, %s2729_s11  ;;  %v1344_v12 = vsel %vm161_vm0, %v1334_v41, 0.0 }
 0x18e   :  { %v3088_v10 = vpop.permute.xlu0 %638  ;;  %v781_v55 = vpop.permute.xlu2 %780  ;;  %v1345_v57 = vrot.slane %v1344_v12, 4 }
 0x18f   :  { %v3090_v33 = vpop.permute.xlu1 %491 }
 0x190   :  { %4094 = vst [vmem:[#allocation33_spill] sm:$0xff] %v3090_v33 }
 0x194   :  { %1248 = vrot.lane.b32.xlu0 %v1246_v37, %s2724_s28  ;;  %v1337_v37 = vsel %vm161_vm0, %v1333_v13, 0.0 }
 0x195   :  { %1357 = vrot.lane.b32.xlu1 %v1356_v15, %s2722_s20  ;;  %v1338_v0 = vrot.slane %v1337_v37, 4  ;;  %v1346_v15 = vadd.f32 %v1345_v57, %v1344_v12  ;;  %v782_v57 = vrot.slane %v781_v55, 1 }
 0x196   :  { %v761_v54 = vpop.permute.xlu0 %760  ;;  %v904_v40 = vpop.permute.xlu2 %903 }
 0x197   :  { %v762_v19 = vrot.slane %v761_v54, 1  ;;  %v3099_v30 = vpop.permute.xlu1 %618  ;;  %v1339_v50 = vadd.f32 %v1338_v0, %v1337_v37  ;;  %v1347_v35 = vrot.slane %v1346_v15, 2 }
 0x199   :  { %v763_v51 = vsel %vm247_vm5, %v761_v54, %v762_v19  ;;  %v1340_v60 = vrot.slane %v1339_v50, 2  ;;  %v1348_v33 = vadd.f32 %v1347_v35, %v1346_v15 }
 0x19a   :  { %v765_v22 = vadd.f32 %v763_v51, %v755_v23  ;;  %v905_v51 = vrot.slane %v904_v40, 1 }
 0x19b   :  { %v1341_v21 = vadd.f32 %v1340_v60, %v1339_v50  ;;  %v1349_v59 = vrot.slane %v1348_v33, 1 }
 0x19d   :  { %v1342_v20 = vrot.slane %v1341_v21, 1  ;;  %v1350_v43 = vadd.f32 %v1349_v59, %v1348_v33  ;;  %v897_v59 = vstv %s2479_s26  ;;  %v906_v33 = vsel %vm236_vm4, %v904_v40, %v905_v51  ;;  %s2735_s26 = smov 122  }
 0x19e   :  { %v791_v41 = vpop.permute.xlu0 %790  ;;  %v898_v15 = vmul.f32 %v897_v59, %v2862_v7 }
 0x19f   :  { %v3103_v47 = vpop.permute.xlu1 %648  ;;  %v1343_v16 = vadd.f32 %v1342_v20, %v1341_v21  ;;  %v1352_v34 = vmul.f32 0.25, %v1350_v43  ;;  %v792_v50 = vrot.slane %v791_v41, 1  ;;  %v934_v21 = vpop.permute.xlu2 %933  ;;  %v783_v20 = vsel %vm269_vm7, %v781_v55, %v782_v57 }
 0x1a0   :  { %v935_v59 = vrot.slane %v934_v21, 1 }
 0x1a1   :  { %v1351_v13 = vmul.f32 0.25, %v1343_v16  ;;  %v1365_v54 = vrot.slane %v1352_v34, 7  ;;  %v793_v35 = vsel %vm280_vm8, %v791_v41, %v792_v50 }
 0x1a3   :  { %v1366_v37 = vsel %vm200_vm3, %v1351_v13, %v1365_v54 }
 0x1a4   :  { %1367 = vrot.lane.b32.xlu2 %v1366_v37, %s2722_s20  ;;  %v908_v37 = vadd.f32 %v906_v33, %v898_v15  ;;  %v936_v33 = vsel %vm269_vm7, %v934_v21, %v935_v59  ;;  %s2486_s20 = sld [smem:[#allocation3 + $0x5]] }
 0x1a6   :  { %v3105_v19 = vpop.permute.xlu0 %881 }
 0x1a7   :  { %v771_v12 = vpop.permute.xlu1 %770  ;;  %v995_v40 = vpop.permute.xlu2 %994 }
 0x1a8   :  { %v772_v23 = vrot.slane %v771_v12, 1 }
 0x1aa   :  { %v773_v60 = vsel %vm258_vm6, %v771_v12, %v772_v23 }
 0x1ab   :  { %v775_v43 = vadd.f32 %v773_v60, %v765_v22 }
 0x1ad   :  { %v785_v0 = vadd.f32 %v783_v20, %v775_v43 }
 0x1ae   :  { %v914_v16 = vpop.permute.xlu0 %913 }
 0x1af   :  { %v915_v34 = vrot.slane %v914_v16, 1  ;;  %v795_v13 = vadd.f32 %v793_v35, %v785_v0  ;;  %v801_v54 = vpop.permute.xlu1 %800 }
 0x1b0   :  { %v802_v12 = vrot.slane %v801_v54, 1 }
 0x1b1   :  { %v916_v23 = vsel %vm247_vm5, %v914_v16, %v915_v34  ;;  %v1025_v16 = vpop.permute.xlu2 %1024 }
 0x1b2   :  { %v918_v22 = vadd.f32 %v916_v23, %v908_v37  ;;  %v803_v55 = vsel %vm291_vm9, %v801_v54, %v802_v12 }
 0x1b3   :  { %v3116_v57 = vadd.f32 %v803_v55, %v795_v13  ;;  %v968_v55 = vstv %s2486_s20  ;;  %s2524_s20 = sld [smem:[#allocation3 + $0x46]] }
 0x1b6   :  { %v944_v51 = vpop.permute.xlu0 %943 }
 0x1b7   :  { %v924_v60 = vpop.permute.xlu1 %923  ;;  %v945_v41 = vrot.slane %v944_v51, 1 }
 0x1b8   :  { %v925_v43 = vrot.slane %v924_v60, 1 }
 0x1b9   :  { %v946_v15 = vsel %vm280_vm8, %v944_v51, %v945_v41  ;;  %v996_v51 = vrot.slane %v995_v40, 1 }
 0x1ba   :  { %v926_v50 = vsel %vm258_vm6, %v924_v60, %v925_v43  ;;  %v3125_v43 = vld [vmem:[#allocation2] ss:$2 sm:$0x7] }
 0x1bb   :  { %v928_v20 = vadd.f32 %v926_v50, %v918_v22  ;;  %v969_v21 = vmul.f32 %v3125_v43, %v968_v55  ;;  %v1056_v50 = vpop.permute.xlu2 %1055 }
 0x1bc   :  { %v1057_v36 = vrot.slane %v1056_v50, 1 }
 0x1bd   :  { %v938_v0 = vadd.f32 %v936_v33, %v928_v20 }
 0x1be   :  { %v975_v35 = vpop.permute.xlu0 %974 }
 0x1bf   :  { %v948_v34 = vadd.f32 %v946_v15, %v938_v0  ;;  %v954_v13 = vpop.permute.xlu1 %953  ;;  %v976_v37 = vrot.slane %v975_v35, 1  ;;  %v997_v15 = vsel %vm258_vm6, %v995_v40, %v996_v51  ;;  %v1058_v40 = vsel %vm236_vm4, %v1056_v50, %v1057_v36 }
 0x1c0   :  { %v955_v54 = vrot.slane %v954_v13, 1 }
 0x1c1   :  { %v977_v60 = vsel %vm236_vm4, %v975_v35, %v976_v37  ;;  %v1026_v37 = vrot.slane %v1025_v16, 1 }
 0x1c2   :  { %v956_v12 = vsel %vm291_vm9, %v954_v13, %v955_v54  ;;  %v979_v20 = vadd.f32 %v977_v60, %v969_v21  ;;  %v1049_v60 = vstv %s2493_s27  ;;  %s2523_s27 = sld [smem:[#allocation3 + $0x3f]] }
 0x1c3   :  { %v3122_v23 = vadd.f32 %v956_v12, %v948_v34  ;;  %v1086_v21 = vpop.permute.xlu2 %1085 }
 0x1c4   :  { %v1087_v46 = vrot.slane %v1086_v21, 1 }
 0x1c6   :  { %v1005_v22 = vpop.permute.xlu0 %1004 }
 0x1c7   :  { %v985_v59 = vpop.permute.xlu1 %984  ;;  %v1006_v34 = vrot.slane %v1005_v22, 1 }
 0x1c8   :  { %v986_v41 = vrot.slane %v985_v59, 1 }
 0x1c9   :  { %v1007_v12 = vsel %vm269_vm7, %v1005_v22, %v1006_v34 }
 0x1ca   :  { %v987_v33 = vsel %vm247_vm5, %v985_v59, %v986_v41  ;;  %v1027_v41 = vsel %vm291_vm9, %v1025_v16, %v1026_v37 }
 0x1cb   :  { %v989_v0 = vadd.f32 %v987_v33, %v979_v20  ;;  %v1050_v20 = vmul.f32 %v1049_v60, %v2862_v7  ;;  %v1147_v16 = vpop.permute.xlu2 %1146 }
 0x1cd   :  { %v999_v13 = vadd.f32 %v997_v15, %v989_v0  ;;  %v1060_v22 = vadd.f32 %v1058_v40, %v1050_v20 }
 0x1ce   :  { %v3130_v54 = vpop.permute.xlu0 %1034 }
 0x1cf   :  { %v1015_v35 = vpop.permute.xlu1 %1014  ;;  %v1009_v29 = vadd.f32 %v1007_v12, %v999_v13 }
 0x1d0   :  { %v1016_v55 = vrot.slane %v1015_v35, 1 }
 0x1d2   :  { %v1017_v44 = vsel %vm280_vm8, %v1015_v35, %v1016_v55 }
 0x1d3   :  { %v1019_v59 = vadd.f32 %v1017_v44, %v1009_v29  ;;  %v1088_v44 = vsel %vm269_vm7, %v1086_v21, %v1087_v46 }
 0x1d5   :  { %v3136_v51 = vadd.f32 %v1027_v41, %v1019_v59 }
 0x1d6   :  { %v1066_v33 = vpop.permute.xlu0 %1065 }
 0x1d7   :  { %v1067_v0 = vrot.slane %v1066_v33, 1  ;;  %v1076_v15 = vpop.permute.xlu1 %1075 }
 0x1d8   :  { %v1077_v34 = vrot.slane %v1076_v15, 1 }
 0x1d9   :  { %v1068_v13 = vsel %vm247_vm5, %v1066_v33, %v1067_v0  ;;  %v1120_v33 = vstv %s2500_s3  ;;  %s2539_s3 = sld [smem:[#allocation3 + $0x4e]] }
 0x1da   :  { %v1070_v35 = vadd.f32 %v1068_v13, %v1060_v22  ;;  %v1078_v12 = vsel %vm258_vm6, %v1076_v15, %v1077_v34  ;;  %v1177_v15 = vpop.permute.xlu2 %1176  ;;  %v1121_v46 = vmul.f32 %v3125_v43, %v1120_v33  ;;  %v1148_v13 = vrot.slane %v1147_v16, 1 }
 0x1dc   :  { %v1080_v29 = vadd.f32 %v1078_v12, %v1070_v35 }
 0x1de   :  { %v1096_v36 = vpop.permute.xlu0 %1095  ;;  %v1090_v50 = vadd.f32 %v1088_v44, %v1080_v29 }
 0x1df   :  { %v1097_v37 = vrot.slane %v1096_v36, 1  ;;  %v1106_v55 = vpop.permute.xlu1 %1105 }
 0x1e0   :  { %v1107_v60 = vrot.slane %v1106_v55, 1 }
 0x1e1   :  { %v1098_v59 = vsel %vm280_vm8, %v1096_v36, %v1097_v37  ;;  %v1149_v36 = vsel %vm258_vm6, %v1147_v16, %v1148_v13  ;;  %v1202_v13 = vstv %s2507_s4  ;;  %s2527_s4 = sld [smem:[#allocation3 + $0x5b]] }
 0x1e2   :  { %v1100_v41 = vadd.f32 %v1098_v59, %v1090_v50  ;;  %v1108_v40 = vsel %vm291_vm9, %v1106_v55, %v1107_v60 }
 0x1e4   :  { %v3144_v20 = vadd.f32 %v1108_v40, %v1100_v41  ;;  %v1178_v41 = vrot.slane %v1177_v15, 1  ;;  %v1209_v40 = vpop.permute.xlu2 %1208 }
 0x1e6   :  { %v1127_v0 = vpop.permute.xlu0 %1126 }
 0x1e7   :  { %v1128_v22 = vrot.slane %v1127_v0, 1  ;;  %v1137_v34 = vpop.permute.xlu1 %1136 }
 0x1e8   :  { %v1138_v21 = vrot.slane %v1137_v34, 1 }
 0x1e9   :  { %v1129_v35 = vsel %vm236_vm4, %v1127_v0, %v1128_v22  ;;  %v1179_v22 = vsel %vm291_vm9, %v1177_v15, %v1178_v41 }
 0x1ea   :  { %v1131_v12 = vadd.f32 %v1129_v35, %v1121_v46  ;;  %v1139_v29 = vsel %vm247_vm5, %v1137_v34, %v1138_v21  ;;  %v1210_v21 = vrot.slane %v1209_v40, 1 }
 0x1ec   :  { %v1141_v44 = vadd.f32 %v1139_v29, %v1131_v12  ;;  %v1239_v35 = vpop.permute.xlu2 %1238  ;;  %v1211_v12 = vsel %vm236_vm4, %v1209_v40, %v1210_v21  ;;  %v518_v29 = vrot.slane %v2948_v27, 1 }
 0x1ee   :  { %v1157_v50 = vpop.permute.xlu0 %1156  ;;  %v1151_v37 = vadd.f32 %v1149_v36, %v1141_v44  ;;  %v519_v41 = vsel %vm236_vm4, %v2948_v27, %v518_v29  ;;  %v3178_v29 = vld [vmem:[#allocation2 + $0x1] ss:$2 sm:$0x3] }
 0x1ef   :  { %v1158_v55 = vrot.slane %v1157_v50, 1  ;;  %v1167_v60 = vpop.permute.xlu1 %1166 }
 0x1f0   :  { %v1168_v59 = vrot.slane %v1167_v60, 1 }
 0x1f1   :  { %v1159_v2 = vsel %vm269_vm7, %v1157_v50, %v1158_v55  ;;  %v510_v50 = vstv %s2444_s5  ;;  %s2526_s5 = sld [smem:[#allocation3 + $0x54]] }
 0x1f2   :  { %v1161_v33 = vadd.f32 %v1159_v2, %v1151_v37  ;;  %v1169_v4 = vsel %vm280_vm8, %v1167_v60, %v1168_v59  ;;  %v1203_v2 = vmul.f32 %v1202_v13, %v2862_v7  ;;  %v528_v37 = vrot.slane %v2976_v53, 1 }
 0x1f3   :  { %v1240_v60 = vrot.slane %v1239_v35, 1 }
 0x1f4   :  { %v1171_v0 = vadd.f32 %v1169_v4, %v1161_v33  ;;  %v1213_v55 = vadd.f32 %v1211_v12, %v1203_v2  ;;  %v511_v33 = vmul.f32 %v3125_v43, %v510_v50  ;;  %v529_v21 = vsel %vm247_vm5, %v2976_v53, %v528_v37 }
 0x1f5   :  { %v538_v2 = vrot.slane %v2924_v63, 1  ;;  %v1241_v27 = vsel %vm269_vm7, %v1239_v35, %v1240_v60  ;;  %v671_v35 = vrot.slane %v2972_v48, 1  ;;  %v592_v60 = vstv %s3163_s9  ;;  %s2531_s9 = sld [smem:[#allocation3 + $0x16]] }
 0x1f6   :  { %v3153_v34 = vadd.f32 %v1179_v22, %v1171_v0  ;;  %v3155_v46 = vpop.permute.xlu0 %1186 }
 0x1f7   :  { %v1229_v16 = vpop.permute.xlu1 %1228 }
 0x1f8   :  { %v1230_v4 = vrot.slane %v1229_v16, 1 }
 0x1fa   :  { %v1231_v0 = vsel %vm258_vm6, %v1229_v16, %v1230_v4 }
 0x1fe   :  { %v1219_v44 = vpop.permute.xlu0 %1218  ;;  %v1368_v22 = vpop.permute.xlu2 %1367 }
 0x1ff   :  { %v1220_v15 = vrot.slane %v1219_v44, 1  ;;  %v1259_v36 = vpop.permute.xlu1 %1258  ;;  %v1369_v12 = vrot.slane %v1368_v22, 7 }
 0x200   :  { %v1260_v50 = vrot.slane %v1259_v36, 1 }
 0x201   :  { %v1221_v59 = vsel %vm247_vm5, %v1219_v44, %v1220_v15  ;;  %v521_v44 = vadd.f32 %v519_v41, %v511_v33  ;;  %v1370_v53 = vsel %vm205_vm10, %v1369_v12, %v1368_v22  ;;  %v548_v33 = vrot.slane %v2960_v38, 1 }
 0x202   :  { %v1223_v40 = vadd.f32 %v1221_v59, %v1213_v55  ;;  %1372 = vst.msk [vmem:[#allocation2 + $0x1] ss:$2 sm:$0x7] %vm2797_vm11, %v1370_v53  ;;  %v663_v59 = vstv %s3160_s8  ;;  %v600_v12 = vrot.slane %v3059_v18, 1  ;;  %v1261_v56 = vsel %vm291_vm9, %v1259_v36, %v1260_v50  ;;  %s2543_s8 = sld [smem:[#allocation3 + $0x9]] }
 0x203   :  { %v531_v15 = vadd.f32 %v529_v21, %v521_v44  ;;  %v3195_v21 = vld [vmem:[#allocation2] ss:$2 sm:$0x3]  ;;  %v593_v36 = vmul.f32 %v592_v60, %v2862_v7 }
 0x204   :  { %v1233_v13 = vadd.f32 %v1231_v0, %v1223_v40  ;;  %v539_v40 = vsel %vm258_vm6, %v2924_v63, %v538_v2  ;;  %v558_v0 = vrot.slane %v2989_v9, 1  ;;  %v672_v63 = vsel %vm236_vm4, %v2972_v48, %v671_v35 }
 0x205   :  { %v541_v53 = vadd.f32 %v539_v40, %v531_v15  ;;  %v610_v2 = vrot.slane %v3080_v14, 1  ;;  %v664_v15 = vmul.f32 %v3125_v43, %v663_v59  ;;  %v601_v50 = vsel %vm236_vm4, %v3059_v18, %v600_v12 }
 0x206   :  { %v1249_v16 = vpop.permute.xlu0 %1248  ;;  %v1243_v4 = vadd.f32 %v1241_v27, %v1233_v13  ;;  %v681_v13 = vrot.slane %v3004_v32, 1  ;;  %v559_v1 = vsel %vm280_vm8, %v2989_v9, %v558_v0  ;;  %v1389_v40 = vstv %s3180_s13  ;;  %s2534_s13 = sld [smem:[#allocation3 + $0x2b]] }
 0x207   :  { %v1250_v37 = vrot.slane %v1249_v16, 1  ;;  %v1358_v55 = vpop.permute.xlu1 %1357  ;;  %v674_v35 = vadd.f32 %v672_v63, %v664_v15  ;;  %v611_v60 = vsel %vm247_vm5, %v3080_v14, %v610_v2  ;;  %v1379_v9 = vstv %s3188_s14  ;;  %s2533_s14 = sld [smem:[#allocation3 + $0x24]] }
 0x208   :  { %v1359_v41 = vrot.slane %v1358_v55, 7  ;;  %v682_v48 = vsel %vm247_vm5, %v3004_v32, %v681_v13  ;;  %v701_v32 = vrot.slane %v2985_v6, 1  ;;  %v603_v0 = vadd.f32 %v601_v50, %v593_v36 }
 0x209   :  { %v1251_v22 = vsel %vm280_vm8, %v1249_v16, %v1250_v37  ;;  %v815_v37 = vstv %s3172_s10  ;;  %v684_v18 = vadd.f32 %v682_v48, %v674_v35  ;;  %v711_v13 = vrot.slane %v3015_v45, 1  ;;  %s2530_s10 = sld [smem:[#allocation3 + $0xf]] }
 0x20a   :  { %v1253_v44 = vadd.f32 %v1251_v22, %v1243_v4  ;;  %v1360_v27 = vsel %vm205_vm10, %v1359_v41, %v1358_v55  ;;  %v549_v4 = vsel %vm269_vm7, %v2960_v38, %v548_v33  ;;  %v568_v55 = vrot.slane %v2938_v17, 1 }
 0x20b   :  { %1362 = vst.msk [vmem:[#allocation2] ss:$2 sm:$0x7] %vm2797_vm11, %v1360_v27  ;;  %v691_v38 = vrot.slane %v2950_v28, 1  ;;  %v551_v59 = vadd.f32 %v549_v4, %v541_v53  ;;  %v1399_v41 = vstv %s3176_s12  ;;  %v823_v22 = vrot.slane %v2999_v25, 1  ;;  %s2546_s12 = sld [smem:[#allocation3 + $0x1e]] }
 0x20c   :  { %v3206_v16 = vadd.f32 %v1261_v56, %v1253_v44  ;;  %v620_v56 = vrot.slane %v3099_v30, 1  ;;  %v833_v12 = vrot.slane %v3027_v3, 1  ;;  %v613_v27 = vadd.f32 %v611_v60, %v603_v0 }
 0x20d   :  { %v561_v33 = vadd.f32 %v559_v1, %v551_v59  ;;  %v692_v4 = vsel %vm258_vm6, %v2950_v28, %v691_v38  ;;  %v630_v15 = vrot.slane %v3075_v31, 1  ;;  %vm579_vm10 = vcmask 15360  }
 0x20e   :  { %v621_v14 = vsel %vm258_vm6, %v3099_v30, %v620_v56  ;;  %v694_v36 = vadd.f32 %v692_v4, %v684_v18  ;;  %v578_v30 = vrot.slane %v2791_v61, 7  ;;  %v569_v48 = vsel %vm291_vm9, %v2938_v17, %v568_v55 }
 0x20f   :  { %v623_v1 = vadd.f32 %v621_v14, %v613_v27  ;;  %v816_v50 = vmul.f32 %v3125_v43, %v815_v37  ;;  %v824_v28 = vsel %vm236_vm4, %v2999_v25, %v823_v22  ;;  %v702_v56 = vsel %vm269_vm7, %v2985_v6, %v701_v32 }
 0x210   :  { %v712_v38 = vsel %vm280_vm8, %v3015_v45, %v711_v13  ;;  %v834_v35 = vsel %vm247_vm5, %v3027_v3, %v833_v12  ;;  %v571_v59 = vadd.f32 %v569_v48, %v561_v33  ;;  %v631_v17 = vsel %vm269_vm7, %v3075_v31, %v630_v15 }
 0x211   :  { %v640_v37 = vrot.slane %v3088_v10, 1  ;;  %v650_v25 = vrot.slane %v3103_v47, 1  ;;  %v1429_v55 = vstv %s3227_s15  ;;  %v826_v60 = vadd.f32 %v824_v28, %v816_v50  ;;  %s2538_s15 = sld [smem:[#allocation3 + $0x47]] }
 0x212   :  { %v3237_v44 = vld [vmem:[#allocation2] ss:$2 sm:$0x7]  ;;  %v633_v6 = vadd.f32 %v631_v17, %v623_v1  ;;  %v3270_v45 = vsel %vm579_vm10, %v578_v30, %v2791_v61  ;;  %v721_v3 = vrot.slane %v2962_v39, 1  ;;  %vm732_vm11 = vcmask 23552  }
 0x213   :  { %v1400_v53 = vmul.f32 %v1399_v41, %v3237_v44  ;;  %v1390_v63 = vmul.f32 %v1389_v40, %v3237_v44  ;;  %v1380_v2 = vmul.f32 %v1379_v9, %v3237_v44  ;;  %v704_v41 = vadd.f32 %v702_v56, %v694_v36 }
 0x214   :  { %v1409_v40 = vstv %s3230_s16  ;;  %v843_v9 = vrot.slane %v2974_v49, 1  ;;  %v836_v33 = vadd.f32 %v834_v35, %v826_v60  ;;  %v1430_v31 = vmul.f32 %v1429_v55, %v3237_v44  ;;  %s2537_s16 = sld [smem:[#allocation3 + $0x40]] }
 0x215   :  { %1402 = vrot.lane.b32.xlu2 %v1400_v53, %s2725_s29  ;;  %1392 = vrot.lane.b32.xlu1 %v1390_v63, %s2727_s6  ;;  %v714_v32 = vadd.f32 %v712_v38, %v704_v41  ;;  %v582_v18 = vmul.f32 %v3270_v45, %v571_v59  ;;  %v641_v0 = vsel %vm280_vm8, %v3088_v10, %v640_v37  ;;  %v731_v61 = vrot.slane %v2793_v62, 7 }
 0x216   :  { %1382 = vrot.lane.b32.xlu0 %v1380_v2, %s2726_s30  ;;  %v651_v22 = vsel %vm291_vm9, %v3103_v47, %v650_v25  ;;  %v1410_v13 = vmul.f32 %v1409_v40, %v3237_v44  ;;  %v643_v12 = vadd.f32 %v641_v0, %v633_v6  ;;  %v722_v14 = vsel %vm291_vm9, %v2962_v39, %v721_v3  ;;  %v3291_v2 = vld [vmem:[#allocation2 + $0x1] ss:$2 sm:$0x7] }
 0x217   :  { %v844_v10 = vsel %vm258_vm6, %v2974_v49, %v843_v9  ;;  %v853_v47 = vrot.slane %v3011_v42, 1  ;;  %v863_v27 = vrot.slane %v3041_v24, 1  ;;  %v724_v4 = vadd.f32 %v722_v14, %v714_v32 }
 0x218   :  { %v846_v53 = vadd.f32 %v844_v10, %v836_v33  ;;  %v653_v63 = vadd.f32 %v651_v22, %v643_v12  ;;  %v1446_v15 = vstv %s3260_s17  ;;  %v3296_v36 = vsel %vm732_vm11, %v731_v61, %v2793_v62  ;;  %s2541_s17 = sld [smem:[#allocation3 + $0x5c]] }
 0x219   :  { %v854_v39 = vsel %vm269_vm7, %v3011_v42, %v853_v47  ;;  %v864_v49 = vsel %vm280_vm8, %v3041_v24, %v863_v27  ;;  %v1447_v1 = vmul.f32 %v1446_v15, %v3291_v2  ;;  %v735_v50 = vmul.f32 %v3296_v36, %v724_v4 }
 0x21a   :  { %v856_v30 = vadd.f32 %v854_v39, %v846_v53  ;;  %v654_v48 = vmul.f32 %v653_v63, %v3270_v45  ;;  %v873_v28 = vrot.slane %v2987_v8, 1  ;;  %v883_v56 = vrot.slane %v3105_v19, 7 }
 0x21b   :  { %v1476_v62 = vstv %s2525_s1  ;;  %v806_v17 = vmul.f32 %v3116_v57, %v3296_v36  ;;  %v1036_v25 = vrot.slane %v3130_v54, 7  ;;  %v1188_v60 = vrot.slane %v3155_v46, 7  ;;  %s2540_s1 = sld [smem:[#allocation3 + $0x55]] }
 0x21c   :  { %v866_v38 = vadd.f32 %v864_v49, %v856_v30  ;;  %v874_v42 = vsel %vm291_vm9, %v2987_v8, %v873_v28  ;;  %v3313_v24 = vsel %vm884_vm12, %v883_v56, %v3105_v19  ;;  %v1477_v59 = vmul.f32 %v1476_v62, %v3291_v2 }
 0x21d   :  { %1432 = vrot.lane.b32.xlu2 %v1430_v31, %s2729_s11  ;;  %584 = vrot.lane.b32.xlu1 %v582_v18, %s2733_s0  ;;  %v3324_v8 = vsel %vm1037_vm13, %v1036_v25, %v3130_v54  ;;  %v1511_v19 = vstv %s2529_s21  ;;  %v959_v57 = vmul.f32 %v3122_v23, %v3313_v24  ;;  %v3336_v54 = vsel %vm1189_vm14, %v1188_v60, %v3155_v46  ;;  %s3377_s21 = sld [smem:[#allocation3 + $0x1]] }
 0x21e   :  { %1412 = vrot.lane.b32.xlu0 %v1410_v13, %s2728_s7  ;;  %v876_v35 = vadd.f32 %v874_v42, %v866_v38  ;;  %v1040_v55 = vmul.f32 %v3324_v8, %v3136_v51  ;;  %v1512_v41 = vmul.f32 %v1511_v19, %v3237_v44  ;;  %v1541_v23 = vstv %s2532_s23  ;;  %s2423_s23 = sld [smem:[#allocation3 + $0x31]] }
 0x21f   :  { %v1111_v51 = vmul.f32 %v3144_v20, %v3324_v8  ;;  %v1192_v6 = vmul.f32 %v3336_v54, %v3153_v34  ;;  %v1542_v40 = vmul.f32 %v1541_v23, %v3237_v44  ;;  %v1576_v3 = vstv %s2536_s24  ;;  %s2545_s24 = sld [smem:[#allocation3 + $0x17]] }
 0x220   :  { %v887_v37 = vmul.f32 %v3313_v24, %v876_v35  ;;  %v1419_v46 = vstv %s2519_s25  ;;  %v1577_v9 = vmul.f32 %v1576_v3, %v3291_v2  ;;  %v1264_v20 = vmul.f32 %v3206_v16, %v3336_v54  ;;  %s2544_s25 = sld [smem:[#allocation3 + $0x10]] }
 0x221   :  { %v1420_v34 = vmul.f32 %v1419_v46, %v3237_v44  ;;  %v1466_v32 = vstv %s2524_s20  ;;  %v1456_v33 = vstv %s2523_s27  ;;  %v1606_v31 = vstv %s2539_s3  ;;  %s3383_s20 = sld [smem:[#allocation3]] }
 0x222   :  { %v1467_v18 = vmul.f32 %v1466_v32, %v3291_v2  ;;  %v1457_v0 = vmul.f32 %v1456_v33, %v3291_v2  ;;  %v1607_v16 = vmul.f32 %v1606_v31, %v3291_v2  ;;  %v1496_v22 = vstv %s2527_s4  ;;  %s3385_s27 = sld [smem:[#allocation3 + $0x32]] }
 0x223   :  { %v1486_v13 = vstv %s2526_s5  ;;  %v1641_v61 = vstv %s2543_s8  ;;  %v1497_v12 = vmul.f32 %v1496_v22, %v3291_v2  ;;  %v1531_v47 = vstv %s2531_s9  ;;  %s3395_s3 = sld [smem:[#allocation3 + $0x2c]] }
 0x224   :  { %v1487_v14 = vmul.f32 %v1486_v13, %v3291_v2  ;;  %v1642_v10 = vmul.f32 %v1641_v61, %v3237_v44  ;;  %v1521_v27 = vstv %s2530_s10  ;;  %v1671_v53 = vstv %s2546_s12  ;;  %s3400_s4 = sld [smem:[#allocation3 + $0x25]] }
 0x225   :  { %656 = vrot.lane.b32.xlu2 %v654_v48, %s2733_s0  ;;  %737 = vrot.lane.b32.xlu1 %v735_v50, %s2733_s0  ;;  %v1532_v63 = vmul.f32 %v1531_v47, %v3237_v44  ;;  %v1522_v4 = vmul.f32 %v1521_v27, %v3237_v44  ;;  %v1672_v15 = vmul.f32 %v1671_v53, %v3237_v44  ;;  %v1561_v39 = vstv %s2534_s13  ;;  %s3428_s5 = sld [smem:[#allocation3]]  ;;  %v4101_v27 = vld [vmem:[#allocation15_spill] sm:$0xff] }
 0x226   :  { %1449 = vrot.lane.b32.xlu0 %v1447_v1, %s2726_s30  ;;  %v1551_v49 = vstv %s2533_s14  ;;  %v1562_v1 = vmul.f32 %v1561_v39, %v3237_v44  ;;  %v1596_v48 = vstv %s2538_s15  ;;  %v1586_v50 = vstv %s2537_s16  ;;  %s3436_s8 = sld [smem:[#allocation3 + $0x41]] }
 0x227   :  { %v1552_v30 = vmul.f32 %v1551_v49, %v3237_v44  ;;  %v1597_v28 = vmul.f32 %v1596_v48, %v3291_v2  ;;  %v1587_v56 = vmul.f32 %v1586_v50, %v3291_v2  ;;  %v1626_v62 = vstv %s2541_s17  ;;  %s3444_s9 = sld [smem:[#allocation3 + $0x3a]] }
 0x228   :  { %v1616_v42 = vstv %s2540_s1  ;;  %v1627_v35 = vmul.f32 %v1626_v62, %v3291_v2  ;;  %v323_v25 = vrot.slane %v3023_v58, 1  ;;  %v1661_v60 = vstv %s2545_s24  ;;  %s3481_s10 = sld [smem:[#allocation3 + $0xa]] }
 0x229   :  { %v370_v23 = vstv %s3377_s21  ;;  %v235_v3 = vrot.slane %v2913_v52, 1  ;;  %v1662_v32 = vmul.f32 %v1661_v60, %v3237_v44  ;;  %v268_v53 = vrot.slane %v4101_v27, 1  ;;  %v4107_v60 = vld [vmem:[#allocation13_spill] sm:$0xff]  ;;  %s3485_s12 = sld [smem:[#allocation3 + $0x3b]] }
 0x22a   :  { %v324_v46 = vsel %vm247_vm5, %v3023_v58, %v323_v25  ;;  %v3414_v31 = vmul.f32 %v3125_v43, %v370_v23  ;;  %v4098_v58 = vld [vmem:[#allocation32_spill] sm:$0xff]  ;;  %v4103_v39 = vmov 0.0   ;;  %vm587_vm10 = vcmask 1031168   ;;  %s3513_s13 = sld [smem:[#allocation3 + $0xc]] }
 0x22b   :  { %v463_v13 = vrot.slane %v4098_v58, 1  ;;  %v237_v61 = vsel %vm236_vm4, %v2913_v52, %v235_v3  ;;  %s3517_s14 = sld [smem:[#allocation3 + $0x42]]  ;;  %vm1197_vm11 = vcmask 998400   ;;  %vm1278_vm12 = vcmask 1039360  }
 0x22c   :  { %s3547_s15 = sld [smem:[#allocation3 + $0x18]] }
 0x22d   :  { %808 = vrot.lane.b32.xlu2 %v806_v17, %s2733_s0  ;;  %889 = vrot.lane.b32.xlu1 %v887_v37, %s2734_s22  ;;  %v313_v17 = vrot.slane %v3001_v26, 1  ;;  %v304_v37 = vstv %s2423_s23  ;;  %v464_v50 = vsel %vm247_vm5, %v4098_v58, %v463_v13  ;;  %v1375_v58 = vstv %s3428_s5  ;;  %v1373_v13 = vld [vmem:[#allocation2] ss:$2 sm:$0x3]  ;;  %s3553_s16 = sld [smem:[#allocation3 + $0x49]] }
 0x22e   :  { %1479 = vrot.lane.b32.xlu0 %v1477_v59, %s2728_s7  ;;  %v1617_v59 = vmul.f32 %v1616_v42, %v3291_v2  ;;  %s3567_s17 = sld [smem:[#allocation3 + $0x1]] }
 0x22f   :  { %s3572_s1 = sld [smem:[#allocation3 + $0x1f]] }
 0x230   :  { %s2593_s21 = sld [smem:[#allocation3 + $0x44]] }
 0x231   :  { %s2587_s23 = sld [smem:[#allocation3 + $0x1a]] }
 0x232   :  { %s2594_s24 = sld [smem:[#allocation3 + $0x4b]] }
 0x233   :  { %s2569_s5 = sld [smem:[#allocation3 + $0x5e]] }
 0x235   :  { %961 = vrot.lane.b32.xlu2 %v959_v57, %s2734_s22  ;;  %1042 = vrot.lane.b32.xlu1 %v1040_v55, %s2734_s22  ;;  %v314_v57 = vsel %vm236_vm4, %v3001_v26, %v313_v17  ;;  %v333_v55 = vrot.slane %v3055_v11, 1  ;;  %v4095_v26 = vld [vmem:[#allocation29_spill] sm:$0xff]  ;;  %v4106_v17 = vld [vmem:[#allocation26_spill] sm:$0xff] }
 0x236   :  { %1514 = vrot.lane.b32.xlu0 %v1512_v41, %s2726_s30  ;;  %v1651_v41 = vstv %s2544_s25  ;;  %s3601_s25 = sld [smem:[#allocation3 + $0x21]] }
 0x237   :  { %v1652_v33 = vmul.f32 %v1651_v41, %v3237_v44  ;;  %v438_v41 = vrot.slane %v4107_v60, 7 }
 0x23d   :  { %1113 = vrot.lane.b32.xlu2 %v1111_v51, %s2734_s22  ;;  %1194 = vrot.lane.b32.xlu1 %v1192_v6, %s2735_s26  ;;  %v305_v51 = vmul.f32 %v304_v37, %v3178_v29  ;;  %v73_v6 = vadd.s32 4294967293, %v2765_v5  ;;  %v334_v5 = vsel %vm258_vm6, %v3055_v11, %v333_v55  ;;  %v4096_v29 = vld [vmem:[#allocation12_spill] sm:$0xff]  ;;  %v4099_v11 = vld [vmem:[#allocation25_spill] sm:$0xff]  ;;  %v473_v37 = vrot.slane %v4106_v17, 1 }
 0x23e   :  { %1544 = vrot.lane.b32.xlu0 %v1542_v40, %s2728_s7  ;;  %v226_v40 = vstv %s3383_s20  ;;  %s2535_s20 = sld [smem:[#allocation3 + $0x32]] }
 0x23f   :  { %vm75_vm15 = vcmp.ge.s32.totalorder %v73_v6, 0  ;;  %v227_v43 = vmul.f32 %v226_v40, %v3195_v21  ;;  %v4102_v21 = vld [vmem:[#allocation16_spill] sm:$0xff]  ;;  %v270_v40 = vsel %vm269_vm7, %v4101_v27, %v268_v53 }
 0x240   :  { %v378_v52 = vrot.slane %v4102_v21, 1  ;;  %v3440_v49 = vsel %vm75_vm15, 1.0, %v4103_v39 }
 0x242   :  { %v379_v3 = vsel %vm236_vm4, %v4102_v21, %v378_v52  ;;  %v1376_v52 = vmul.f32 %v1375_v58, %v1373_v13 }
 0x245   :  { %1266 = vrot.lane.b32.xlu2 %v1264_v20, %s2735_s26  ;;  %1422 = vrot.lane.b32.xlu1 %v1420_v34, %s2724_s28  ;;  %v316_v20 = vadd.f32 %v314_v57, %v305_v51  ;;  %v453_v34 = vrot.slane %v4095_v26, 1 }
 0x246   :  { %1579 = vrot.lane.b32.xlu0 %v1577_v9, %s2726_s30  ;;  %v445_v9 = vstv %s3385_s27  ;;  %s2568_s27 = sld [smem:[#allocation3 + $0x57]] }
 0x247   :  { %v326_v22 = vadd.f32 %v324_v46, %v316_v20  ;;  %v4108_v46 = vld [vmem:[#allocation30_spill] sm:$0xff]  ;;  %v297_v20 = vrot.slane %v3440_v49, 7 }
 0x24d   :  { %1469 = vrot.lane.b32.xlu2 %v1467_v18, %s2725_s29  ;;  %1459 = vrot.lane.b32.xlu1 %v1457_v0, %s2727_s6  ;;  %v72_v18 = vadd.s32 4294967293, %v4096_v29  ;;  %v4097_v0 = vld [vmem:[#allocation20_spill] sm:$0xff]  ;;  %v474_v29 = vsel %vm258_vm6, %v4106_v17, %v473_v37 }
 0x24e   :  { %1609 = vrot.lane.b32.xlu0 %v1607_v16, %s2728_s7  ;;  %v246_v16 = vrot.slane %v4097_v0, 1 }
 0x24f   :  { %vm74_vm1 = vcmp.ge.s32.totalorder %v72_v18, 0 }
 0x250   :  { %v248_v48 = vsel %vm247_vm5, %v4097_v0, %v246_v16 }
 0x255   :  { %1499 = vrot.lane.b32.xlu2 %v1497_v12, %s2729_s11  ;;  %1489 = vrot.lane.b32.xlu1 %v1487_v14, %s2724_s28  ;;  %v343_v12 = vrot.slane %v4099_v11, 1  ;;  %v446_v14 = vmul.f32 %v445_v9, %v2862_v7  ;;  %v1691_v7 = vstv %s3395_s3  ;;  %v483_v9 = vrot.slane %v4108_v46, 1  ;;  %s2521_s3 = sld [smem:[#allocation3 + $0x31]] }
 0x256   :  { %1644 = vrot.lane.b32.xlu0 %v1642_v10, %s2726_s30  ;;  %v4100_v10 = vld [vmem:[#allocation14_spill] sm:$0xff]  ;;  %v1692_v57 = vmul.f32 %v1691_v7, %v3237_v44 }
 0x257   :  { %v257_v47 = vrot.slane %v4100_v10, 1  ;;  %v484_v18 = vsel %vm269_vm7, %v4108_v46, %v483_v9 }
 0x259   :  { %v259_v23 = vsel %vm258_vm6, %v4100_v10, %v257_v47  ;;  %v1712_v47 = vstv %s3444_s9  ;;  %s2596_s9 = sld [smem:[#allocation3 + $0x59]] }
 0x25d   :  { %1534 = vrot.lane.b32.xlu2 %v1532_v63, %s2725_s29  ;;  %1524 = vrot.lane.b32.xlu1 %v1522_v4, %s2727_s6  ;;  %v454_v63 = vsel %vm236_vm4, %v4095_v26, %v453_v34  ;;  %v336_v4 = vadd.f32 %v334_v5, %v326_v22  ;;  %v2405_v5 = vsel %vm74_vm1, 1.0, %v4103_v39 }
 0x25e   :  { %1674 = vrot.lane.b32.xlu0 %v1672_v15, %s2728_s7  ;;  %v456_v42 = vadd.f32 %v454_v63, %v446_v14 }
 0x260   :  { %v466_v6 = vadd.f32 %v464_v50, %v456_v42  ;;  %v4112_v42 = vld [vmem:[#allocation28_spill] sm:$0xff] }
 0x262   :  { %v476_v14 = vadd.f32 %v474_v29, %v466_v6 }
 0x265   :  { %1564 = vrot.lane.b32.xlu2 %v1562_v1, %s2729_s11  ;;  %1554 = vrot.lane.b32.xlu1 %v1552_v30, %s2724_s28  ;;  %v1681_v1 = vstv %s3400_s4  ;;  %v239_v30 = vadd.f32 %v237_v61, %v227_v43  ;;  %v1722_v43 = vstv %s3436_s8  ;;  %v4110_v61 = vld [vmem:[#allocation19_spill] sm:$0xff]  ;;  %s3616_s4 = sld [smem:[#allocation3 + $0x2d]] }
 0x266   :  { %v1682_v55 = vmul.f32 %v1681_v1, %v3237_v44  ;;  %v1723_v39 = vmul.f32 %v1722_v43, %v3291_v2  ;;  %v1713_v1 = vmul.f32 %v1712_v47, %v3291_v2  ;;  %v4115_v47 = vld [vmem:[#allocation18_spill] sm:$0xff]  ;;  %s2590_s8 = sld [smem:[#allocation3 + $0x2f]] }
 0x267   :  { %v250_v51 = vadd.f32 %v248_v48, %v239_v30  ;;  %v381_v30 = vadd.f32 %v379_v3, %v3414_v31  ;;  %v4111_v48 = vld [vmem:[#allocation17_spill] sm:$0xff]  ;;  %v4113_v31 = vld [vmem:[#allocation23_spill] sm:$0xff] }
 0x268   :  { %v279_v50 = vrot.slane %v4111_v48, 1  ;;  %v398_v37 = vrot.slane %v4113_v31, 1 }
 0x26a   :  { %v399_v29 = vsel %vm258_vm6, %v4113_v31, %v398_v37 }
 0x26d   :  { %1599 = vrot.lane.b32.xlu2 %v1597_v28, %s2725_s29  ;;  %1589 = vrot.lane.b32.xlu1 %v1587_v56, %s2727_s6  ;;  %v344_v28 = vsel %vm269_vm7, %v4099_v11, %v343_v12  ;;  %v4104_v56 = vld [vmem:[#allocation27_spill] sm:$0xff]  ;;  %v388_v11 = vrot.slane %v4110_v61, 1  ;;  %v261_v12 = vadd.f32 %v259_v23, %v250_v51 }
 0x26e   :  { %v353_v62 = vrot.slane %v4104_v56, 1  ;;  %v346_v25 = vadd.f32 %v344_v28, %v336_v4  ;;  %v486_v28 = vadd.f32 %v484_v18, %v476_v14  ;;  %v408_v18 = vrot.slane %v4115_v47, 1 }
 0x26f   :  { %v3381_v38 = vpop.permute.xlu2 %1402  ;;  %v272_v23 = vadd.f32 %v270_v40, %v261_v12 }
 0x270   :  { %v354_v26 = vsel %vm280_vm8, %v4104_v56, %v353_v62  ;;  %v1404_v49 = vrot.slane %v3381_v38, 1  ;;  %v389_v62 = vsel %vm247_vm5, %v4110_v61, %v388_v11 }
 0x271   :  { %v356_v0 = vadd.f32 %v354_v26, %v346_v25  ;;  %v391_v12 = vadd.f32 %v389_v62, %v381_v30  ;;  %v2067_v30 = vstv %s3513_s13  ;;  %s2599_s13 = sld [smem:[#allocation3 + $0xd]] }
 0x272   :  { %v1405_v51 = vsel %vm258_vm6, %v3381_v38, %v1404_v49  ;;  %v2068_v37 = vmul.f32 %v2067_v30, %v3237_v44 }
 0x275   :  { %1629 = vrot.lane.b32.xlu2 %v1627_v35, %s2729_s11  ;;  %1619 = vrot.lane.b32.xlu1 %v1617_v59, %s2724_s28  ;;  %v4105_v35 = vld [vmem:[#allocation31_spill] sm:$0xff] }
 0x276   :  { %v363_v59 = vrot.slane %v4105_v35, 1 }
 0x277   :  { %v3393_v19 = vpop.permute.xlu2 %1432 }
 0x278   :  { %v364_v34 = vsel %vm291_vm9, %v4105_v35, %v363_v59  ;;  %v503_v35 = vrot.slane %v4112_v42, 1  ;;  %v3502_v59 = vsel %vm200_vm3, %v2405_v5, %v297_v20  ;;  %vm892_vm3 = vcmask 1014784  }
 0x279   :  { %v366_v27 = vadd.f32 %v364_v34, %v356_v0  ;;  %v1854_v34 = vstv %s3485_s12  ;;  %s2578_s12 = sld [smem:[#allocation3 + $0x3c]] }
 0x27a   :  { %v504_v40 = vsel %vm291_vm9, %v4112_v42, %v503_v35  ;;  %v1855_v61 = vmul.f32 %v1854_v34, %v3291_v2  ;;  %v4117_v35 = vld [vmem:[#allocation24_spill] sm:$0xff] }
 0x27b   :  { %v367_v6 = vmul.f32 %v366_v27, %v3502_v59  ;;  %v3540_v27 = vsel %vm439_vm2, %v438_v41, %v4107_v60  ;;  %v1864_v60 = vstv %s3517_s14  ;;  %v409_v41 = vsel %vm269_vm7, %v4115_v47, %v408_v18  ;;  %s2579_s14 = sld [smem:[#allocation3 + $0x43]] }
 0x27c   :  { %v1813_v18 = vstv %s3572_s1  ;;  %s2607_s1 = sld [smem:[#allocation3 + $0x45]] }
 0x27d   :  { %1664 = vrot.lane.b32.xlu2 %v1662_v32, %s2725_s29  ;;  %1654 = vrot.lane.b32.xlu1 %v1652_v33, %s2727_s6  ;;  %v4109_v32 = vld [vmem:[#allocation33_spill] sm:$0xff] }
 0x27e   :  { %v493_v33 = vrot.slane %v4109_v32, 1 }
 0x27f   :  { %v3434_v15 = vpop.permute.xlu2 %656 }
 0x280   :  { %v494_v4 = vsel %vm280_vm8, %v4109_v32, %v493_v33  ;;  %v658_v21 = vrot.slane %v3434_v15, 1  ;;  %v1783_v32 = vstv %s3481_s10  ;;  %s2571_s10 = sld [smem:[#allocation3 + $0xb]] }
 0x281   :  { %v496_v25 = vadd.f32 %v494_v4, %v486_v28  ;;  %v1784_v11 = vmul.f32 %v1783_v32, %v3237_v44  ;;  %v1874_v32 = vstv %s3553_s16  ;;  %s2553_s16 = sld [smem:[#allocation3 + $0x4f]] }
 0x283   :  { %v506_v0 = vadd.f32 %v504_v40, %v496_v25  ;;  %v1865_v25 = vmul.f32 %v1864_v60, %v3291_v2 }
 0x285   :  { %1694 = vrot.lane.b32.xlu2 %v1692_v57, %s2729_s11  ;;  %1684 = vrot.lane.b32.xlu1 %v1682_v55, %s2724_s28  ;;  %v659_v57 = vsel %vm587_vm10, %v3434_v15, %v658_v21  ;;  %v4114_v15 = vld [vmem:[#allocation22_spill] sm:$0xff] }
 0x286   :  { %v290_v33 = vrot.slane %v4114_v15, 1  ;;  %v661_v38 = vadd.f32 %v659_v57, %v367_v6 }
 0x287   :  { %v3477_v16 = vpop.permute.xlu2 %808  ;;  %v1393_v22 = vpop.permute.xlu1 %1392 }
 0x288   :  { %v1383_v10 = vpop.permute.xlu0 %1382  ;;  %v1394_v53 = vrot.slane %v1393_v22, 1  ;;  %v292_v21 = vsel %vm291_vm9, %v4114_v15, %v290_v33  ;;  %v1803_v15 = vstv %s3547_s15  ;;  %s2573_s15 = sld [smem:[#allocation3 + $0x19]] }
 0x289   :  { %v1384_v63 = vrot.slane %v1383_v10, 1 }
 0x28a   :  { %v1395_v17 = vsel %vm247_vm5, %v1393_v22, %v1394_v53  ;;  %v810_v22 = vrot.slane %v3477_v16, 1 }
 0x28b   :  { %v1385_v7 = vsel %vm236_vm4, %v1383_v10, %v1384_v63  ;;  %v281_v10 = vsel %vm280_vm8, %v4111_v48, %v279_v50  ;;  %v401_v63 = vadd.f32 %v399_v29, %v391_v12 }
 0x28c   :  { %v1387_v56 = vadd.f32 %v1385_v7, %v1376_v52  ;;  %v283_v53 = vadd.f32 %v281_v10, %v272_v23  ;;  %v811_v4 = vsel %vm587_vm10, %v3477_v16, %v810_v22  ;;  %v507_v52 = vmul.f32 %v506_v0, %v3540_v27  ;;  %v4116_v16 = vld [vmem:[#allocation21_spill] sm:$0xff] }
 0x28d   :  { %1725 = vrot.lane.b32.xlu2 %v1723_v39, %s2727_s6  ;;  %1715 = vrot.lane.b32.xlu1 %v1713_v1, %s2726_s30  ;;  %v418_v48 = vrot.slane %v4116_v16, 1  ;;  %v1875_v22 = vmul.f32 %v1874_v32, %v3291_v2  ;;  %v1508_v10 = vstv %s3567_s17  ;;  %s3693_s17 = sld [smem:[#allocation3 + $0x14]] }
 0x28e   :  { %v1397_v55 = vadd.f32 %v1395_v17, %v1387_v56  ;;  %v813_v50 = vadd.f32 %v811_v4, %v507_v52  ;;  %v294_v28 = vadd.f32 %v292_v21, %v283_v53  ;;  %v411_v56 = vadd.f32 %v409_v41, %v401_v63 }
 0x28f   :  { %v962_v3 = vpop.permute.xlu2 %961  ;;  %v585_v46 = vpop.permute.xlu1 %584  ;;  %v428_v17 = vrot.slane %v4117_v35, 1  ;;  %v419_v57 = vsel %vm280_vm8, %v4116_v16, %v418_v48  ;;  %v2148_v53 = vstv %s2593_s21  ;;  %v1509_v52 = vmul.f32 %v1508_v10, %v3237_v44  ;;  %s2542_s21 = sld [smem:[#allocation3 + $0x2]] }
 0x290   :  { %v963_v9 = vrot.slane %v962_v3, 1  ;;  %v1413_v20 = vpop.permute.xlu0 %1412  ;;  %v1407_v26 = vadd.f32 %v1405_v51, %v1397_v55  ;;  %v586_v62 = vrot.slane %v585_v46, 1  ;;  %v421_v23 = vadd.f32 %v419_v57, %v411_v56 }
 0x291   :  { %v1414_v5 = vrot.slane %v1413_v20, 1  ;;  %v429_v51 = vsel %vm291_vm9, %v4117_v35, %v428_v17  ;;  %v300_v6 = vmul.f32 %v3502_v59, %v294_v28  ;;  %v2149_v30 = vmul.f32 %v2148_v53, %v3291_v2 }
 0x292   :  { %v964_v58 = vsel %vm892_vm3, %v962_v3, %v963_v9  ;;  %v588_v55 = vsel %vm587_vm10, %v585_v46, %v586_v62  ;;  %v431_v33 = vadd.f32 %v429_v51, %v421_v23  ;;  %v2158_v56 = vstv %s2594_s24  ;;  %s2581_s24 = sld [smem:[#allocation3 + $0x51]] }
 0x293   :  { %v966_v13 = vadd.f32 %v964_v58, %v661_v38  ;;  %v1415_v43 = vsel %vm269_vm7, %v1413_v20, %v1414_v5  ;;  %v590_v46 = vadd.f32 %v588_v55, %v300_v6  ;;  %v1804_v58 = vmul.f32 %v1803_v15, %v3237_v44 }
 0x294   :  { %v3529_v14 = vadd.f32 %v1415_v43, %v1407_v26  ;;  %v2087_v62 = vstv %s2587_s23  ;;  %v2159_v17 = vmul.f32 %v2158_v56, %v3291_v2  ;;  %v1573_v55 = vstv %s2535_s20  ;;  %s3707_s23 = sld [smem:[#allocation3 + $0x20]] }
 0x295   :  { %1857 = vrot.lane.b32.xlu2 %v1855_v61, %s2726_s30  ;;  %1786 = vrot.lane.b32.xlu1 %v1784_v11, %s2726_s30  ;;  %v442_v61 = vmul.f32 %v3540_v27, %v431_v33  ;;  %v1434_v23 = vrot.slane %v3393_v19, 1  ;;  %v1574_v15 = vmul.f32 %v1573_v55, %v3291_v2  ;;  %s3723_s20 = sld [smem:[#allocation3 + $0x5d]] }
 0x297   :  { %v1114_v39 = vpop.permute.xlu2 %1113  ;;  %v738_v49 = vpop.permute.xlu1 %737 }
 0x298   :  { %v1115_v7 = vrot.slane %v1114_v39, 1  ;;  %v3549_v1 = vpop.permute.xlu0 %1449  ;;  %v739_v40 = vrot.slane %v738_v49, 1 }
 0x29a   :  { %v1116_v42 = vsel %vm892_vm3, %v1114_v39, %v1115_v7  ;;  %v740_v43 = vsel %vm587_vm10, %v738_v49, %v739_v40  ;;  %v1814_v7 = vmul.f32 %v1813_v18, %v3237_v44 }
 0x29b   :  { %v1118_v31 = vadd.f32 %v1116_v42, %v813_v50  ;;  %v742_v63 = vadd.f32 %v740_v43, %v442_v61 }
 0x29d   :  { %2070 = vrot.lane.b32.xlu2 %v2068_v37, %s2726_s30  ;;  %1867 = vrot.lane.b32.xlu1 %v1865_v25, %s2727_s6 }
 0x29f   :  { %v1267_v3 = vpop.permute.xlu2 %1266  ;;  %v890_v9 = vpop.permute.xlu1 %889 }
 0x2a0   :  { %v1268_v20 = vrot.slane %v1267_v3, 1  ;;  %v891_v26 = vrot.slane %v890_v9, 1  ;;  %v3574_v34 = vpop.permute.xlu0 %1479 }
 0x2a1   :  { %v1481_v53 = vrot.slane %v3574_v34, 1 }
 0x2a2   :  { %v1269_v38 = vsel %vm1197_vm11, %v1267_v3, %v1268_v20  ;;  %v893_v5 = vsel %vm892_vm3, %v890_v9, %v891_v26  ;;  %v2097_v3 = vstv %s3601_s25  ;;  %v1894_v9 = vstv %s2568_s27  ;;  %s3720_s25 = sld [smem:[#allocation3 + $0x5]] }
 0x2a3   :  { %v1271_v29 = vadd.f32 %v1269_v38, %v966_v13  ;;  %v895_v0 = vadd.f32 %v893_v5, %v590_v46  ;;  %v1451_v26 = vrot.slane %v3549_v1, 1  ;;  %v2098_v40 = vmul.f32 %v2097_v3, %v3237_v44  ;;  %s3728_s27 = sld [smem:[#allocation3 + $0x4c]] }
 0x2a4   :  { %v1895_v38 = vmul.f32 %v1894_v9, %v3291_v2  ;;  %v1435_v5 = vsel %vm291_vm9, %v3393_v19, %v1434_v23  ;;  %v1996_v3 = vstv %s2578_s12  ;;  %v1925_v9 = vstv %s2571_s10  ;;  %s2583_s10 = sld [smem:[#allocation3 + $0x5f]] }
 0x2a5   :  { %1877 = vrot.lane.b32.xlu2 %v1875_v22, %s2725_s29  ;;  %1806 = vrot.lane.b32.xlu1 %v1804_v58, %s2725_s29  ;;  %s2558_s12 = sld [smem:[#allocation3 + $0x11]] }
 0x2a7   :  { %v3586_v11 = vpop.permute.xlu2 %1469  ;;  %v1043_v12 = vpop.permute.xlu1 %1042 }
 0x2a8   :  { %v1044_v47 = vrot.slane %v1043_v12, 1  ;;  %v1515_v13 = vpop.permute.xlu0 %1514  ;;  %v1471_v19 = vrot.slane %v3586_v11, 1 }
 0x2a9   :  { %v1516_v4 = vrot.slane %v1515_v13, 1 }
 0x2aa   :  { %v1045_v21 = vsel %vm892_vm3, %v1043_v12, %v1044_v47  ;;  %v1904_v47 = vstv %s2569_s5  ;;  %s2582_s5 = sld [smem:[#allocation3 + $0x58]] }
 0x2ab   :  { %v1047_v39 = vadd.f32 %v1045_v21, %v742_v63  ;;  %v1517_v49 = vsel %vm236_vm4, %v1515_v13, %v1516_v4  ;;  %v1833_v13 = vstv %s3616_s4  ;;  %v1905_v21 = vmul.f32 %v1904_v47, %v3291_v2  ;;  %s3746_s4 = sld [smem:[#allocation3 + $0x22]] }
 0x2ac   :  { %v3595_v60 = vadd.f32 %v1517_v49, %v1509_v52  ;;  %v1472_v52 = vsel %vm258_vm6, %v3586_v11, %v1471_v19  ;;  %v1482_v49 = vsel %vm269_vm7, %v3574_v34, %v1481_v53 }
 0x2ad   :  { %v3597_v41 = vadd.f32 %v1118_v31, %v1047_v39  ;;  %1816 = vrot.lane.b32.xlu2 %v1814_v7, %s2728_s7  ;;  %2151 = vrot.lane.b32.xlu1 %v2149_v30, %s2727_s6  ;;  %v2088_v31 = vmul.f32 %v2087_v62, %v3237_v44  ;;  %v2117_v62 = vstv %s2590_s8  ;;  %s2552_s8 = sld [smem:[#allocation3 + $0x48]] }
 0x2af   :  { %v3603_v16 = vpop.permute.xlu2 %1499  ;;  %v1195_v48 = vpop.permute.xlu1 %1194 }
 0x2b0   :  { %v1196_v50 = vrot.slane %v1195_v48, 1  ;;  %v3605_v28 = vpop.permute.xlu0 %1544 }
 0x2b2   :  { %v1198_v42 = vsel %vm1197_vm11, %v1195_v48, %v1196_v50  ;;  %v1501_v50 = vrot.slane %v3603_v16, 1 }
 0x2b3   :  { %v1200_v35 = vadd.f32 %v1198_v42, %v895_v0  ;;  %v1442_v0 = vstv %s2521_s3  ;;  %v2178_v42 = vstv %s2596_s9  ;;  %s3742_s3 = sld [smem:[#allocation3 + $0x33]] }
 0x2b4   :  { %v1502_v34 = vsel %vm291_vm9, %v3603_v16, %v1501_v50  ;;  %s2576_s9 = sld [smem:[#allocation3 + $0x2e]] }
 0x2b5   :  { %2161 = vrot.lane.b32.xlu2 %v2159_v17, %s2725_s29  ;;  %2090 = vrot.lane.b32.xlu1 %v2088_v31, %s2725_s29  ;;  %v3612_v37 = vadd.f32 %v1271_v29, %v1200_v35  ;;  %v1440_v29 = vld [vmem:[#allocation2 + $0x1] ss:$2 sm:$0x3]  ;;  %v2118_v17 = vmul.f32 %v2117_v62, %v3237_v44  ;;  %v2179_v31 = vmul.f32 %v2178_v42, %v3291_v2 }
 0x2b6   :  { %v1443_v43 = vmul.f32 %v1442_v0, %v1440_v29 }
 0x2b7   :  { %v3614_v25 = vpop.permute.xlu2 %1534  ;;  %v1423_v57 = vpop.permute.xlu1 %1422 }
 0x2b8   :  { %v1424_v51 = vrot.slane %v1423_v57, 1  ;;  %v1580_v6 = vpop.permute.xlu0 %1579 }
 0x2b9   :  { %v1581_v20 = vrot.slane %v1580_v6, 1 }
 0x2ba   :  { %v1425_v32 = vsel %vm280_vm8, %v1423_v57, %v1424_v51  ;;  %v1536_v51 = vrot.slane %v3614_v25, 1 }
 0x2bb   :  { %v1427_v46 = vadd.f32 %v1425_v32, %v3529_v14  ;;  %v1582_v33 = vsel %vm236_vm4, %v1580_v6, %v1581_v20  ;;  %v1452_v14 = vsel %vm236_vm4, %v3549_v1, %v1451_v26  ;;  %v1834_v1 = vmul.f32 %v1833_v13, %v3237_v44 }
 0x2bc   :  { %v3629_v22 = vadd.f32 %v1582_v33, %v1574_v15  ;;  %v1454_v18 = vadd.f32 %v1452_v14, %v1443_v43  ;;  %v1546_v20 = vrot.slane %v3605_v28, 1  ;;  %v1997_v32 = vmul.f32 %v1996_v3, %v3291_v2 }
 0x2bd   :  { %v3631_v58 = vadd.f32 %v1435_v5, %v1427_v46  ;;  %2100 = vrot.lane.b32.xlu2 %v2098_v40, %s2728_s7  ;;  %1897 = vrot.lane.b32.xlu1 %v1895_v38, %s2724_s28  ;;  %v1926_v15 = vmul.f32 %v1925_v9, %v3237_v44  ;;  %v1537_v46 = vsel %vm258_vm6, %v3614_v25, %v1536_v51  ;;  %v2209_v44 = vstv %s2599_s13  ;;  %s2604_s13 = sld [smem:[#allocation3 + $0x30]] }
 0x2be   :  { %v1547_v40 = vsel %vm269_vm7, %v3605_v28, %v1546_v20  ;;  %v2006_v14 = vstv %s2579_s14  ;;  %v1638_v9 = vstv %s2542_s21  ;;  %s2610_s14 = sld [smem:[#allocation3 + $0x5a]] }
 0x2bf   :  { %v3637_v61 = vpop.permute.xlu2 %1564  ;;  %v1460_v12 = vpop.permute.xlu1 %1459  ;;  %v2007_v28 = vmul.f32 %v2006_v14, %v3291_v2  ;;  %s2595_s21 = sld [smem:[#allocation3 + $0x52]] }
 0x2c0   :  { %v1461_v10 = vrot.slane %v1460_v12, 1  ;;  %v1610_v47 = vpop.permute.xlu0 %1609 }
 0x2c2   :  { %v1462_v63 = vsel %vm247_vm5, %v1460_v12, %v1461_v10  ;;  %v3681_v12 = vld [vmem:[#allocation2] ss:$2 sm:$0x7] }
 0x2c3   :  { %v1464_v4 = vadd.f32 %v1462_v63, %v1454_v18  ;;  %v2210_v19 = vmul.f32 %v3681_v12, %v2209_v44  ;;  %v3733_v44 = vld [vmem:[#allocation2 + $0x1] ss:$2 sm:$0x7] }
 0x2c5   :  { %v1474_v39 = vadd.f32 %v1472_v52, %v1464_v4  ;;  %1907 = vrot.lane.b32.xlu2 %v1905_v21, %s2729_s11  ;;  %1836 = vrot.lane.b32.xlu1 %v1834_v1, %s2729_s11  ;;  %v1945_v21 = vstv %s2573_s15  ;;  %v1742_v1 = vstv %s2553_s16  ;;  %v1611_v52 = vrot.slane %v1610_v47, 1  ;;  %s2592_s15 = sld [smem:[#allocation3 + $0x3d]] }
 0x2c6   :  { %s2586_s16 = sld [smem:[#allocation3 + $0x13]] }
 0x2c7   :  { %v3651_v7 = vpop.permute.xlu2 %1599  ;;  %v1490_v30 = vpop.permute.xlu1 %1489  ;;  %v1484_v48 = vadd.f32 %v1482_v49, %v1474_v39  ;;  %v1946_v49 = vmul.f32 %v3681_v12, %v1945_v21 }
 0x2c8   :  { %v1491_v56 = vrot.slane %v1490_v30, 1  ;;  %v1601_v63 = vrot.slane %v3651_v7, 1  ;;  %v1645_v62 = vpop.permute.xlu0 %1644 }
 0x2ca   :  { %v1492_v11 = vsel %vm280_vm8, %v1490_v30, %v1491_v56  ;;  %v1743_v30 = vmul.f32 %v1742_v1, %v3291_v2  ;;  %v1612_v56 = vsel %vm269_vm7, %v1610_v47, %v1611_v52 }
 0x2cb   :  { %v1494_v35 = vadd.f32 %v1492_v11, %v1484_v48  ;;  %v1602_v48 = vsel %vm258_vm6, %v3651_v7, %v1601_v63  ;;  %v2219_v7 = vstv %s3693_s17  ;;  %v1762_v63 = vstv %s3723_s20  ;;  %s2567_s17 = sld [smem:[#allocation3 + $0x50]] }
 0x2cc   :  { %v2220_v3 = vmul.f32 %v3681_v12, %v2219_v7  ;;  %s2597_s20 = sld [smem:[#allocation3 + $0x60]] }
 0x2cd   :  { %v3659_v57 = vadd.f32 %v1502_v34, %v1494_v35  ;;  %2120 = vrot.lane.b32.xlu2 %v2118_v17, %s2729_s11  ;;  %2181 = vrot.lane.b32.xlu1 %v2179_v31, %s2724_s28  ;;  %v2290_v31 = vstv %s2607_s1  ;;  %v1646_v34 = vrot.slane %v1645_v62, 1  ;;  %s2561_s1 = sld [smem:[#allocation3 + $0x26]] }
 0x2cf   :  { %v3663_v55 = vpop.permute.xlu2 %1629  ;;  %v1525_v23 = vpop.permute.xlu1 %1524 }
 0x2d0   :  { %v1526_v6 = vrot.slane %v1525_v23, 1  ;;  %v1631_v35 = vrot.slane %v3663_v55, 1 }
 0x2d2   :  { %v1527_v16 = vsel %vm247_vm5, %v1525_v23, %v1526_v6  ;;  %v2291_v6 = vmul.f32 %v2290_v31, %v3291_v2  ;;  %v1632_v20 = vsel %vm291_vm9, %v3663_v55, %v1631_v35  ;;  %v1639_v2 = vmul.f32 %v3681_v12, %v1638_v9 }
 0x2d3   :  { %v1529_v26 = vadd.f32 %v1527_v16, %v3595_v60  ;;  %v1566_v60 = vrot.slane %v3637_v61, 1  ;;  %v1709_v35 = vstv %s3742_s3  ;;  %s2606_s3 = sld [smem:[#allocation3 + $0x3e]] }
 0x2d5   :  { %v1539_v33 = vadd.f32 %v1537_v46, %v1529_v26  ;;  %1999 = vrot.lane.b32.xlu2 %v1997_v32, %s2726_s30  ;;  %1928 = vrot.lane.b32.xlu1 %v1926_v15, %s2726_s30  ;;  %v1567_v10 = vsel %vm291_vm9, %v3637_v61, %v1566_v60  ;;  %v1647_v26 = vsel %vm236_vm4, %v1645_v62, %v1646_v34 }
 0x2d7   :  { %v3677_v38 = vpop.permute.xlu2 %1664  ;;  %v1555_v5 = vpop.permute.xlu1 %1554  ;;  %v1549_v29 = vadd.f32 %v1547_v40, %v1539_v33  ;;  %v2026_v33 = vstv %s2581_s24  ;;  %v1955_v40 = vstv %s3707_s23  ;;  %s2598_s23 = sld [smem:[#allocation3 + $0x6]] }
 0x2d8   :  { %v1556_v0 = vrot.slane %v1555_v5, 1  ;;  %v1666_v55 = vrot.slane %v3677_v38, 1  ;;  %v2027_v14 = vmul.f32 %v3733_v44, %v2026_v33  ;;  %s2589_s24 = sld [smem:[#allocation3 + $0x28]] }
 0x2da   :  { %v1557_v25 = vsel %vm280_vm8, %v1555_v5, %v1556_v0  ;;  %v1649_v5 = vadd.f32 %v1647_v26, %v1639_v2 }
 0x2db   :  { %v1559_v43 = vadd.f32 %v1557_v25, %v1549_v29  ;;  %v1675_v29 = vpop.permute.xlu0 %1674  ;;  %v1956_v25 = vmul.f32 %v3681_v12, %v1955_v40  ;;  %v2046_v40 = vstv %s2583_s10  ;;  %s2611_s10 = sld [smem:[#allocation3 + $0x61]] }
 0x2dd   :  { %v3687_v13 = vadd.f32 %v1567_v10, %v1559_v43  ;;  %2212 = vrot.lane.b32.xlu2 %v2210_v19, %s2726_s30  ;;  %2009 = vrot.lane.b32.xlu1 %v2007_v28, %s2727_s6  ;;  %v1676_v43 = vrot.slane %v1675_v29, 1  ;;  %v1667_v19 = vsel %vm258_vm6, %v3677_v38, %v1666_v55  ;;  %v2064_v10 = vstv %s3720_s25  ;;  %s2736_s25 = smov 127  }
 0x2df   :  { %v3691_v18 = vpop.permute.xlu2 %1694  ;;  %v1590_v53 = vpop.permute.xlu1 %1589  ;;  %v1677_v21 = vsel %vm269_vm7, %v1675_v29, %v1676_v43  ;;  %v2320_v43 = vstv %s2610_s14 }
 0x2e0   :  { %v1591_v4 = vrot.slane %v1590_v53, 1  ;;  %v1696_v1 = vrot.slane %v3691_v18, 1 }
 0x2e2   :  { %v1592_v61 = vsel %vm247_vm5, %v1590_v53, %v1591_v4  ;;  %v2300_v4 = vstv %s3728_s27  ;;  %s2572_s27 = sld [smem:[#allocation3 + $0x12]] }
 0x2e3   :  { %v1594_v39 = vadd.f32 %v1592_v61, %v3629_v22  ;;  %v2065_v61 = vmul.f32 %v3681_v12, %v2064_v10  ;;  %v2301_v62 = vmul.f32 %v3733_v44, %v2300_v4  ;;  %v2138_v10 = vstv %s2592_s15  ;;  %s2391_s15 = sshll.u32 %s4046_s2, 4  ;;  %s2392_s15 = int_to_ptr.hbm [resolvable:$true] %s2391_s15 }
 0x2e5   :  { %v1604_v50 = vadd.f32 %v1602_v48, %v1594_v39  ;;  %1948 = vrot.lane.b32.xlu2 %v1946_v49, %s2725_s29  ;;  %1745 = vrot.lane.b32.xlu1 %v1743_v30, %s2728_s7 }
 0x2e7   :  { %v3705_v42 = vpop.permute.xlu2 %1725  ;;  %v1620_v22 = vpop.permute.xlu1 %1619  ;;  %v1614_v11 = vadd.f32 %v1612_v56, %v1604_v50  ;;  %v1763_v56 = vmul.f32 %v3733_v44, %v1762_v63  ;;  %v2077_v63 = vstv %s2586_s16 }
 0x2e8   :  { %v1621_v17 = vrot.slane %v1620_v22, 1  ;;  %v1727_v34 = vrot.slane %v3705_v42, 1 }
 0x2ea   :  { %v1622_v23 = vsel %vm280_vm8, %v1620_v22, %v1621_v17  ;;  %v1697_v22 = vsel %vm291_vm9, %v3691_v18, %v1696_v1  ;;  %v1710_v18 = vmul.f32 %v3733_v44, %v1709_v35  ;;  %v1728_v2 = vsel %vm247_vm5, %v3705_v42, %v1727_v34 }
 0x2eb   :  { %v1624_v51 = vadd.f32 %v1622_v23, %v1614_v11  ;;  %v2047_v42 = vmul.f32 %v3733_v44, %v2046_v40  ;;  %v1884_v1 = vstv %s2567_s17 }
 0x2ed   :  { %v3716_v16 = vadd.f32 %v1632_v20, %v1624_v51  ;;  %2293 = vrot.lane.b32.xlu2 %v2291_v6, %s2727_s6  ;;  %2222 = vrot.lane.b32.xlu1 %v2220_v3, %s2727_s6  ;;  %v2239_v51 = vstv %s3746_s4  ;;  %v2036_v6 = vstv %s2582_s5  ;;  %s2580_s4 = sld [smem:[#allocation3 + $0x4a]] }
 0x2ee   :  { %v2240_v20 = vmul.f32 %v3681_v12, %v2239_v51  ;;  %v2037_v26 = vmul.f32 %v3733_v44, %v2036_v6  ;;  %s2554_s5 = sld [smem:[#allocation3 + $0x56]] }
 0x2ef   :  { %v3726_v32 = vpop.permute.xlu2 %1857  ;;  %v1655_v15 = vpop.permute.xlu1 %1654 }
 0x2f0   :  { %v1656_v46 = vrot.slane %v1655_v15, 1 }
 0x2f2   :  { %v1657_v60 = vsel %vm247_vm5, %v1655_v15, %v1656_v46  ;;  %v1732_v15 = vstv %s2552_s8  ;;  %s2601_s8 = sld [smem:[#allocation3 + $0x1b]] }
 0x2f3   :  { %v1659_v0 = vadd.f32 %v1657_v60, %v1649_v5  ;;  %v1733_v33 = vmul.f32 %v3733_v44, %v1732_v15  ;;  %v1975_v5 = vstv %s2576_s9  ;;  %v1793_v60 = vstv %s2558_s12  ;;  %s2603_s9 = sld [smem:[#allocation3 + $0x29]] }
 0x2f4   :  { %v1976_v29 = vmul.f32 %v3681_v12, %v1975_v5  ;;  %s2556_s12 = sld [smem:[#allocation3 + $0x3]] }
 0x2f5   :  { %v1669_v28 = vadd.f32 %v1667_v19, %v1659_v0  ;;  %2029 = vrot.lane.b32.xlu2 %v2027_v14, %s2728_s7  ;;  %1958 = vrot.lane.b32.xlu1 %v1956_v25, %s2728_s7  ;;  %v1794_v14 = vmul.f32 %v3681_v12, %v1793_v60  ;;  %v2259_v25 = vstv %s2604_s13  ;;  %s2570_s13 = sld [smem:[#allocation3 + $0x4]] }
 0x2f6   :  { %v2260_v19 = vmul.f32 %v3681_v12, %v2259_v25 }
 0x2f7   :  { %v2071_v47 = vpop.permute.xlu2 %2070  ;;  %v1685_v53 = vpop.permute.xlu1 %1684  ;;  %v1679_v39 = vadd.f32 %v1677_v21, %v1669_v28  ;;  %v2321_v28 = vmul.f32 %v3733_v44, %v2320_v43  ;;  %v2078_v21 = vmul.f32 %v3681_v12, %v2077_v63 }
 0x2f8   :  { %v2072_v52 = vrot.slane %v2071_v47, 1  ;;  %v1686_v38 = vrot.slane %v1685_v53, 1  ;;  %v2229_v60 = vstv %s2601_s8 }
 0x2fa   :  { %v2073_v49 = vsel %vm236_vm4, %v2071_v47, %v2072_v52  ;;  %v1687_v30 = vsel %vm280_vm8, %v1685_v53, %v1686_v38  ;;  %v2139_v53 = vmul.f32 %v3733_v44, %v2138_v10  ;;  %v1885_v38 = vmul.f32 %v3733_v44, %v1884_v1 }
 0x2fb   :  { %v3753_v48 = vadd.f32 %v2073_v49, %v2065_v61  ;;  %v1689_v50 = vadd.f32 %v1687_v30, %v1679_v39  ;;  %v1823_v61 = vstv %s2561_s1  ;;  %v2168_v30 = vstv %s2595_s21 }
 0x2fc   :  { %v1824_v49 = vmul.f32 %v3681_v12, %v1823_v61 }
 0x2fd   :  { %v1699_v11 = vadd.f32 %v1697_v22, %v1689_v50  ;;  %1765 = vrot.lane.b32.xlu2 %v1763_v56, %s2729_s11  ;;  %2303 = vrot.lane.b32.xlu1 %v2301_v62, %s2725_s29  ;;  %v2206_v50 = vstv %s2598_s23  ;;  %v2169_v62 = vmul.f32 %v3733_v44, %v2168_v30 }
 0x2ff   :  { %v3762_v17 = vpop.permute.xlu2 %1877  ;;  %v1716_v31 = vpop.permute.xlu1 %1715  ;;  %v1700_v7 = vmul.f32 %v1699_v11, %v3270_v45  ;;  %v2207_v11 = vmul.f32 %v3681_v12, %v2206_v50 }
 0x300   :  { %v1717_v23 = vrot.slane %v1716_v31, 1 }
 0x301   :  { %1702 = vrot.lane.b32.xlu0 %v1700_v7, %s2733_s0  ;;  %v2107_v7 = vstv %s2589_s24 }
 0x302   :  { %v1718_v3 = vsel %vm236_vm4, %v1716_v31, %v1717_v23  ;;  %v2108_v34 = vmul.f32 %v3681_v12, %v2107_v7  ;;  %v2188_v23 = vstv %s2597_s20 }
 0x303   :  { %v1720_v9 = vadd.f32 %v1718_v3, %v1710_v18  ;;  %v2189_v6 = vmul.f32 %v3733_v44, %v2188_v23  ;;  %v1935_v18 = vstv %s2572_s27 }
 0x304   :  { %v1936_v3 = vmul.f32 %v3681_v12, %v1935_v18 }
 0x305   :  { %2242 = vrot.lane.b32.xlu2 %v2240_v20, %s2728_s7  ;;  %2039 = vrot.lane.b32.xlu1 %v2037_v26, %s2724_s28  ;;  %v3776_v55 = vadd.f32 %v1728_v2, %v1720_v9  ;;  %v2016_v2 = vstv %s2580_s4 }
 0x306   :  { %v2017_v15 = vmul.f32 %v3733_v44, %v2016_v2 }
 0x307   :  { %v3778_v46 = vpop.permute.xlu2 %1816  ;;  %v3820_v51 = vpop.permute.xlu1 %1786 }
 0x308   :  { %v1788_v23 = vrot.slane %v3820_v51, 1 }
 0x309   :  { %1735 = vrot.lane.b32.xlu0 %v1733_v33, %s2725_s29  ;;  %v1752_v33 = vstv %s2554_s5 }
 0x30a   :  { %v1753_v5 = vmul.f32 %v3733_v44, %v1752_v33 }
 0x30d   :  { %2049 = vrot.lane.b32.xlu2 %v2047_v42, %s2729_s11  ;;  %1978 = vrot.lane.b32.xlu1 %v1976_v29, %s2729_s11 }
 0x30f   :  { %v3786_v0 = vpop.permute.xlu2 %2161  ;;  %v1868_v9 = vpop.permute.xlu1 %1867 }
 0x311   :  { %1796 = vrot.lane.b32.xlu0 %v1794_v14, %s2727_s6  ;;  %v1438_v14 = vmul.f32 %v3631_v58, %v3502_v59 }
 0x315   :  { %2262 = vrot.lane.b32.xlu2 %v2260_v19, %s2729_s11  ;;  %2323 = vrot.lane.b32.xlu1 %v2321_v28, %s2724_s28  ;;  %v2230_v28 = vmul.f32 %v3681_v12, %v2229_v60 }
 0x317   :  { %v3794_v47 = vpop.permute.xlu2 %2100  ;;  %v3828_v26 = vpop.permute.xlu1 %1806 }
 0x319   :  { %2141 = vrot.lane.b32.xlu0 %v2139_v53, %s2726_s30 }
 0x31f   :  { %v3798_v4 = vpop.permute.xlu2 %1907  ;;  %v3832_v40 = vpop.permute.xlu1 %2151 }
 0x321   :  { %2080 = vrot.lane.b32.xlu0 %v2078_v21, %s2727_s6 }
 0x327   :  { %v3802_v52 = vpop.permute.xlu2 %2120  ;;  %v3839_v43 = vpop.permute.xlu1 %2090 }
 0x329   :  { %1887 = vrot.lane.b32.xlu0 %v1885_v38, %s2728_s7 }
 0x32f   :  { %v3806_v39 = vpop.permute.xlu2 %1999  ;;  %v1898_v38 = vpop.permute.xlu1 %1897 }
 0x331   :  { %1826 = vrot.lane.b32.xlu0 %v1824_v49, %s2724_s28 }
 0x337   :  { %v2213_v56 = vpop.permute.xlu2 %2212  ;;  %v1837_v50 = vpop.permute.xlu1 %1836 }
 0x338   :  { %v2214_v22 = vrot.slane %v2213_v56, 1 }
 0x339   :  { %2171 = vrot.lane.b32.xlu0 %v2169_v62, %s2728_s7  ;;  %v2249_v62 = vstv %s2603_s9 }
 0x33a   :  { %v2215_v35 = vsel %vm236_vm4, %v2213_v56, %v2214_v22  ;;  %v1859_v22 = vrot.slane %v3726_v32, 1 }
 0x33b   :  { %v3814_v31 = vadd.f32 %v2215_v35, %v2207_v11  ;;  %v1869_v35 = vrot.slane %v1868_v9, 1 }
 0x341   :  { %1275 = vrot.lane.b32.xlu0 %v3597_v41, %s2736_s25  ;;  %v2280_v41 = vstv %s2606_s3 }
 0x342   :  { %v2281_v20 = vmul.f32 %v3733_v44, %v2280_v41  ;;  %v1780_v41 = vstv %s2556_s12 }
 0x349   :  { %2110 = vrot.lane.b32.xlu0 %v2108_v34, %s2724_s28  ;;  %v1860_v34 = vsel %vm236_vm4, %v3726_v32, %v1859_v22  ;;  %v1781_v32 = vmul.f32 %v3681_v12, %v1780_v41 }
 0x351   :  { %2191 = vrot.lane.b32.xlu0 %v2189_v6, %s2729_s11  ;;  %v2330_v6 = vstv %s2611_s10 }
 0x352   :  { %v2331_v33 = vmul.f32 %v3733_v44, %v2330_v6  ;;  %v1838_v6 = vrot.slane %v1837_v50, 1 }
 0x359   :  { %1938 = vrot.lane.b32.xlu0 %v1936_v3, %s2727_s6  ;;  %s2609_s6 = sld [smem:[#allocation3 + $0x53]]  ;;  %v3862_v3 = vpop.permute.xlu1 %2181 }
 0x35f   :  { %v2310_v49 = vstv %s2609_s6 }
 0x360   :  { %v2311_v30 = vmul.f32 %v3733_v44, %v2310_v49 }
 0x361   :  { %2283 = vrot.lane.b32.xlu0 %v2281_v20, %s2726_s30  ;;  %s2575_s30 = sld [smem:[#allocation3 + $0x27]]  ;;  %v1870_v20 = vsel %vm247_vm5, %v1868_v9, %v1869_v35  ;;  %v3877_v49 = vpop.permute.xlu1 %1928 }
 0x367   :  { %v1965_v63 = vstv %s2575_s30 }
 0x368   :  { %v1966_v58 = vmul.f32 %v3681_v12, %v1965_v63 }
 0x369   :  { %2019 = vrot.lane.b32.xlu0 %v2017_v15, %s2725_s29 }
 0x371   :  { %1755 = vrot.lane.b32.xlu0 %v1753_v5, %s2724_s28  ;;  %v1879_v5 = vrot.slane %v3762_v17, 1 }
 0x373   :  { %v1703_v42 = vpop.permute.xlu0 %1702  ;;  %v1880_v9 = vsel %vm258_vm6, %v3762_v17, %v1879_v5 }
 0x374   :  { %v1704_v29 = vrot.slane %v1703_v42, 1 }
 0x376   :  { %v1705_v25 = vsel %vm587_vm10, %v1703_v42, %v1704_v29  ;;  %v1789_v42 = vsel %vm236_vm4, %v3820_v51, %v1788_v23  ;;  %v1909_v51 = vrot.slane %v3798_v4, 1 }
 0x377   :  { %v3841_v19 = vadd.f32 %v1705_v25, %v1438_v14  ;;  %v1791_v14 = vadd.f32 %v1789_v42, %v1781_v32 }
 0x379   :  { %2232 = vrot.lane.b32.xlu0 %v2230_v28, %s2725_s29  ;;  %s2563_s29 = sld [smem:[#allocation3 + $0x34]]  ;;  %v1808_v28 = vrot.slane %v3828_v26, 1 }
 0x37b   :  { %v1736_v10 = vpop.permute.xlu0 %1735 }
 0x37c   :  { %v1737_v53 = vrot.slane %v1736_v10, 1 }
 0x37e   :  { %v1738_v21 = vsel %vm258_vm6, %v1736_v10, %v1737_v53  ;;  %v1899_v10 = vrot.slane %v1898_v38, 1 }
 0x37f   :  { %v3847_v1 = vadd.f32 %v1738_v21, %v3776_v55  ;;  %v2250_v55 = vmul.f32 %v3681_v12, %v2249_v62  ;;  %v1851_v11 = vstv %s2563_s29  ;;  %v1809_v62 = vsel %vm258_vm6, %v3828_v26, %v1808_v28 }
 0x380   :  { %v1852_v18 = vmul.f32 %v3733_v44, %v1851_v11  ;;  %v1900_v17 = vsel %vm280_vm8, %v1898_v38, %v1899_v10  ;;  %v1910_v11 = vsel %vm291_vm9, %v3798_v4, %v1909_v51  ;;  %v1839_v38 = vsel %vm291_vm9, %v1837_v50, %v1838_v6 }
 0x381   :  { %1968 = vrot.lane.b32.xlu0 %v1966_v58, %s2724_s28 }
 0x382   :  { %v1862_v15 = vadd.f32 %v1860_v34, %v1852_v18 }
 0x383   :  { %v1797_v61 = vpop.permute.xlu0 %1796 }
 0x384   :  { %v1798_v2 = vrot.slane %v1797_v61, 1  ;;  %v1872_v29 = vadd.f32 %v1870_v20, %v1862_v15  ;;  %v3891_v15 = vpop.permute.xlu1 %2009 }
 0x386   :  { %v1799_v60 = vsel %vm247_vm5, %v1797_v61, %v1798_v2  ;;  %v1882_v21 = vadd.f32 %v1880_v9, %v1872_v29  ;;  %v1818_v61 = vrot.slane %v3778_v46, 1 }
 0x387   :  { %v1801_v63 = vadd.f32 %v1799_v60, %v1791_v14 }
 0x388   :  { %v1819_v23 = vsel %vm269_vm7, %v3778_v46, %v1818_v61 }
 0x389   :  { %2313 = vrot.lane.b32.xlu0 %v2311_v30, %s2728_s7  ;;  %s2605_s7 = sld [smem:[#allocation3 + $0x37]] }
 0x38b   :  { %v3853_v56 = vpop.permute.xlu0 %2141 }
 0x38c   :  { %v2143_v32 = vrot.slane %v3853_v56, 1  ;;  %v3899_v14 = vpop.permute.xlu1 %1745 }
 0x38e   :  { %v2144_v9 = vsel %vm236_vm4, %v3853_v56, %v2143_v32 }
 0x391   :  { %2252 = vrot.lane.b32.xlu0 %v2250_v55, %s2724_s28  ;;  %v1811_v55 = vadd.f32 %v1809_v62, %v1801_v63  ;;  %s2591_s28 = sld [smem:[#allocation3 + $0x36]]  ;;  %v2153_v63 = vrot.slane %v3832_v40, 1  ;;  %v2163_v62 = vrot.slane %v3786_v0, 1 }
 0x393   :  { %v2081_v7 = vpop.permute.xlu0 %2080  ;;  %v1821_v41 = vadd.f32 %v1819_v23, %v1811_v55  ;;  %v2164_v23 = vsel %vm258_vm6, %v3786_v0, %v2163_v62 }
 0x394   :  { %v2082_v42 = vrot.slane %v2081_v7, 1 }
 0x396   :  { %v2083_v60 = vsel %vm247_vm5, %v2081_v7, %v2082_v42 }
 0x397   :  { %v2135_v29 = vstv %s2591_s28 }
 0x398   :  { %v2136_v10 = vmul.f32 %v3733_v44, %v2135_v29 }
 0x399   :  { %2333 = vrot.lane.b32.xlu0 %v2331_v33, %s2729_s11  ;;  %v3893_v33 = vpop.permute.xlu2 %1948  ;;  %s2577_s11 = sld [smem:[#allocation3 + $0x35]] }
 0x39b   :  { %v1888_v25 = vpop.permute.xlu0 %1887 }
 0x39c   :  { %v1889_v53 = vrot.slane %v1888_v25, 1 }
 0x39e   :  { %v1890_v58 = vsel %vm269_vm7, %v1888_v25, %v1889_v53  ;;  %v2092_v25 = vrot.slane %v3839_v43, 1  ;;  %v2085_v53 = vadd.f32 %v2083_v60, %v3753_v48 }
 0x39f   :  { %v1892_v30 = vadd.f32 %v1890_v58, %v1882_v21  ;;  %v2146_v21 = vadd.f32 %v2144_v9, %v2136_v10  ;;  %v2102_v58 = vrot.slane %v3794_v47, 1 }
 0x3a1   :  { %v1902_v22 = vadd.f32 %v1900_v17, %v1892_v30  ;;  %v2093_v30 = vsel %vm258_vm6, %v3839_v43, %v2092_v25  ;;  %v2154_v17 = vsel %vm247_vm5, %v3832_v40, %v2153_v63 }
 0x3a2   :  { %v2095_v56 = vadd.f32 %v2093_v30, %v2085_v53  ;;  %v2156_v55 = vadd.f32 %v2154_v17, %v2146_v21  ;;  %v2277_v30 = vstv %s2605_s7  ;;  %v2001_v17 = vrot.slane %v3806_v39, 1 }
 0x3a3   :  { %v1912_v35 = vadd.f32 %v1910_v11, %v1902_v22  ;;  %v1827_v34 = vpop.permute.xlu0 %1826  ;;  %v2103_v11 = vsel %vm269_vm7, %v3794_v47, %v2102_v58 }
 0x3a4   :  { %v1828_v18 = vrot.slane %v1827_v34, 1  ;;  %v2105_v43 = vadd.f32 %v2103_v11, %v2095_v56  ;;  %v2278_v11 = vmul.f32 %v3733_v44, %v2277_v30 }
 0x3a5   :  { %v1913_v20 = vmul.f32 %v1912_v35, %v3296_v36 }
 0x3a6   :  { %v1829_v2 = vsel %vm280_vm8, %v1827_v34, %v1828_v18  ;;  %v3920_v34 = vpop.permute.xlu1 %2222 }
 0x3a7   :  { %v1831_v26 = vadd.f32 %v1829_v2, %v1821_v41  ;;  %1915 = vrot.lane.b32.xlu2 %v1913_v20, %s2733_s0  ;;  %v2166_v41 = vadd.f32 %v2164_v23, %v2156_v55  ;;  %v2183_v2 = vrot.slane %v3862_v3, 1 }
 0x3a9   :  { %v1841_v4 = vadd.f32 %v1839_v38, %v1831_v26 }
 0x3ab   :  { %v1842_v46 = vmul.f32 %v1841_v4, %v3296_v36  ;;  %v2172_v5 = vpop.permute.xlu0 %2171  ;;  %v3904_v36 = vpop.permute.xlu2 %2293 }
 0x3ac   :  { %v2173_v48 = vrot.slane %v2172_v5, 1 }
 0x3ad   :  { %1844 = vrot.lane.b32.xlu1 %v1842_v46, %s2733_s0 }
 0x3ae   :  { %v2174_v6 = vsel %vm269_vm7, %v2172_v5, %v2173_v48  ;;  %v2184_v5 = vsel %vm280_vm8, %v3862_v3, %v2183_v2  ;;  %v2295_v48 = vrot.slane %v3904_v36, 1 }
 0x3af   :  { %v2176_v38 = vadd.f32 %v2174_v6, %v2166_v41 }
 0x3b0   :  { %v2296_v2 = vsel %vm247_vm5, %v3904_v36, %v2295_v48  ;;  %v1922_v48 = vstv %s2570_s13 }
 0x3b1   :  { %v2186_v29 = vadd.f32 %v2184_v5, %v2176_v38 }
 0x3b3   :  { %v1276_v50 = vpop.permute.xlu0 %1275  ;;  %v3926_v18 = vpop.permute.xlu2 %2029 }
 0x3b4   :  { %v1277_v28 = vrot.slane %v1276_v50, 1 }
 0x3b6   :  { %v1279_v7 = vsel %vm1278_vm12, %v1276_v50, %v1277_v28 }
 0x3b7   :  { %v1281_v51 = vadd.f32 %v1279_v7, %v3612_v37  ;;  %v2122_v37 = vrot.slane %v3802_v52, 1 }
 0x3b9   :  { %v2514_v61 = vmul.f32 -1.442695, %v1281_v51  ;;  %v2123_v47 = vsel %vm291_vm9, %v3802_v52, %v2122_v37  ;;  %v3936_v52 = vpop.permute.xlu1 %1958 }
 0x3bb   :  { %2637 = vpow2.f32 %v2514_v61  ;;  %v2111_v22 = vpop.permute.xlu0 %2110  ;;  %v3938_v25 = vpop.permute.xlu2 %1765 }
 0x3bc   :  { %v2112_v35 = vrot.slane %v2111_v22, 1  ;;  %v1767_v30 = vrot.slane %v3938_v25, 1 }
 0x3be   :  { %v2113_v40 = vsel %vm280_vm8, %v2111_v22, %v2112_v35  ;;  %v1993_v35 = vstv %s2577_s11 }
 0x3bf   :  { %v2115_v20 = vadd.f32 %v2113_v40, %v2105_v43  ;;  %v2011_v43 = vrot.slane %v3891_v15, 1  ;;  %v1301_v40 = vld [vmem:[#allocation7] sm:$0xff] }
 0x3c1   :  { %v2638_v26 = vpop.eup %2637  ;;  %v2125_v4 = vadd.f32 %v2123_v47, %v2115_v20  ;;  %v3944_v51 = vpop.permute.xlu1 %2303  ;;  %v2002_v47 = vsel %vm236_vm4, %v3806_v39, %v2001_v17 }
 0x3c2   :  { %v1285_v46 = vadd.f32 1.0, %v2638_v26  ;;  %v1994_v26 = vmul.f32 %v3733_v44, %v1993_v35 }
 0x3c3   :  { %v2126_v42 = vmul.f32 %v2125_v4, %v3324_v8  ;;  %v2192_v0 = vpop.permute.xlu0 %2191  ;;  %v3946_v56 = vpop.permute.xlu2 %2242 }
 0x3c4   :  { %2639 = vrcp.f32 %v1285_v46  ;;  %v2193_v32 = vrot.slane %v2192_v0, 1  ;;  %v1297_v63 = vand.u32 2147483648, %v1285_v46  ;;  %v1295_v21 = vand.u32 2147483647, %v1285_v46 }
 0x3c5   :  { %2128 = vrot.lane.b32.xlu0 %v2126_v42, %s2734_s22  ;;  %vm1291_vm14 = vweird.f32 %v1285_v46 }
 0x3c6   :  { %v2194_v60 = vsel %vm291_vm9, %v2192_v0, %v2193_v32  ;;  %vm1296_vm1 = vcmp.eq.f32.partialorder %v1295_v21, 8.507059e+37  ;;  %v2004_v0 = vadd.f32 %v2002_v47, %v1994_v26 }
 0x3c7   :  { %v2196_v50 = vadd.f32 %v2194_v60, %v2186_v29  ;;  %v2031_v29 = vrot.slane %v3926_v18, 1 }
 0x3c9   :  { %v2197_v9 = vmul.f32 %v2196_v50, %v3324_v8  ;;  %v1298_v8 = vor.u32 1.1754944e-38, %v1297_v63  ;;  %v2040_v5 = vpop.permute.xlu1 %2039 }
 0x3ca   :  { %v2640_v28 = vpop.eup %2639  ;;  %v2041_v36 = vrot.slane %v2040_v5, 1 }
 0x3cb   :  { %v1287_v10 = vmul.f32 %v2640_v28, %v1285_v46  ;;  %2199 = vrot.lane.b32.xlu1 %v2197_v9, %s2734_s22  ;;  %v3942_v3 = vpop.permute.xlu0 %1938  ;;  %vm1292_vm13 = vweird.f32 %v2640_v28  ;;  %v2012_v46 = vsel %vm247_vm5, %v3891_v15, %v2011_v43  ;;  %v2050_v50 = vpop.permute.xlu2 %2049  ;;  %v1747_v15 = vrot.slane %v3899_v14, 1 }
 0x3cc   :  { %vm1293_vm15 = vmor %vm1291_vm14, %vm1292_vm13  ;;  %v2014_v39 = vadd.f32 %v2012_v46, %v2004_v0  ;;  %v2042_v63 = vsel %vm280_vm8, %v2040_v5, %v2041_v36  ;;  %v1923_v43 = vmul.f32 %v3681_v12, %v1922_v48  ;;  %v1960_v12 = vrot.slane %v3936_v52, 1 }
 0x3cd   :  { %v1288_v53 = vsub.f32 1.0, %v1287_v10  ;;  %v2051_v10 = vrot.slane %v2050_v50, 1  ;;  %v2224_v5 = vrot.slane %v3920_v34, 1 }
 0x3cf   :  { %v1289_v7 = vmul.f32 %v2640_v28, %v1288_v53 }
 0x3d1   :  { %v1290_v58 = vadd.f32 %v2640_v28, %v1289_v7  ;;  %v1930_v7 = vrot.slane %v3877_v49, 1 }
 0x3d3   :  { %v2284_v61 = vpop.permute.xlu0 %2283  ;;  %v1294_v62 = vsel %vm1293_vm15, %v2640_v28, %v1290_v58  ;;  %v2032_v28 = vsel %vm269_vm7, %v3926_v18, %v2031_v29  ;;  %v1931_v35 = vsel %vm236_vm4, %v3877_v49, %v1930_v7 }
 0x3d4   :  { %v2285_v55 = vrot.slane %v2284_v61, 1  ;;  %v1299_v22 = vsel %vm1296_vm1, %v1298_v8, %v1294_v62  ;;  %v1748_v8 = vsel %vm269_vm7, %v3899_v14, %v1747_v15  ;;  %v1768_v14 = vsel %vm291_vm9, %v3938_v25, %v1767_v30  ;;  %v1979_v25 = vpop.permute.xlu1 %1978 }
 0x3d5   :  { %v1304_v37 = vperm.slane %v1299_v22, 1  ;;  %v1303_v41 = vperm.slane %v1299_v22, 0  ;;  %v1750_v18 = vadd.f32 %v1748_v8, %v3847_v1  ;;  %v2305_v15 = vrot.slane %v3944_v51, 1 }
 0x3d6   :  { %v2286_v23 = vsel %vm236_vm4, %v2284_v61, %v2285_v55  ;;  %v2052_v61 = vsel %vm291_vm9, %v2050_v50, %v2051_v10  ;;  %v1940_v55 = vrot.slane %v3942_v3, 1  ;;  %v2225_v50 = vsel %vm247_vm5, %v3920_v34, %v2224_v5 }
 0x3d7   :  { %v2288_v6 = vadd.f32 %v2286_v23, %v2278_v11  ;;  %v1305_v20 = vrot.slane %v1304_v37, 4  ;;  %v2227_v36 = vadd.f32 %v2225_v50, %v3814_v31 }
 0x3d8   :  { %v1941_v1 = vsel %vm247_vm5, %v3942_v3, %v1940_v55  ;;  %v1961_v3 = vsel %vm269_vm7, %v3936_v52, %v1960_v12 }
 0x3d9   :  { %v3958_v38 = vadd.f32 %v2296_v2, %v2288_v6  ;;  %v1306_v4 = vsel %vm161_vm0, %v1303_v41, %v1305_v20  ;;  %v1933_v6 = vadd.f32 %v1931_v35, %v1923_v43  ;;  %v1950_v20 = vrot.slane %v3893_v33, 1 }
 0x3da   :  { %v1308_v42 = vmul.f32 %v1306_v4, %v1301_v40  ;;  %v1980_v4 = vrot.slane %v1979_v25, 1 }
 0x3db   :  { %v2020_v32 = vpop.permute.xlu0 %2019  ;;  %v1943_v47 = vadd.f32 %v1941_v1, %v1933_v6  ;;  %v1951_v49 = vsel %vm258_vm6, %v3893_v33, %v1950_v20 }
 0x3dc   :  { %v2021_v60 = vrot.slane %v2020_v32, 1  ;;  %1309 = vst [vmem:[#allocation8] sm:$0xff] %v1308_v42  ;;  %v2324_v34 = vpop.permute.xlu1 %2323 }
 0x3dd   :  { %v1953_v2 = vadd.f32 %v1951_v49, %v1943_v47  ;;  %v1635_v47 = vmul.f32 %v3716_v16, %v3540_v27  ;;  %v1570_v49 = vmul.f32 %v3687_v13, %v3540_v27 }
 0x3de   :  { %v2022_v44 = vsel %vm258_vm6, %v2020_v32, %v2021_v60  ;;  %v1981_v32 = vsel %vm291_vm9, %v1979_v25, %v1980_v4 }
 0x3df   :  { %v2024_v9 = vadd.f32 %v2022_v44, %v2014_v39  ;;  %v2244_v44 = vrot.slane %v3946_v56, 1 }
 0x3e1   :  { %v2034_v53 = vadd.f32 %v2032_v28, %v2024_v9  ;;  %v2263_v9 = vpop.permute.xlu2 %2262 }
 0x3e3   :  { %v2044_v21 = vadd.f32 %v2042_v63, %v2034_v53  ;;  %v1756_v58 = vpop.permute.xlu0 %1755  ;;  %v2264_v63 = vrot.slane %v2263_v9, 1 }
 0x3e4   :  { %v1757_v62 = vrot.slane %v1756_v58, 1 }
 0x3e5   :  { %v2054_v17 = vadd.f32 %v2052_v61, %v2044_v21 }
 0x3e6   :  { %v1758_v22 = vsel %vm280_vm8, %v1756_v58, %v1757_v62  ;;  %v2306_v58 = vsel %vm258_vm6, %v3944_v51, %v2305_v15  ;;  %v2265_v62 = vsel %vm291_vm9, %v2263_v9, %v2264_v63 }
 0x3e7   :  { %v1760_v11 = vadd.f32 %v1758_v22, %v1750_v18  ;;  %v2055_v37 = vmul.f32 %v2054_v17, %v3313_v24  ;;  %v2308_v8 = vadd.f32 %v2306_v58, %v3958_v38  ;;  %v2325_v17 = vrot.slane %v2324_v34, 1 }
 0x3e9   :  { %v1770_v23 = vadd.f32 %v1768_v14, %v1760_v11  ;;  %2057 = vrot.lane.b32.xlu1 %v2055_v37, %s2734_s22  ;;  %v2326_v22 = vsel %vm280_vm8, %v2324_v34, %v2325_v17 }
 0x3eb   :  { %v1771_v40 = vmul.f32 %v1770_v23, %v3270_v45  ;;  %v2233_v41 = vpop.permute.xlu0 %2232  ;;  %v1963_v45 = vadd.f32 %v1961_v3, %v1953_v2 }
 0x3ec   :  { %v2234_v33 = vrot.slane %v2233_v41, 1 }
 0x3ed   :  { %1773 = vrot.lane.b32.xlu2 %v1771_v40, %s2733_s0  ;;  %s2737_s0 = smov [#allocation8]  }
 0x3ee   :  { %v2235_v52 = vsel %vm258_vm6, %v2233_v41, %v2234_v33 }
 0x3ef   :  { %v2237_v28 = vadd.f32 %v2235_v52, %v2227_v36 }
 0x3f3   :  { %v1969_v26 = vpop.permute.xlu0 %1968 }
 0x3f4   :  { %v1970_v46 = vrot.slane %v1969_v26, 1 }
 0x3f6   :  { %v1971_v42 = vsel %vm280_vm8, %v1969_v26, %v1970_v46 }
 0x3f7   :  { %v1973_v0 = vadd.f32 %v1971_v42, %v1963_v45 }
 0x3f9   :  { %v1983_v29 = vadd.f32 %v1981_v32, %v1973_v0 }
 0x3fb   :  { %v1984_v60 = vmul.f32 %v1983_v29, %v3313_v24  ;;  %v2314_v39 = vpop.permute.xlu0 %2313  ;;  %v2245_v24 = vsel %vm269_vm7, %v3946_v56, %v2244_v44 }
 0x3fc   :  { %v2315_v10 = vrot.slane %v2314_v39, 1  ;;  %v2247_v21 = vadd.f32 %v2245_v24, %v2237_v28 }
 0x3fd   :  { %1986 = vrot.lane.b32.xlu0 %v1984_v60, %s2734_s22  ;;  %v1505_v60 = vmul.f32 %v3659_v57, %v3502_v59  ;;  %s2389_s22 = sshll.u32 %s2737_s0, 4  ;;  %s2390_s22 = int_to_ptr.vmem [resolvable:$true] %s2389_s22 }
 0x3fe   :  { %v2316_v31 = vsel %vm269_vm7, %v2314_v39, %v2315_v10 }
 0x3ff   :  { %v2318_v18 = vadd.f32 %v2316_v31, %v2308_v8 }
 0x401   :  { %v2328_v37 = vadd.f32 %v2326_v22, %v2318_v18  ;;  %v1916_v14 = vpop.permute.xlu2 %1915 }
 0x402   :  { %v1917_v1 = vrot.slane %v1916_v14, 1 }
 0x403   :  { %v2253_v53 = vpop.permute.xlu0 %2252 }
 0x404   :  { %v2254_v7 = vrot.slane %v2253_v53, 1  ;;  %v1918_v41 = vsel %vm587_vm10, %v1916_v14, %v1917_v1 }
 0x405   :  { %v1920_v2 = vadd.f32 %v1918_v41, %v1635_v47 }
 0x406   :  { %v2255_v30 = vsel %vm280_vm8, %v2253_v53, %v2254_v7 }
 0x407   :  { %v2257_v61 = vadd.f32 %v2255_v30, %v2247_v21 }
 0x409   :  { %v2267_v48 = vadd.f32 %v2265_v62, %v2257_v61 }
 0x40b   :  { %v2268_v56 = vmul.f32 %v2267_v48, %v3336_v54  ;;  %v2334_v55 = vpop.permute.xlu0 %2333 }
 0x40c   :  { %v2335_v11 = vrot.slane %v2334_v55, 1 }
 0x40d   :  { %2270 = vrot.lane.b32.xlu2 %v2268_v56, %s2735_s26 }
 0x40e   :  { %v2336_v51 = vsel %vm291_vm9, %v2334_v55, %v2335_v11  ;;  %v2375_v11 = vld [vmem:[#allocation7 + $0x8] sm:$0xff] }
 0x40f   :  { %v2338_v35 = vadd.f32 %v2336_v51, %v2328_v37 }
 0x411   :  { %v2339_v38 = vmul.f32 %v2338_v35, %v3336_v54 }
 0x413   :  { %2341 = vrot.lane.b32.xlu0 %v2339_v38, %s2735_s26 }
 0x41f   :  { %v1845_v43 = vpop.permute.xlu1 %1844 }
 0x420   :  { %v1846_v6 = vrot.slane %v1845_v43, 1 }
 0x422   :  { %v1847_v20 = vsel %vm587_vm10, %v1845_v43, %v1846_v6 }
 0x423   :  { %v1849_v26 = vadd.f32 %v1847_v20, %v1570_v49 }
 0x437   :  { %v2129_v23 = vpop.permute.xlu0 %2128 }
 0x438   :  { %v2130_v40 = vrot.slane %v2129_v23, 1 }
 0x43a   :  { %v2131_v54 = vsel %vm892_vm3, %v2129_v23, %v2130_v40 }
 0x43b   :  { %v2133_v4 = vadd.f32 %v2131_v54, %v1849_v26 }
 0x43d   :  { %v2200_v12 = vpop.permute.xlu1 %2199 }
 0x43e   :  { %v2201_v25 = vrot.slane %v2200_v12, 1 }
 0x440   :  { %v2202_v3 = vsel %vm892_vm3, %v2200_v12, %v2201_v25 }
 0x441   :  { %v2204_v46 = vadd.f32 %v2202_v3, %v1920_v2 }
 0x443   :  { %v2348_v45 = vadd.f32 %v2204_v46, %v2133_v4 }
 0x445   :  { %2350 = vrot.lane.b32.xlu1 %v2348_v45, %s2736_s25 }
 0x447   :  { %v1774_v42 = vpop.permute.xlu2 %1773 }
 0x448   :  { %v1775_v16 = vrot.slane %v1774_v42, 1 }
 0x44a   :  { %v1776_v13 = vsel %vm587_vm10, %v1774_v42, %v1775_v16 }
 0x44b   :  { %v1778_v52 = vadd.f32 %v1776_v13, %v1505_v60 }
 0x45b   :  { %v2058_v5 = vpop.permute.xlu1 %2057 }
 0x45c   :  { %v2059_v29 = vrot.slane %v2058_v5, 1 }
 0x45e   :  { %v2060_v39 = vsel %vm892_vm3, %v2058_v5, %v2059_v29 }
 0x45f   :  { %v2062_v28 = vadd.f32 %v2060_v39, %v1778_v52 }
 0x467   :  { %v2271_v27 = vpop.permute.xlu2 %2270 }
 0x468   :  { %v2272_v50 = vrot.slane %v2271_v27, 1 }
 0x46a   :  { %v2273_v15 = vsel %vm1197_vm11, %v2271_v27, %v2272_v50 }
 0x46f   :  { %v1987_v0 = vpop.permute.xlu0 %1986 }
 0x470   :  { %v1988_v32 = vrot.slane %v1987_v0, 1 }
 0x472   :  { %v1989_v33 = vsel %vm892_vm3, %v1987_v0, %v1988_v32 }
 0x473   :  { %v1991_v36 = vadd.f32 %v1989_v33, %v3841_v19 }
 0x475   :  { %v2275_v53 = vadd.f32 %v2273_v15, %v1991_v36 }
 0x485   :  { %v2342_v44 = vpop.permute.xlu0 %2341 }
 0x486   :  { %v2343_v9 = vrot.slane %v2342_v44, 1 }
 0x488   :  { %v2344_v10 = vsel %vm1197_vm11, %v2342_v44, %v2343_v9 }
 0x489   :  { %v2346_v24 = vadd.f32 %v2344_v10, %v2062_v28 }
 0x48b   :  { %v2347_v63 = vadd.f32 %v2346_v24, %v2275_v53 }
 0x4b7   :  { %v2351_v7 = vpop.permute.xlu1 %2350 }
 0x4b8   :  { %v2352_v34 = vrot.slane %v2351_v7, 1 }
 0x4ba   :  { %v2353_v59 = vsel %vm1278_vm12, %v2351_v7, %v2352_v34 }
 0x4bb   :  { %v2355_v57 = vadd.f32 %v2353_v59, %v2347_v63 }
 0x4bd   :  { %v2612_v21 = vmul.f32 -1.442695, %v2355_v57 }
 0x4bf   :  { %2641 = vpow2.f32 %v2612_v21 }
 0x4c5   :  { %v2642_v58 = vpop.eup %2641 }
 0x4c6   :  { %v2359_v31 = vadd.f32 1.0, %v2642_v58 }
 0x4c8   :  { %2643 = vrcp.f32 %v2359_v31  ;;  %v2371_v61 = vand.u32 2147483648, %v2359_v31  ;;  %v2369_v17 = vand.u32 2147483647, %v2359_v31  ;;  %vm2365_vm5 = vweird.f32 %v2359_v31 }
 0x4ca   :  { %v2372_v48 = vor.u32 1.1754944e-38, %v2371_v61  ;;  %vm2370_vm7 = vcmp.eq.f32.partialorder %v2369_v17, 8.507059e+37 }
 0x4ce   :  { %v2644_v19 = vpop.eup %2643 }
 0x4cf   :  { %v2361_v30 = vmul.f32 %v2644_v19, %v2359_v31  ;;  %vm2366_vm4 = vweird.f32 %v2644_v19 }
 0x4d0   :  { %vm2367_vm6 = vmor %vm2365_vm5, %vm2366_vm4 }
 0x4d1   :  { %v2362_v8 = vsub.f32 1.0, %v2361_v30 }
 0x4d3   :  { %v2363_v62 = vmul.f32 %v2644_v19, %v2362_v8 }
 0x4d5   :  { %v2364_v18 = vadd.f32 %v2644_v19, %v2363_v62 }
 0x4d7   :  { %v2368_v56 = vsel %vm2367_vm6, %v2644_v19, %v2364_v18 }
 0x4d8   :  { %v2373_v55 = vsel %vm2370_vm7, %v2372_v48, %v2368_v56 }
 0x4d9   :  { %v2378_v22 = vperm.slane %v2373_v55, 1  ;;  %v2377_v37 = vperm.slane %v2373_v55, 0 }
 0x4db   :  { %v2379_v51 = vrot.slane %v2378_v22, 4 }
 0x4dd   :  { %v2380_v35 = vsel %vm161_vm0, %v2377_v37, %v2379_v51 }
 0x4de   :  { %v2382_v38 = vmul.f32 %v2380_v35, %v2375_v11 }
 0x4e0   :  { %2384 = vst [vmem:[#allocation8 + $0x8] sm:$0xff] %v2382_v38 }
 0x4e1   :  { %2397 = dma.vmem_to_hbm [thread:$0]  %s2390_s22, 256, %s2392_s15, [#allocation5], %s2716_s18, %s2716_s18, %s2717_s19  }
 0x4e2   :  { %2712 = dma.done.wait [#allocation5], 256  }
 0x4e3   :  { %2713 = vsyncadd [#allocation5], 4294967040 }
 0x4e4   :  { %2402 = vsyncpa [#allocation4], 1 }
 0x4e5   :  { %2403 = vsyncpa [#allocation5], 1 }
 0x4e6   :  { %2404 = vsyncpa [#allocation6], 1 }

</bundles_post_ra>
